<compile_context>
chip_gen: v7x
topology: tpu7x:2x2x1
jax: 0.10.0
libtpu: 0.0.40
codegen_flags: <defaults>
</compile_context>

<pallas_src>
import jax
import jax.numpy as jnp
from jax import lax
from jax.experimental import pallas as pl
from jax.experimental.pallas import tpu as pltpu

EPS = 1e-5                      # nn.InstanceNorm2d default eps
LANE = 128                      # TPU lane width
SUBLANE = 8                     # TPU sublane width (f32)
MAX_ROW_TILE = 512              # spatial rows per grid step
VMEM_LIMIT = 48 * 1024 * 1024   # leaves headroom on v7x's 64 MiB VMEM


def _ceil_to(x, m):
    return ((x + m - 1) // m) * m


# ----------------------------------------------------------------------------
# Pallas kernels
# ----------------------------------------------------------------------------
def _make_plain_kernel(activation):
    """(patches @ W + b) -> activation.  Fully tiled output (no InstanceNorm)."""

    def kernel(p_ref, w_ref, b_ref, o_ref):
        # p_ref: (1, TR, CKp) bf16; w_ref: (CKp, COp) bf16; b_ref: (1, COp) f32
        y = jnp.dot(p_ref[0], w_ref[...], preferred_element_type=jnp.float32)
        y = y + b_ref[...]
        if activation == "relu":
            y = jnp.maximum(y, 0.0)
        elif activation == "tanh":
            y = jnp.tanh(y)
        o_ref[0] = y.astype(o_ref.dtype)

    return kernel


def _make_norm_kernel(activation, add_res, n_rows, row_tile, needs_mask):
    """(patches @ W + b) with one-pass InstanceNorm across row tiles.

    Row tiles accumulate per-channel sum / sum-of-squares in VMEM scratch and
    stash the pre-norm result into the VMEM-resident output block; the last
    row tile normalizes (biased var, eps=1e-5), applies the activation and the
    optional residual skip, all in f32."""
    inv_n = 1.0 / float(n_rows)

    def body(p_ref, w_ref, b_ref, r_ref, o_ref, s_sum, s_sq):
        r = pl.program_id(1)
        nrt = pl.num_programs(1)

        @pl.when(r == 0)
        def _():
            s_sum[...] = jnp.zeros_like(s_sum)
            s_sq[...] = jnp.zeros_like(s_sq)

        row0 = pl.multiple_of(r * row_tile, row_tile)
        y = jnp.dot(p_ref[0], w_ref[...], preferred_element_type=jnp.float32)
        y = y + b_ref[...]
        if needs_mask:
            rows = row0 + lax.broadcasted_iota(jnp.int32, (row_tile, 1), 0)
            y = jnp.where(rows < n_rows, y, 0.0)   # keep padded rows out of stats

        o_ref[0, pl.ds(row0, row_tile), :] = y     # stash pre-norm result
        s_sum[...] += jnp.sum(y, axis=0, keepdims=True)
        s_sq[...] += jnp.sum(y * y, axis=0, keepdims=True)

        @pl.when(r == nrt - 1)
        def _():
            mean = s_sum[...] * inv_n                       # (1, COp)
            var = s_sq[...] * inv_n - mean * mean           # E[x^2] - mean^2
            scale = lax.rsqrt(jnp.maximum(var, 0.0) + EPS)
            z = (o_ref[0] - mean) * scale
            if activation == "relu":
                z = jnp.maximum(z, 0.0)
            elif activation == "tanh":
                z = jnp.tanh(z)
            if r_ref is not None:
                z = z + r_ref[0]                            # residual skip
            o_ref[0] = z.astype(o_ref.dtype)

    if add_res:
        def kernel(p_ref, w_ref, b_ref, r_ref, o_ref, s_sum, s_sq):
            body(p_ref, w_ref, b_ref, r_ref, o_ref, s_sum, s_sq)
    else:
        def kernel(p_ref, w_ref, b_ref, o_ref, s_sum, s_sq):
            body(p_ref, w_ref, b_ref, None, o_ref, s_sum, s_sq)
    return kernel


def conv_matmul(patches, wmat, bias, *, do_norm=False, activation="none",
                residual=None):
    """patches: (N, HW, CK), wmat: (CK, Cout), bias: (Cout,),
    residual: optional (N, HW, Cout).  Returns (N, HW, Cout) float32."""
    N, HW, CK = patches.shape
    Cout = wmat.shape[1]

    # Lane-dense / sublane-aligned padding.
    ckp = _ceil_to(CK, LANE)
    cop = _ceil_to(Cout, LANE)
    row_tile = min(MAX_ROW_TILE, _ceil_to(HW, SUBLANE))
    hwp = _ceil_to(HW, row_tile)
    nrt = hwp // row_tile

    # bf16 MXU operands; bias / epilogue stay f32.
    p = jnp.pad(patches.astype(jnp.float32),
                ((0, 0), (0, hwp - HW), (0, ckp - CK))).astype(jnp.bfloat16)
    w = jnp.pad(wmat.astype(jnp.float32),
                ((0, ckp - CK), (0, cop - Cout))).astype(jnp.bfloat16)
    b = jnp.pad(bias.astype(jnp.float32), (0, cop - Cout)).reshape(1, cop)

    in_specs = [
        pl.BlockSpec((1, row_tile, ckp), lambda n, r: (n, r, 0)),
        pl.BlockSpec((ckp, cop), lambda n, r: (0, 0)),
        pl.BlockSpec((1, cop), lambda n, r: (0, 0)),
    ]
    args = [p, w, b]

    if do_norm:
        kernel = _make_norm_kernel(activation, residual is not None,
                                   HW, row_tile, hwp != HW)
        if residual is not None:
            res = jnp.pad(residual.astype(jnp.float32),
                          ((0, 0), (0, hwp - HW), (0, cop - Cout)))
            in_specs.append(pl.BlockSpec((1, hwp, cop), lambda n, r: (n, 0, 0)))
            args.append(res)
        # Output block resident across row tiles (accumulator pattern).
        out_spec = pl.BlockSpec((1, hwp, cop), lambda n, r: (n, 0, 0))
        scratch = [pltpu.VMEM((1, cop), jnp.float32),
                   pltpu.VMEM((1, cop), jnp.float32)]
        dims = ("parallel", "arbitrary")
    else:
        kernel = _make_plain_kernel(activation)
        out_spec = pl.BlockSpec((1, row_tile, cop), lambda n, r: (n, r, 0))
        scratch = []
        dims = ("parallel", "parallel")

    y = pl.pallas_call(
        kernel,
        grid=(N, nrt),
        in_specs=in_specs,
        out_specs=out_spec,
        out_shape=jax.ShapeDtypeStruct((N, hwp, cop), jnp.float32),
        scratch_shapes=scratch,
        compiler_params=pltpu.CompilerParams(
            dimension_semantics=dims,
            vmem_limit_bytes=VMEM_LIMIT),
    )(*args)
    return y[:, :HW, :Cout]


# ----------------------------------------------------------------------------
# Plain-JAX glue: padding / im2col / transpose-conv dilation
# ----------------------------------------------------------------------------
def _im2col(x, kh, kw, stride):
    """x: NHWC (already padded). Returns (N, Ho*Wo, kh*kw*C), Ho, Wo."""
    N, H, W, C = x.shape
    Ho = (H - kh) // stride + 1
    Wo = (W - kw) // stride + 1
    cols = []
    for i in range(kh):
        for j in range(kw):
            cols.append(x[:, i:i + (Ho - 1) * stride + 1:stride,
                          j:j + (Wo - 1) * stride + 1:stride, :])
    p = jnp.stack(cols, axis=3)                  # (N, Ho, Wo, kh*kw, C)
    return p.reshape(N, Ho * Wo, kh * kw * C), Ho, Wo


def conv2d(x, weight, bias, *, stride=1, pad=0, pad_mode="reflect",
           do_norm=False, activation="none", residual=None):
    """x: NHWC.  weight: (Cout, Cin, kh, kw) (PyTorch layout).  Returns NHWC."""
    Cout, Cin, kh, kw = weight.shape
    N = x.shape[0]
    if pad > 0:
        x = jnp.pad(x, ((0, 0), (pad, pad), (pad, pad), (0, 0)), mode=pad_mode)
    patches, Ho, Wo = _im2col(x, kh, kw, stride)
    # column ordering of im2col is (kernel position, Cin) -> match it
    wmat = jnp.transpose(weight, (2, 3, 1, 0)).reshape(kh * kw * Cin, Cout)
    res = residual.reshape(N, Ho * Wo, Cout) if residual is not None else None
    y = conv_matmul(patches, wmat, bias, do_norm=do_norm,
                    activation=activation, residual=res)
    return y.reshape(N, Ho, Wo, Cout)


def conv_transpose2d(x, weight, bias, *, stride=2, pad=1, output_padding=1,
                     do_norm=False, activation="none"):
    """x: NHWC. weight: (Cin, Cout, kh, kw) (PyTorch ConvTranspose2d layout)."""
    Cin, Cout, kh, kw = weight.shape
    N, H, W, C = x.shape
    # Insert zeros (stride-1) between pixels, then zero-pad and run a regular
    # conv with the spatially-flipped, channel-swapped kernel.
    Hd, Wd = (H - 1) * stride + 1, (W - 1) * stride + 1
    xd = jnp.zeros((N, Hd, Wd, C), x.dtype).at[:, ::stride, ::stride, :].set(x)
    lo = kh - 1 - pad
    hi = kh - 1 - pad + output_padding
    xd = jnp.pad(xd, ((0, 0), (lo, hi), (lo, hi), (0, 0)))
    w_eq = jnp.transpose(weight[:, :, ::-1, ::-1], (1, 0, 2, 3))  # (Cout,Cin,kh,kw)
    patches, Ho, Wo = _im2col(xd, kh, kw, 1)
    wmat = jnp.transpose(w_eq, (2, 3, 1, 0)).reshape(kh * kw * Cin, Cout)
    y = conv_matmul(patches, wmat, bias, do_norm=do_norm, activation=activation)
    return y.reshape(N, Ho, Wo, Cout)


# ----------------------------------------------------------------------------
# Parameter init (deterministic, synthetic)
# ----------------------------------------------------------------------------
def _conv_param(key, cout, cin, k):
    kw_, kb = jax.random.split(key)
    bound = 1.0 / float(jnp.sqrt(cin * k * k))
    w = jax.random.uniform(kw_, (cout, cin, k, k), jnp.float32, -bound, bound)
    b = jax.random.uniform(kb, (cout,), jnp.float32, -bound, bound)
    return w, b


def _convT_param(key, cin, cout, k):
    kw_, kb = jax.random.split(key)
    bound = 1.0 / float(jnp.sqrt(cout * k * k))
    w = jax.random.uniform(kw_, (cin, cout, k, k), jnp.float32, -bound, bound)
    b = jax.random.uniform(kb, (cout,), jnp.float32, -bound, bound)
    return w, b


def init_generator_params(key, input_channel, output_channel, hidden_channel=64):
    keys = jax.random.split(key, 32)
    ki = iter(keys)
    p = {}
    p["upfeature"] = _conv_param(next(ki), hidden_channel, input_channel, 7)
    p["contract1"] = _conv_param(next(ki), input_channel * 2, input_channel, 3)
    p["contract2"] = _conv_param(next(ki), hidden_channel * 4, hidden_channel * 2, 3)
    rc = input_channel * 4
    for i in range(9):
        w1, b1 = _conv_param(next(ki), rc, rc, 3)
        w2, b2 = _conv_param(next(ki), rc, rc, 3)
        p[f"res{i}"] = (w1, b1, w2, b2)
    p["expand2"] = _convT_param(next(ki), hidden_channel * 4, hidden_channel * 2, 3)
    p["expand3"] = _convT_param(next(ki), hidden_channel * 2, hidden_channel, 3)
    p["downfeature"] = _conv_param(next(ki), output_channel, hidden_channel, 7)
    return p


# ----------------------------------------------------------------------------
# Generator forward (NCHW in / NCHW out, matching the PyTorch module)
# ----------------------------------------------------------------------------
def generator_forward(params, x_nchw):
    x = jnp.transpose(x_nchw, (0, 2, 3, 1)).astype(jnp.float32)  # NCHW -> NHWC

    # upfeature: 7x7 reflect conv, no norm / activation
    x = conv2d(x, *params["upfeature"], stride=1, pad=3)
    # contract1 / contract2: 3x3 s2 reflect conv + IN + ReLU
    x = conv2d(x, *params["contract1"], stride=2, pad=1,
               do_norm=True, activation="relu")
    x = conv2d(x, *params["contract2"], stride=2, pad=1,
               do_norm=True, activation="relu")
    # 9 residual blocks
    for i in range(9):
        w1, b1, w2, b2 = params[f"res{i}"]
        orig = x
        h = conv2d(x, w1, b1, stride=1, pad=1, do_norm=True, activation="relu")
        x = conv2d(h, w2, b2, stride=1, pad=1, do_norm=True, activation="none",
                   residual=orig)
    # expanding blocks: ConvT 3x3 s2 + IN + ReLU
    x = conv_transpose2d(x, *params["expand2"], do_norm=True, activation="relu")
    x = conv_transpose2d(x, *params["expand3"], do_norm=True, activation="relu")
    # downfeature 7x7 reflect conv; final tanh fused into the same kernel
    x = conv2d(x, *params["downfeature"], stride=1, pad=3, activation="tanh")

    return jnp.transpose(x, (0, 3, 1, 2))  # NHWC -> NCHW


# ----------------------------------------------------------------------------
if __name__ == "__main__":
    key = jax.random.PRNGKey(0)
    k_param, k_x = jax.random.split(key)

    # The module's channel wiring requires input_channel == hidden_channel.
    batch, in_ch, out_ch, hidden_ch, spatial = 2, 4, 4, 4, 16

    params = init_generator_params(k_param, in_ch, out_ch, hidden_ch)
    x = jax.random.normal(k_x, (batch, in_ch, spatial, spatial), jnp.float32)

    fwd = jax.jit(generator_forward)
    y = jax.block_until_ready(fwd(params, x))

    assert y.shape == (batch, out_ch, spatial, spatial), y.shape
    assert bool(jnp.all(jnp.isfinite(y)))
    assert bool(jnp.all(jnp.abs(y) <= 1.0))  # tanh range
    print("KERNEL_OK")
</pallas_src>

<mosaic_0001>
module attributes {stable_mosaic.version = 11 : i64} {
  func.func @kernel(%arg0: i32, %arg1: i32, %arg2: memref<1x256x256xbf16, #tpu.memory_space<vmem>>, %arg3: memref<256x128xbf16, #tpu.memory_space<vmem>>, %arg4: memref<1x128xf32, #tpu.memory_space<vmem>>, %arg5: memref<1x256x128xf32, #tpu.memory_space<vmem>>) attributes {dimension_semantics = [#tpu.dimension_semantics<parallel>, #tpu.dimension_semantics<parallel>], iteration_bounds = array<i64: 2, 1>, scalar_prefetch = 0 : i64, scratch_operands = 0 : i64, tpu.core_type = #tpu.core_type<tc>, window_params = [{transform_indices = @transform_0, window_bounds = array<i64: 1, 256, 256>}, {pipeline_mode = #tpu.pipeline_mode<synchronous>, transform_indices = @transform_1, window_bounds = array<i64: 256, 128>}, {pipeline_mode = #tpu.pipeline_mode<synchronous>, transform_indices = @transform_2, window_bounds = array<i64: 1, 128>}, {transform_indices = @transform_3, window_bounds = array<i64: 1, 256, 128>}]} {
    %c0 = arith.constant 0 : index
    %c0_0 = arith.constant 0 : index
    %c0_1 = arith.constant 0 : index
    %0 = vector.load %arg2[%c0, %c0_0, %c0_1] : memref<1x256x256xbf16, #tpu.memory_space<vmem>>, vector<1x256x256xbf16>
    %1 = vector.shape_cast %0 : vector<1x256x256xbf16> to vector<256x256xbf16>
    %c0_2 = arith.constant 0 : index
    %c0_3 = arith.constant 0 : index
    %2 = vector.load %arg3[%c0_2, %c0_3] : memref<256x128xbf16, #tpu.memory_space<vmem>>, vector<256x128xbf16>
    %cst = arith.constant dense<0.000000e+00> : vector<256x128xf32>
    %3 = tpu.matmul %1, %2, %cst {dimension_numbers = #tpu.dot_dimension_numbers<[1], [0], [0], [1], [0, 0, 1, 1], [], []>} : vector<256x256xbf16>, vector<256x128xbf16>, vector<256x128xf32> -> vector<256x128xf32>
    %c0_4 = arith.constant 0 : index
    %c0_5 = arith.constant 0 : index
    %4 = vector.load %arg4[%c0_4, %c0_5] : memref<1x128xf32, #tpu.memory_space<vmem>>, vector<1x128xf32>
    %5 = vector.broadcast %4 : vector<1x128xf32> to vector<256x128xf32>
    %6 = arith.addf %3, %5 : vector<256x128xf32>
    %c0_6 = arith.constant 0 : index
    %c0_7 = arith.constant 0 : index
    %c0_8 = arith.constant 0 : index
    %7 = vector.load %arg5[%c0_6, %c0_7, %c0_8] : memref<1x256x128xf32, #tpu.memory_space<vmem>>, vector<1x256x128xf32>
    %8 = vector.shape_cast %7 : vector<1x256x128xf32> to vector<256x128xf32>
    %9 = vector.shape_cast %6 : vector<256x128xf32> to vector<1x256x128xf32>
    tpu.vector_store %arg5[%c0_6, %c0_7, %c0_8], %9 {strides = array<i32>} : memref<1x256x128xf32, #tpu.memory_space<vmem>>, vector<1x256x128xf32>,
    return
  }
  func.func @transform_0(%arg0: i32, %arg1: i32) -> (i32, i32, i32) {
    %c0_i32 = arith.constant 0 : i32
    %c0_i32_0 = arith.constant 0 : i32
    return %arg0, %arg1, %c0_i32 : i32, i32, i32
  }
  func.func @transform_1(%arg0: i32, %arg1: i32) -> (i32, i32) {
    %c0_i32 = arith.constant 0 : i32
    %c0_i32_0 = arith.constant 0 : i32
    %c0_i32_1 = arith.constant 0 : i32
    return %c0_i32, %c0_i32_0 : i32, i32
  }
  func.func @transform_2(%arg0: i32, %arg1: i32) -> (i32, i32) {
    %c0_i32 = arith.constant 0 : i32
    %c0_i32_0 = arith.constant 0 : i32
    %c0_i32_1 = arith.constant 0 : i32
    return %c0_i32, %c0_i32_0 : i32, i32
  }
  func.func @transform_3(%arg0: i32, %arg1: i32) -> (i32, i32, i32) {
    %c0_i32 = arith.constant 0 : i32
    %c0_i32_0 = arith.constant 0 : i32
    return %arg0, %arg1, %c0_i32 : i32, i32, i32
  }
}

module attributes {stable_mosaic.version = 11 : i64} {
  func.func @kernel(%arg0: i32, %arg1: i32, %arg2: memref<1x64x128xbf16, #tpu.memory_space<vmem>>, %arg3: memref<128x128xbf16, #tpu.memory_space<vmem>>, %arg4: memref<1x128xf32, #tpu.memory_space<vmem>>, %arg5: memref<1x64x128xf32, #tpu.memory_space<vmem>>, %arg6: memref<1x128xf32, #tpu.memory_space<vmem>>, %arg7: memref<1x128xf32, #tpu.memory_space<vmem>>) attributes {dimension_semantics = [#tpu.dimension_semantics<parallel>, #tpu.dimension_semantics<arbitrary>], iteration_bounds = array<i64: 2, 1>, scalar_prefetch = 0 : i64, scratch_operands = 2 : i64, tpu.core_type = #tpu.core_type<tc>, window_params = [{transform_indices = @transform_0, window_bounds = array<i64: 1, 64, 128>}, {pipeline_mode = #tpu.pipeline_mode<synchronous>, transform_indices = @transform_1, window_bounds = array<i64: 128, 128>}, {pipeline_mode = #tpu.pipeline_mode<synchronous>, transform_indices = @transform_2, window_bounds = array<i64: 1, 128>}, {transform_indices = @transform_3, window_bounds = array<i64: 1, 64, 128>}]} {
    %c0_i32 = arith.constant 0 : i32
    %0 = arith.cmpi eq, %arg1, %c0_i32 : i32
    %1 = arith.extui %0 : i1 to i32
    %c0_i32_0 = arith.constant 0 : i32
    %2 = arith.cmpi ne, %1, %c0_i32_0 : i32
    scf.if %2 {
      %cst_21 = arith.constant 0.000000e+00 : f32
      %30 = vector.broadcast %cst_21 : f32 to vector<1x128xf32>
      %c0_22 = arith.constant 0 : index
      %c0_23 = arith.constant 0 : index
      %31 = vector.load %arg6[%c0_22, %c0_23] : memref<1x128xf32, #tpu.memory_space<vmem>>, vector<1x128xf32>
      tpu.vector_store %arg6[%c0_22, %c0_23], %30 {strides = array<i32>} : memref<1x128xf32, #tpu.memory_space<vmem>>, vector<1x128xf32>,
      %cst_24 = arith.constant 0.000000e+00 : f32
      %32 = vector.broadcast %cst_24 : f32 to vector<1x128xf32>
      %c0_25 = arith.constant 0 : index
      %c0_26 = arith.constant 0 : index
      %33 = vector.load %arg7[%c0_25, %c0_26] : memref<1x128xf32, #tpu.memory_space<vmem>>, vector<1x128xf32>
      tpu.vector_store %arg7[%c0_25, %c0_26], %32 {strides = array<i32>} : memref<1x128xf32, #tpu.memory_space<vmem>>, vector<1x128xf32>,
    } else {
    }
    %c64_i32 = arith.constant 64 : i32
    %3 = arith.muli %arg1, %c64_i32 : i32
    %4 = tpu.assume_multiple %3, 64 : i32
    %c0 = arith.constant 0 : index
    %c0_1 = arith.constant 0 : index
    %c0_2 = arith.constant 0 : index
    %5 = vector.load %arg2[%c0, %c0_1, %c0_2] : memref<1x64x128xbf16, #tpu.memory_space<vmem>>, vector<1x64x128xbf16>
    %6 = vector.shape_cast %5 : vector<1x64x128xbf16> to vector<64x128xbf16>
    %c0_3 = arith.constant 0 : index
    %c0_4 = arith.constant 0 : index
    %7 = vector.load %arg3[%c0_3, %c0_4] : memref<128x128xbf16, #tpu.memory_space<vmem>>, vector<128x128xbf16>
    %cst = arith.constant dense<0.000000e+00> : vector<64x128xf32>
    %8 = tpu.matmul %6, %7, %cst {dimension_numbers = #tpu.dot_dimension_numbers<[1], [0], [0], [1], [0, 0, 1, 1], [], []>} : vector<64x128xbf16>, vector<128x128xbf16>, vector<64x128xf32> -> vector<64x128xf32>
    %c0_5 = arith.constant 0 : index
    %c0_6 = arith.constant 0 : index
    %9 = vector.load %arg4[%c0_5, %c0_6] : memref<1x128xf32, #tpu.memory_space<vmem>>, vector<1x128xf32>
    %10 = vector.broadcast %9 : vector<1x128xf32> to vector<64x128xf32>
    %11 = arith.addf %8, %10 : vector<64x128xf32>
    %c0_7 = arith.constant 0 : index
    %12 = arith.index_cast %4 : i32 to index
    %c0_8 = arith.constant 0 : index
    %13 = vector.load %arg5[%c0_7, %12, %c0_8] : memref<1x64x128xf32, #tpu.memory_space<vmem>>, vector<1x64x128xf32>
    %14 = vector.shape_cast %13 : vector<1x64x128xf32> to vector<64x128xf32>
    %15 = vector.shape_cast %11 : vector<64x128xf32> to vector<1x64x128xf32>
    tpu.vector_store %arg5[%c0_7, %12, %c0_8], %15 {strides = array<i32>} : memref<1x64x128xf32, #tpu.memory_space<vmem>>, vector<1x64x128xf32>,
    %c0_9 = arith.constant 0 : index
    %c0_10 = arith.constant 0 : index
    %16 = vector.load %arg6[%c0_9, %c0_10] : memref<1x128xf32, #tpu.memory_space<vmem>>, vector<1x128xf32>
    %cst_11 = arith.constant dense<0.000000e+00> : vector<128xf32>
    %17 = vector.multi_reduction <add>, %11, %cst_11 [0] : vector<64x128xf32> to vector<128xf32>
    %18 = vector.shape_cast %17 : vector<128xf32> to vector<1x128xf32>
    %19 = arith.addf %16, %18 : vector<1x128xf32>
    %c0_12 = arith.constant 0 : index
    %c0_13 = arith.constant 0 : index
    %20 = vector.load %arg6[%c0_12, %c0_13] : memref<1x128xf32, #tpu.memory_space<vmem>>, vector<1x128xf32>
    tpu.vector_store %arg6[%c0_12, %c0_13], %19 {strides = array<i32>} : memref<1x128xf32, #tpu.memory_space<vmem>>, vector<1x128xf32>,
    %c0_14 = arith.constant 0 : index
    %c0_15 = arith.constant 0 : index
    %21 = vector.load %arg7[%c0_14, %c0_15] : memref<1x128xf32, #tpu.memory_space<vmem>>, vector<1x128xf32>
    %22 = arith.mulf %11, %11 : vector<64x128xf32>
    %cst_16 = arith.constant dense<0.000000e+00> : vector<128xf32>
    %23 = vector.multi_reduction <add>, %22, %cst_16 [0] : vector<64x128xf32> to vector<128xf32>
    %24 = vector.shape_cast %23 : vector<128xf32> to vector<1x128xf32>
    %25 = arith.addf %21, %24 : vector<1x128xf32>
    %c0_17 = arith.constant 0 : index
    %c0_18 = arith.constant 0 : index
    %26 = vector.load %arg7[%c0_17, %c0_18] : memref<1x128xf32, #tpu.memory_space<vmem>>, vector<1x128xf32>
    tpu.vector_store %arg7[%c0_17, %c0_18], %25 {strides = array<i32>} : memref<1x128xf32, #tpu.memory_space<vmem>>, vector<1x128xf32>,
    %c0_i32_19 = arith.constant 0 : i32
    %27 = arith.cmpi eq, %arg1, %c0_i32_19 : i32
    %28 = arith.extui %27 : i1 to i32
    %c0_i32_20 = arith.constant 0 : i32
    %29 = arith.cmpi ne, %28, %c0_i32_20 : i32
    scf.if %29 {
      %c0_21 = arith.constant 0 : index
      %c0_22 = arith.constant 0 : index
      %30 = vector.load %arg6[%c0_21, %c0_22] : memref<1x128xf32, #tpu.memory_space<vmem>>, vector<1x128xf32>
      %cst_23 = arith.constant 1.562500e-02 : f32
      %31 = vector.broadcast %cst_23 : f32 to vector<1x128xf32>
      %32 = arith.mulf %30, %31 : vector<1x128xf32>
      %c0_24 = arith.constant 0 : index
      %c0_25 = arith.constant 0 : index
      %33 = vector.load %arg7[%c0_24, %c0_25] : memref<1x128xf32, #tpu.memory_space<vmem>>, vector<1x128xf32>
      %cst_26 = arith.constant 1.562500e-02 : f32
      %34 = vector.broadcast %cst_26 : f32 to vector<1x128xf32>
      %35 = arith.mulf %33, %34 : vector<1x128xf32>
      %36 = arith.mulf %32, %32 : vector<1x128xf32>
      %37 = arith.subf %35, %36 : vector<1x128xf32>
      %cst_27 = arith.constant 0.000000e+00 : f32
      %38 = vector.broadcast %cst_27 : f32 to vector<1x128xf32>
      %39 = arith.maximumf %37, %38 : vector<1x128xf32>
      %cst_28 = arith.constant 9.99999974E-6 : f32
      %40 = vector.broadcast %cst_28 : f32 to vector<1x128xf32>
      %41 = arith.addf %39, %40 : vector<1x128xf32>
      %42 = math.rsqrt %41 : vector<1x128xf32>
      %c0_29 = arith.constant 0 : index
      %c0_30 = arith.constant 0 : index
      %c0_31 = arith.constant 0 : index
      %43 = vector.load %arg5[%c0_29, %c0_30, %c0_31] : memref<1x64x128xf32, #tpu.memory_space<vmem>>, vector<1x64x128xf32>
      %44 = vector.shape_cast %43 : vector<1x64x128xf32> to vector<64x128xf32>
      %45 = vector.broadcast %32 : vector<1x128xf32> to vector<64x128xf32>
      %46 = arith.subf %44, %45 : vector<64x128xf32>
      %47 = vector.broadcast %42 : vector<1x128xf32> to vector<64x128xf32>
      %48 = arith.mulf %46, %47 : vector<64x128xf32>
      %cst_32 = arith.constant 0.000000e+00 : f32
      %49 = vector.broadcast %cst_32 : f32 to vector<64x128xf32>
      %50 = arith.maximumf %48, %49 : vector<64x128xf32>
      %c0_33 = arith.constant 0 : index
      %c0_34 = arith.constant 0 : index
      %c0_35 = arith.constant 0 : index
      %51 = vector.load %arg5[%c0_33, %c0_34, %c0_35] : memref<1x64x128xf32, #tpu.memory_space<vmem>>, vector<1x64x128xf32>
      %52 = vector.shape_cast %51 : vector<1x64x128xf32> to vector<64x128xf32>
      %53 = vector.shape_cast %50 : vector<64x128xf32> to vector<1x64x128xf32>
      tpu.vector_store %arg5[%c0_33, %c0_34, %c0_35], %53 {strides = array<i32>} : memref<1x64x128xf32, #tpu.memory_space<vmem>>, vector<1x64x128xf32>,
    } else {
    }
    return
  }
  func.func @transform_0(%arg0: i32, %arg1: i32) -> (i32, i32, i32) {
    %c0_i32 = arith.constant 0 : i32
    %c0_i32_0 = arith.constant 0 : i32
    return %arg0, %arg1, %c0_i32 : i32, i32, i32
  }
  func.func @transform_1(%arg0: i32, %arg1: i32) -> (i32, i32) {
    %c0_i32 = arith.constant 0 : i32
    %c0_i32_0 = arith.constant 0 : i32
    %c0_i32_1 = arith.constant 0 : i32
    return %c0_i32, %c0_i32_0 : i32, i32
  }
  func.func @transform_2(%arg0: i32, %arg1: i32) -> (i32, i32) {
    %c0_i32 = arith.constant 0 : i32
    %c0_i32_0 = arith.constant 0 : i32
    %c0_i32_1 = arith.constant 0 : i32
    return %c0_i32, %c0_i32_0 : i32, i32
  }
  func.func @transform_3(%arg0: i32, %arg1: i32) -> (i32, i32, i32) {
    %c0_i32 = arith.constant 0 : i32
    %c0_i32_0 = arith.constant 0 : i32
    %c0_i32_1 = arith.constant 0 : i32
    return %arg0, %c0_i32, %c0_i32_0 : i32, i32, i32
  }
}

module attributes {stable_mosaic.version = 11 : i64} {
  func.func @kernel(%arg0: i32, %arg1: i32, %arg2: memref<1x16x128xbf16, #tpu.memory_space<vmem>>, %arg3: memref<128x128xbf16, #tpu.memory_space<vmem>>, %arg4: memref<1x128xf32, #tpu.memory_space<vmem>>, %arg5: memref<1x16x128xf32, #tpu.memory_space<vmem>>, %arg6: memref<1x128xf32, #tpu.memory_space<vmem>>, %arg7: memref<1x128xf32, #tpu.memory_space<vmem>>) attributes {dimension_semantics = [#tpu.dimension_semantics<parallel>, #tpu.dimension_semantics<arbitrary>], iteration_bounds = array<i64: 2, 1>, scalar_prefetch = 0 : i64, scratch_operands = 2 : i64, tpu.core_type = #tpu.core_type<tc>, window_params = [{transform_indices = @transform_0, window_bounds = array<i64: 1, 16, 128>}, {pipeline_mode = #tpu.pipeline_mode<synchronous>, transform_indices = @transform_1, window_bounds = array<i64: 128, 128>}, {pipeline_mode = #tpu.pipeline_mode<synchronous>, transform_indices = @transform_2, window_bounds = array<i64: 1, 128>}, {transform_indices = @transform_3, window_bounds = array<i64: 1, 16, 128>}]} {
    %c0_i32 = arith.constant 0 : i32
    %0 = arith.cmpi eq, %arg1, %c0_i32 : i32
    %1 = arith.extui %0 : i1 to i32
    %c0_i32_0 = arith.constant 0 : i32
    %2 = arith.cmpi ne, %1, %c0_i32_0 : i32
    scf.if %2 {
      %cst_21 = arith.constant 0.000000e+00 : f32
      %30 = vector.broadcast %cst_21 : f32 to vector<1x128xf32>
      %c0_22 = arith.constant 0 : index
      %c0_23 = arith.constant 0 : index
      %31 = vector.load %arg6[%c0_22, %c0_23] : memref<1x128xf32, #tpu.memory_space<vmem>>, vector<1x128xf32>
      tpu.vector_store %arg6[%c0_22, %c0_23], %30 {strides = array<i32>} : memref<1x128xf32, #tpu.memory_space<vmem>>, vector<1x128xf32>,
      %cst_24 = arith.constant 0.000000e+00 : f32
      %32 = vector.broadcast %cst_24 : f32 to vector<1x128xf32>
      %c0_25 = arith.constant 0 : index
      %c0_26 = arith.constant 0 : index
      %33 = vector.load %arg7[%c0_25, %c0_26] : memref<1x128xf32, #tpu.memory_space<vmem>>, vector<1x128xf32>
      tpu.vector_store %arg7[%c0_25, %c0_26], %32 {strides = array<i32>} : memref<1x128xf32, #tpu.memory_space<vmem>>, vector<1x128xf32>,
    } else {
    }
    %c16_i32 = arith.constant 16 : i32
    %3 = arith.muli %arg1, %c16_i32 : i32
    %4 = tpu.assume_multiple %3, 16 : i32
    %c0 = arith.constant 0 : index
    %c0_1 = arith.constant 0 : index
    %c0_2 = arith.constant 0 : index
    %5 = vector.load %arg2[%c0, %c0_1, %c0_2] : memref<1x16x128xbf16, #tpu.memory_space<vmem>>, vector<1x16x128xbf16>
    %6 = vector.shape_cast %5 : vector<1x16x128xbf16> to vector<16x128xbf16>
    %c0_3 = arith.constant 0 : index
    %c0_4 = arith.constant 0 : index
    %7 = vector.load %arg3[%c0_3, %c0_4] : memref<128x128xbf16, #tpu.memory_space<vmem>>, vector<128x128xbf16>
    %cst = arith.constant dense<0.000000e+00> : vector<16x128xf32>
    %8 = tpu.matmul %6, %7, %cst {dimension_numbers = #tpu.dot_dimension_numbers<[1], [0], [0], [1], [0, 0, 1, 1], [], []>} : vector<16x128xbf16>, vector<128x128xbf16>, vector<16x128xf32> -> vector<16x128xf32>
    %c0_5 = arith.constant 0 : index
    %c0_6 = arith.constant 0 : index
    %9 = vector.load %arg4[%c0_5, %c0_6] : memref<1x128xf32, #tpu.memory_space<vmem>>, vector<1x128xf32>
    %10 = vector.broadcast %9 : vector<1x128xf32> to vector<16x128xf32>
    %11 = arith.addf %8, %10 : vector<16x128xf32>
    %c0_7 = arith.constant 0 : index
    %12 = arith.index_cast %4 : i32 to index
    %c0_8 = arith.constant 0 : index
    %13 = vector.load %arg5[%c0_7, %12, %c0_8] : memref<1x16x128xf32, #tpu.memory_space<vmem>>, vector<1x16x128xf32>
    %14 = vector.shape_cast %13 : vector<1x16x128xf32> to vector<16x128xf32>
    %15 = vector.shape_cast %11 : vector<16x128xf32> to vector<1x16x128xf32>
    tpu.vector_store %arg5[%c0_7, %12, %c0_8], %15 {strides = array<i32>} : memref<1x16x128xf32, #tpu.memory_space<vmem>>, vector<1x16x128xf32>,
    %c0_9 = arith.constant 0 : index
    %c0_10 = arith.constant 0 : index
    %16 = vector.load %arg6[%c0_9, %c0_10] : memref<1x128xf32, #tpu.memory_space<vmem>>, vector<1x128xf32>
    %cst_11 = arith.constant dense<0.000000e+00> : vector<128xf32>
    %17 = vector.multi_reduction <add>, %11, %cst_11 [0] : vector<16x128xf32> to vector<128xf32>
    %18 = vector.shape_cast %17 : vector<128xf32> to vector<1x128xf32>
    %19 = arith.addf %16, %18 : vector<1x128xf32>
    %c0_12 = arith.constant 0 : index
    %c0_13 = arith.constant 0 : index
    %20 = vector.load %arg6[%c0_12, %c0_13] : memref<1x128xf32, #tpu.memory_space<vmem>>, vector<1x128xf32>
    tpu.vector_store %arg6[%c0_12, %c0_13], %19 {strides = array<i32>} : memref<1x128xf32, #tpu.memory_space<vmem>>, vector<1x128xf32>,
    %c0_14 = arith.constant 0 : index
    %c0_15 = arith.constant 0 : index
    %21 = vector.load %arg7[%c0_14, %c0_15] : memref<1x128xf32, #tpu.memory_space<vmem>>, vector<1x128xf32>
    %22 = arith.mulf %11, %11 : vector<16x128xf32>
    %cst_16 = arith.constant dense<0.000000e+00> : vector<128xf32>
    %23 = vector.multi_reduction <add>, %22, %cst_16 [0] : vector<16x128xf32> to vector<128xf32>
    %24 = vector.shape_cast %23 : vector<128xf32> to vector<1x128xf32>
    %25 = arith.addf %21, %24 : vector<1x128xf32>
    %c0_17 = arith.constant 0 : index
    %c0_18 = arith.constant 0 : index
    %26 = vector.load %arg7[%c0_17, %c0_18] : memref<1x128xf32, #tpu.memory_space<vmem>>, vector<1x128xf32>
    tpu.vector_store %arg7[%c0_17, %c0_18], %25 {strides = array<i32>} : memref<1x128xf32, #tpu.memory_space<vmem>>, vector<1x128xf32>,
    %c0_i32_19 = arith.constant 0 : i32
    %27 = arith.cmpi eq, %arg1, %c0_i32_19 : i32
    %28 = arith.extui %27 : i1 to i32
    %c0_i32_20 = arith.constant 0 : i32
    %29 = arith.cmpi ne, %28, %c0_i32_20 : i32
    scf.if %29 {
      %c0_21 = arith.constant 0 : index
      %c0_22 = arith.constant 0 : index
      %30 = vector.load %arg6[%c0_21, %c0_22] : memref<1x128xf32, #tpu.memory_space<vmem>>, vector<1x128xf32>
      %cst_23 = arith.constant 6.250000e-02 : f32
      %31 = vector.broadcast %cst_23 : f32 to vector<1x128xf32>
      %32 = arith.mulf %30, %31 : vector<1x128xf32>
      %c0_24 = arith.constant 0 : index
      %c0_25 = arith.constant 0 : index
      %33 = vector.load %arg7[%c0_24, %c0_25] : memref<1x128xf32, #tpu.memory_space<vmem>>, vector<1x128xf32>
      %cst_26 = arith.constant 6.250000e-02 : f32
      %34 = vector.broadcast %cst_26 : f32 to vector<1x128xf32>
      %35 = arith.mulf %33, %34 : vector<1x128xf32>
      %36 = arith.mulf %32, %32 : vector<1x128xf32>
      %37 = arith.subf %35, %36 : vector<1x128xf32>
      %cst_27 = arith.constant 0.000000e+00 : f32
      %38 = vector.broadcast %cst_27 : f32 to vector<1x128xf32>
      %39 = arith.maximumf %37, %38 : vector<1x128xf32>
      %cst_28 = arith.constant 9.99999974E-6 : f32
      %40 = vector.broadcast %cst_28 : f32 to vector<1x128xf32>
      %41 = arith.addf %39, %40 : vector<1x128xf32>
      %42 = math.rsqrt %41 : vector<1x128xf32>
      %c0_29 = arith.constant 0 : index
      %c0_30 = arith.constant 0 : index
      %c0_31 = arith.constant 0 : index
      %43 = vector.load %arg5[%c0_29, %c0_30, %c0_31] : memref<1x16x128xf32, #tpu.memory_space<vmem>>, vector<1x16x128xf32>
      %44 = vector.shape_cast %43 : vector<1x16x128xf32> to vector<16x128xf32>
      %45 = vector.broadcast %32 : vector<1x128xf32> to vector<16x128xf32>
      %46 = arith.subf %44, %45 : vector<16x128xf32>
      %47 = vector.broadcast %42 : vector<1x128xf32> to vector<16x128xf32>
      %48 = arith.mulf %46, %47 : vector<16x128xf32>
      %cst_32 = arith.constant 0.000000e+00 : f32
      %49 = vector.broadcast %cst_32 : f32 to vector<16x128xf32>
      %50 = arith.maximumf %48, %49 : vector<16x128xf32>
      %c0_33 = arith.constant 0 : index
      %c0_34 = arith.constant 0 : index
      %c0_35 = arith.constant 0 : index
      %51 = vector.load %arg5[%c0_33, %c0_34, %c0_35] : memref<1x16x128xf32, #tpu.memory_space<vmem>>, vector<1x16x128xf32>
      %52 = vector.shape_cast %51 : vector<1x16x128xf32> to vector<16x128xf32>
      %53 = vector.shape_cast %50 : vector<16x128xf32> to vector<1x16x128xf32>
      tpu.vector_store %arg5[%c0_33, %c0_34, %c0_35], %53 {strides = array<i32>} : memref<1x16x128xf32, #tpu.memory_space<vmem>>, vector<1x16x128xf32>,
    } else {
    }
    return
  }
  func.func @transform_0(%arg0: i32, %arg1: i32) -> (i32, i32, i32) {
    %c0_i32 = arith.constant 0 : i32
    %c0_i32_0 = arith.constant 0 : i32
    return %arg0, %arg1, %c0_i32 : i32, i32, i32
  }
  func.func @transform_1(%arg0: i32, %arg1: i32) -> (i32, i32) {
    %c0_i32 = arith.constant 0 : i32
    %c0_i32_0 = arith.constant 0 : i32
    %c0_i32_1 = arith.constant 0 : i32
    return %c0_i32, %c0_i32_0 : i32, i32
  }
  func.func @transform_2(%arg0: i32, %arg1: i32) -> (i32, i32) {
    %c0_i32 = arith.constant 0 : i32
    %c0_i32_0 = arith.constant 0 : i32
    %c0_i32_1 = arith.constant 0 : i32
    return %c0_i32, %c0_i32_0 : i32, i32
  }
  func.func @transform_3(%arg0: i32, %arg1: i32) -> (i32, i32, i32) {
    %c0_i32 = arith.constant 0 : i32
    %c0_i32_0 = arith.constant 0 : i32
    %c0_i32_1 = arith.constant 0 : i32
    return %arg0, %c0_i32, %c0_i32_0 : i32, i32, i32
  }
}

module attributes {stable_mosaic.version = 11 : i64} {
  func.func @kernel(%arg0: i32, %arg1: i32, %arg2: memref<1x16x256xbf16, #tpu.memory_space<vmem>>, %arg3: memref<256x128xbf16, #tpu.memory_space<vmem>>, %arg4: memref<1x128xf32, #tpu.memory_space<vmem>>, %arg5: memref<1x16x128xf32, #tpu.memory_space<vmem>>, %arg6: memref<1x128xf32, #tpu.memory_space<vmem>>, %arg7: memref<1x128xf32, #tpu.memory_space<vmem>>) attributes {dimension_semantics = [#tpu.dimension_semantics<parallel>, #tpu.dimension_semantics<arbitrary>], iteration_bounds = array<i64: 2, 1>, scalar_prefetch = 0 : i64, scratch_operands = 2 : i64, tpu.core_type = #tpu.core_type<tc>, window_params = [{transform_indices = @transform_0, window_bounds = array<i64: 1, 16, 256>}, {pipeline_mode = #tpu.pipeline_mode<synchronous>, transform_indices = @transform_1, window_bounds = array<i64: 256, 128>}, {pipeline_mode = #tpu.pipeline_mode<synchronous>, transform_indices = @transform_2, window_bounds = array<i64: 1, 128>}, {transform_indices = @transform_3, window_bounds = array<i64: 1, 16, 128>}]} {
    %c0_i32 = arith.constant 0 : i32
    %0 = arith.cmpi eq, %arg1, %c0_i32 : i32
    %1 = arith.extui %0 : i1 to i32
    %c0_i32_0 = arith.constant 0 : i32
    %2 = arith.cmpi ne, %1, %c0_i32_0 : i32
    scf.if %2 {
      %cst_21 = arith.constant 0.000000e+00 : f32
      %30 = vector.broadcast %cst_21 : f32 to vector<1x128xf32>
      %c0_22 = arith.constant 0 : index
      %c0_23 = arith.constant 0 : index
      %31 = vector.load %arg6[%c0_22, %c0_23] : memref<1x128xf32, #tpu.memory_space<vmem>>, vector<1x128xf32>
      tpu.vector_store %arg6[%c0_22, %c0_23], %30 {strides = array<i32>} : memref<1x128xf32, #tpu.memory_space<vmem>>, vector<1x128xf32>,
      %cst_24 = arith.constant 0.000000e+00 : f32
      %32 = vector.broadcast %cst_24 : f32 to vector<1x128xf32>
      %c0_25 = arith.constant 0 : index
      %c0_26 = arith.constant 0 : index
      %33 = vector.load %arg7[%c0_25, %c0_26] : memref<1x128xf32, #tpu.memory_space<vmem>>, vector<1x128xf32>
      tpu.vector_store %arg7[%c0_25, %c0_26], %32 {strides = array<i32>} : memref<1x128xf32, #tpu.memory_space<vmem>>, vector<1x128xf32>,
    } else {
    }
    %c16_i32 = arith.constant 16 : i32
    %3 = arith.muli %arg1, %c16_i32 : i32
    %4 = tpu.assume_multiple %3, 16 : i32
    %c0 = arith.constant 0 : index
    %c0_1 = arith.constant 0 : index
    %c0_2 = arith.constant 0 : index
    %5 = vector.load %arg2[%c0, %c0_1, %c0_2] : memref<1x16x256xbf16, #tpu.memory_space<vmem>>, vector<1x16x256xbf16>
    %6 = vector.shape_cast %5 : vector<1x16x256xbf16> to vector<16x256xbf16>
    %c0_3 = arith.constant 0 : index
    %c0_4 = arith.constant 0 : index
    %7 = vector.load %arg3[%c0_3, %c0_4] : memref<256x128xbf16, #tpu.memory_space<vmem>>, vector<256x128xbf16>
    %cst = arith.constant dense<0.000000e+00> : vector<16x128xf32>
    %8 = tpu.matmul %6, %7, %cst {dimension_numbers = #tpu.dot_dimension_numbers<[1], [0], [0], [1], [0, 0, 1, 1], [], []>} : vector<16x256xbf16>, vector<256x128xbf16>, vector<16x128xf32> -> vector<16x128xf32>
    %c0_5 = arith.constant 0 : index
    %c0_6 = arith.constant 0 : index
    %9 = vector.load %arg4[%c0_5, %c0_6] : memref<1x128xf32, #tpu.memory_space<vmem>>, vector<1x128xf32>
    %10 = vector.broadcast %9 : vector<1x128xf32> to vector<16x128xf32>
    %11 = arith.addf %8, %10 : vector<16x128xf32>
    %c0_7 = arith.constant 0 : index
    %12 = arith.index_cast %4 : i32 to index
    %c0_8 = arith.constant 0 : index
    %13 = vector.load %arg5[%c0_7, %12, %c0_8] : memref<1x16x128xf32, #tpu.memory_space<vmem>>, vector<1x16x128xf32>
    %14 = vector.shape_cast %13 : vector<1x16x128xf32> to vector<16x128xf32>
    %15 = vector.shape_cast %11 : vector<16x128xf32> to vector<1x16x128xf32>
    tpu.vector_store %arg5[%c0_7, %12, %c0_8], %15 {strides = array<i32>} : memref<1x16x128xf32, #tpu.memory_space<vmem>>, vector<1x16x128xf32>,
    %c0_9 = arith.constant 0 : index
    %c0_10 = arith.constant 0 : index
    %16 = vector.load %arg6[%c0_9, %c0_10] : memref<1x128xf32, #tpu.memory_space<vmem>>, vector<1x128xf32>
    %cst_11 = arith.constant dense<0.000000e+00> : vector<128xf32>
    %17 = vector.multi_reduction <add>, %11, %cst_11 [0] : vector<16x128xf32> to vector<128xf32>
    %18 = vector.shape_cast %17 : vector<128xf32> to vector<1x128xf32>
    %19 = arith.addf %16, %18 : vector<1x128xf32>
    %c0_12 = arith.constant 0 : index
    %c0_13 = arith.constant 0 : index
    %20 = vector.load %arg6[%c0_12, %c0_13] : memref<1x128xf32, #tpu.memory_space<vmem>>, vector<1x128xf32>
    tpu.vector_store %arg6[%c0_12, %c0_13], %19 {strides = array<i32>} : memref<1x128xf32, #tpu.memory_space<vmem>>, vector<1x128xf32>,
    %c0_14 = arith.constant 0 : index
    %c0_15 = arith.constant 0 : index
    %21 = vector.load %arg7[%c0_14, %c0_15] : memref<1x128xf32, #tpu.memory_space<vmem>>, vector<1x128xf32>
    %22 = arith.mulf %11, %11 : vector<16x128xf32>
    %cst_16 = arith.constant dense<0.000000e+00> : vector<128xf32>
    %23 = vector.multi_reduction <add>, %22, %cst_16 [0] : vector<16x128xf32> to vector<128xf32>
    %24 = vector.shape_cast %23 : vector<128xf32> to vector<1x128xf32>
    %25 = arith.addf %21, %24 : vector<1x128xf32>
    %c0_17 = arith.constant 0 : index
    %c0_18 = arith.constant 0 : index
    %26 = vector.load %arg7[%c0_17, %c0_18] : memref<1x128xf32, #tpu.memory_space<vmem>>, vector<1x128xf32>
    tpu.vector_store %arg7[%c0_17, %c0_18], %25 {strides = array<i32>} : memref<1x128xf32, #tpu.memory_space<vmem>>, vector<1x128xf32>,
    %c0_i32_19 = arith.constant 0 : i32
    %27 = arith.cmpi eq, %arg1, %c0_i32_19 : i32
    %28 = arith.extui %27 : i1 to i32
    %c0_i32_20 = arith.constant 0 : i32
    %29 = arith.cmpi ne, %28, %c0_i32_20 : i32
    scf.if %29 {
      %c0_21 = arith.constant 0 : index
      %c0_22 = arith.constant 0 : index
      %30 = vector.load %arg6[%c0_21, %c0_22] : memref<1x128xf32, #tpu.memory_space<vmem>>, vector<1x128xf32>
      %cst_23 = arith.constant 6.250000e-02 : f32
      %31 = vector.broadcast %cst_23 : f32 to vector<1x128xf32>
      %32 = arith.mulf %30, %31 : vector<1x128xf32>
      %c0_24 = arith.constant 0 : index
      %c0_25 = arith.constant 0 : index
      %33 = vector.load %arg7[%c0_24, %c0_25] : memref<1x128xf32, #tpu.memory_space<vmem>>, vector<1x128xf32>
      %cst_26 = arith.constant 6.250000e-02 : f32
      %34 = vector.broadcast %cst_26 : f32 to vector<1x128xf32>
      %35 = arith.mulf %33, %34 : vector<1x128xf32>
      %36 = arith.mulf %32, %32 : vector<1x128xf32>
      %37 = arith.subf %35, %36 : vector<1x128xf32>
      %cst_27 = arith.constant 0.000000e+00 : f32
      %38 = vector.broadcast %cst_27 : f32 to vector<1x128xf32>
      %39 = arith.maximumf %37, %38 : vector<1x128xf32>
      %cst_28 = arith.constant 9.99999974E-6 : f32
      %40 = vector.broadcast %cst_28 : f32 to vector<1x128xf32>
      %41 = arith.addf %39, %40 : vector<1x128xf32>
      %42 = math.rsqrt %41 : vector<1x128xf32>
      %c0_29 = arith.constant 0 : index
      %c0_30 = arith.constant 0 : index
      %c0_31 = arith.constant 0 : index
      %43 = vector.load %arg5[%c0_29, %c0_30, %c0_31] : memref<1x16x128xf32, #tpu.memory_space<vmem>>, vector<1x16x128xf32>
      %44 = vector.shape_cast %43 : vector<1x16x128xf32> to vector<16x128xf32>
      %45 = vector.broadcast %32 : vector<1x128xf32> to vector<16x128xf32>
      %46 = arith.subf %44, %45 : vector<16x128xf32>
      %47 = vector.broadcast %42 : vector<1x128xf32> to vector<16x128xf32>
      %48 = arith.mulf %46, %47 : vector<16x128xf32>
      %cst_32 = arith.constant 0.000000e+00 : f32
      %49 = vector.broadcast %cst_32 : f32 to vector<16x128xf32>
      %50 = arith.maximumf %48, %49 : vector<16x128xf32>
      %c0_33 = arith.constant 0 : index
      %c0_34 = arith.constant 0 : index
      %c0_35 = arith.constant 0 : index
      %51 = vector.load %arg5[%c0_33, %c0_34, %c0_35] : memref<1x16x128xf32, #tpu.memory_space<vmem>>, vector<1x16x128xf32>
      %52 = vector.shape_cast %51 : vector<1x16x128xf32> to vector<16x128xf32>
      %53 = vector.shape_cast %50 : vector<16x128xf32> to vector<1x16x128xf32>
      tpu.vector_store %arg5[%c0_33, %c0_34, %c0_35], %53 {strides = array<i32>} : memref<1x16x128xf32, #tpu.memory_space<vmem>>, vector<1x16x128xf32>,
    } else {
    }
    return
  }
  func.func @transform_0(%arg0: i32, %arg1: i32) -> (i32, i32, i32) {
    %c0_i32 = arith.constant 0 : i32
    %c0_i32_0 = arith.constant 0 : i32
    return %arg0, %arg1, %c0_i32 : i32, i32, i32
  }
  func.func @transform_1(%arg0: i32, %arg1: i32) -> (i32, i32) {
    %c0_i32 = arith.constant 0 : i32
    %c0_i32_0 = arith.constant 0 : i32
    %c0_i32_1 = arith.constant 0 : i32
    return %c0_i32, %c0_i32_0 : i32, i32
  }
  func.func @transform_2(%arg0: i32, %arg1: i32) -> (i32, i32) {
    %c0_i32 = arith.constant 0 : i32
    %c0_i32_0 = arith.constant 0 : i32
    %c0_i32_1 = arith.constant 0 : i32
    return %c0_i32, %c0_i32_0 : i32, i32
  }
  func.func @transform_3(%arg0: i32, %arg1: i32) -> (i32, i32, i32) {
    %c0_i32 = arith.constant 0 : i32
    %c0_i32_0 = arith.constant 0 : i32
    %c0_i32_1 = arith.constant 0 : i32
    return %arg0, %c0_i32, %c0_i32_0 : i32, i32, i32
  }
}

module attributes {stable_mosaic.version = 11 : i64} {
  func.func @kernel(%arg0: i32, %arg1: i32, %arg2: memref<1x16x256xbf16, #tpu.memory_space<vmem>>, %arg3: memref<256x128xbf16, #tpu.memory_space<vmem>>, %arg4: memref<1x128xf32, #tpu.memory_space<vmem>>, %arg5: memref<1x16x128xf32, #tpu.memory_space<vmem>>, %arg6: memref<1x16x128xf32, #tpu.memory_space<vmem>>, %arg7: memref<1x128xf32, #tpu.memory_space<vmem>>, %arg8: memref<1x128xf32, #tpu.memory_space<vmem>>) attributes {dimension_semantics = [#tpu.dimension_semantics<parallel>, #tpu.dimension_semantics<arbitrary>], iteration_bounds = array<i64: 2, 1>, scalar_prefetch = 0 : i64, scratch_operands = 2 : i64, tpu.core_type = #tpu.core_type<tc>, window_params = [{transform_indices = @transform_0, window_bounds = array<i64: 1, 16, 256>}, {pipeline_mode = #tpu.pipeline_mode<synchronous>, transform_indices = @transform_1, window_bounds = array<i64: 256, 128>}, {pipeline_mode = #tpu.pipeline_mode<synchronous>, transform_indices = @transform_2, window_bounds = array<i64: 1, 128>}, {transform_indices = @transform_3, window_bounds = array<i64: 1, 16, 128>}, {transform_indices = @transform_4, window_bounds = array<i64: 1, 16, 128>}]} {
    %c0_i32 = arith.constant 0 : i32
    %0 = arith.cmpi eq, %arg1, %c0_i32 : i32
    %1 = arith.extui %0 : i1 to i32
    %c0_i32_0 = arith.constant 0 : i32
    %2 = arith.cmpi ne, %1, %c0_i32_0 : i32
    scf.if %2 {
      %cst_21 = arith.constant 0.000000e+00 : f32
      %30 = vector.broadcast %cst_21 : f32 to vector<1x128xf32>
      %c0_22 = arith.constant 0 : index
      %c0_23 = arith.constant 0 : index
      %31 = vector.load %arg7[%c0_22, %c0_23] : memref<1x128xf32, #tpu.memory_space<vmem>>, vector<1x128xf32>
      tpu.vector_store %arg7[%c0_22, %c0_23], %30 {strides = array<i32>} : memref<1x128xf32, #tpu.memory_space<vmem>>, vector<1x128xf32>,
      %cst_24 = arith.constant 0.000000e+00 : f32
      %32 = vector.broadcast %cst_24 : f32 to vector<1x128xf32>
      %c0_25 = arith.constant 0 : index
      %c0_26 = arith.constant 0 : index
      %33 = vector.load %arg8[%c0_25, %c0_26] : memref<1x128xf32, #tpu.memory_space<vmem>>, vector<1x128xf32>
      tpu.vector_store %arg8[%c0_25, %c0_26], %32 {strides = array<i32>} : memref<1x128xf32, #tpu.memory_space<vmem>>, vector<1x128xf32>,
    } else {
    }
    %c16_i32 = arith.constant 16 : i32
    %3 = arith.muli %arg1, %c16_i32 : i32
    %4 = tpu.assume_multiple %3, 16 : i32
    %c0 = arith.constant 0 : index
    %c0_1 = arith.constant 0 : index
    %c0_2 = arith.constant 0 : index
    %5 = vector.load %arg2[%c0, %c0_1, %c0_2] : memref<1x16x256xbf16, #tpu.memory_space<vmem>>, vector<1x16x256xbf16>
    %6 = vector.shape_cast %5 : vector<1x16x256xbf16> to vector<16x256xbf16>
    %c0_3 = arith.constant 0 : index
    %c0_4 = arith.constant 0 : index
    %7 = vector.load %arg3[%c0_3, %c0_4] : memref<256x128xbf16, #tpu.memory_space<vmem>>, vector<256x128xbf16>
    %cst = arith.constant dense<0.000000e+00> : vector<16x128xf32>
    %8 = tpu.matmul %6, %7, %cst {dimension_numbers = #tpu.dot_dimension_numbers<[1], [0], [0], [1], [0, 0, 1, 1], [], []>} : vector<16x256xbf16>, vector<256x128xbf16>, vector<16x128xf32> -> vector<16x128xf32>
    %c0_5 = arith.constant 0 : index
    %c0_6 = arith.constant 0 : index
    %9 = vector.load %arg4[%c0_5, %c0_6] : memref<1x128xf32, #tpu.memory_space<vmem>>, vector<1x128xf32>
    %10 = vector.broadcast %9 : vector<1x128xf32> to vector<16x128xf32>
    %11 = arith.addf %8, %10 : vector<16x128xf32>
    %c0_7 = arith.constant 0 : index
    %12 = arith.index_cast %4 : i32 to index
    %c0_8 = arith.constant 0 : index
    %13 = vector.load %arg6[%c0_7, %12, %c0_8] : memref<1x16x128xf32, #tpu.memory_space<vmem>>, vector<1x16x128xf32>
    %14 = vector.shape_cast %13 : vector<1x16x128xf32> to vector<16x128xf32>
    %15 = vector.shape_cast %11 : vector<16x128xf32> to vector<1x16x128xf32>
    tpu.vector_store %arg6[%c0_7, %12, %c0_8], %15 {strides = array<i32>} : memref<1x16x128xf32, #tpu.memory_space<vmem>>, vector<1x16x128xf32>,
    %c0_9 = arith.constant 0 : index
    %c0_10 = arith.constant 0 : index
    %16 = vector.load %arg7[%c0_9, %c0_10] : memref<1x128xf32, #tpu.memory_space<vmem>>, vector<1x128xf32>
    %cst_11 = arith.constant dense<0.000000e+00> : vector<128xf32>
    %17 = vector.multi_reduction <add>, %11, %cst_11 [0] : vector<16x128xf32> to vector<128xf32>
    %18 = vector.shape_cast %17 : vector<128xf32> to vector<1x128xf32>
    %19 = arith.addf %16, %18 : vector<1x128xf32>
    %c0_12 = arith.constant 0 : index
    %c0_13 = arith.constant 0 : index
    %20 = vector.load %arg7[%c0_12, %c0_13] : memref<1x128xf32, #tpu.memory_space<vmem>>, vector<1x128xf32>
    tpu.vector_store %arg7[%c0_12, %c0_13], %19 {strides = array<i32>} : memref<1x128xf32, #tpu.memory_space<vmem>>, vector<1x128xf32>,
    %c0_14 = arith.constant 0 : index
    %c0_15 = arith.constant 0 : index
    %21 = vector.load %arg8[%c0_14, %c0_15] : memref<1x128xf32, #tpu.memory_space<vmem>>, vector<1x128xf32>
    %22 = arith.mulf %11, %11 : vector<16x128xf32>
    %cst_16 = arith.constant dense<0.000000e+00> : vector<128xf32>
    %23 = vector.multi_reduction <add>, %22, %cst_16 [0] : vector<16x128xf32> to vector<128xf32>
    %24 = vector.shape_cast %23 : vector<128xf32> to vector<1x128xf32>
    %25 = arith.addf %21, %24 : vector<1x128xf32>
    %c0_17 = arith.constant 0 : index
    %c0_18 = arith.constant 0 : index
    %26 = vector.load %arg8[%c0_17, %c0_18] : memref<1x128xf32, #tpu.memory_space<vmem>>, vector<1x128xf32>
    tpu.vector_store %arg8[%c0_17, %c0_18], %25 {strides = array<i32>} : memref<1x128xf32, #tpu.memory_space<vmem>>, vector<1x128xf32>,
    %c0_i32_19 = arith.constant 0 : i32
    %27 = arith.cmpi eq, %arg1, %c0_i32_19 : i32
    %28 = arith.extui %27 : i1 to i32
    %c0_i32_20 = arith.constant 0 : i32
    %29 = arith.cmpi ne, %28, %c0_i32_20 : i32
    scf.if %29 {
      %c0_21 = arith.constant 0 : index
      %c0_22 = arith.constant 0 : index
      %30 = vector.load %arg7[%c0_21, %c0_22] : memref<1x128xf32, #tpu.memory_space<vmem>>, vector<1x128xf32>
      %cst_23 = arith.constant 6.250000e-02 : f32
      %31 = vector.broadcast %cst_23 : f32 to vector<1x128xf32>
      %32 = arith.mulf %30, %31 : vector<1x128xf32>
      %c0_24 = arith.constant 0 : index
      %c0_25 = arith.constant 0 : index
      %33 = vector.load %arg8[%c0_24, %c0_25] : memref<1x128xf32, #tpu.memory_space<vmem>>, vector<1x128xf32>
      %cst_26 = arith.constant 6.250000e-02 : f32
      %34 = vector.broadcast %cst_26 : f32 to vector<1x128xf32>
      %35 = arith.mulf %33, %34 : vector<1x128xf32>
      %36 = arith.mulf %32, %32 : vector<1x128xf32>
      %37 = arith.subf %35, %36 : vector<1x128xf32>
      %cst_27 = arith.constant 0.000000e+00 : f32
      %38 = vector.broadcast %cst_27 : f32 to vector<1x128xf32>
      %39 = arith.maximumf %37, %38 : vector<1x128xf32>
      %cst_28 = arith.constant 9.99999974E-6 : f32
      %40 = vector.broadcast %cst_28 : f32 to vector<1x128xf32>
      %41 = arith.addf %39, %40 : vector<1x128xf32>
      %42 = math.rsqrt %41 : vector<1x128xf32>
      %c0_29 = arith.constant 0 : index
      %c0_30 = arith.constant 0 : index
      %c0_31 = arith.constant 0 : index
      %43 = vector.load %arg6[%c0_29, %c0_30, %c0_31] : memref<1x16x128xf32, #tpu.memory_space<vmem>>, vector<1x16x128xf32>
      %44 = vector.shape_cast %43 : vector<1x16x128xf32> to vector<16x128xf32>
      %45 = vector.broadcast %32 : vector<1x128xf32> to vector<16x128xf32>
      %46 = arith.subf %44, %45 : vector<16x128xf32>
      %47 = vector.broadcast %42 : vector<1x128xf32> to vector<16x128xf32>
      %48 = arith.mulf %46, %47 : vector<16x128xf32>
      %c0_32 = arith.constant 0 : index
      %c0_33 = arith.constant 0 : index
      %c0_34 = arith.constant 0 : index
      %49 = vector.load %arg5[%c0_32, %c0_33, %c0_34] : memref<1x16x128xf32, #tpu.memory_space<vmem>>, vector<1x16x128xf32>
      %50 = vector.shape_cast %49 : vector<1x16x128xf32> to vector<16x128xf32>
      %51 = arith.addf %48, %50 : vector<16x128xf32>
      %c0_35 = arith.constant 0 : index
      %c0_36 = arith.constant 0 : index
      %c0_37 = arith.constant 0 : index
      %52 = vector.load %arg6[%c0_35, %c0_36, %c0_37] : memref<1x16x128xf32, #tpu.memory_space<vmem>>, vector<1x16x128xf32>
      %53 = vector.shape_cast %52 : vector<1x16x128xf32> to vector<16x128xf32>
      %54 = vector.shape_cast %51 : vector<16x128xf32> to vector<1x16x128xf32>
      tpu.vector_store %arg6[%c0_35, %c0_36, %c0_37], %54 {strides = array<i32>} : memref<1x16x128xf32, #tpu.memory_space<vmem>>, vector<1x16x128xf32>,
    } else {
    }
    return
  }
  func.func @transform_0(%arg0: i32, %arg1: i32) -> (i32, i32, i32) {
    %c0_i32 = arith.constant 0 : i32
    %c0_i32_0 = arith.constant 0 : i32
    return %arg0, %arg1, %c0_i32 : i32, i32, i32
  }
  func.func @transform_1(%arg0: i32, %arg1: i32) -> (i32, i32) {
    %c0_i32 = arith.constant 0 : i32
    %c0_i32_0 = arith.constant 0 : i32
    %c0_i32_1 = arith.constant 0 : i32
    return %c0_i32, %c0_i32_0 : i32, i32
  }
  func.func @transform_2(%arg0: i32, %arg1: i32) -> (i32, i32) {
    %c0_i32 = arith.constant 0 : i32
    %c0_i32_0 = arith.constant 0 : i32
    %c0_i32_1 = arith.constant 0 : i32
    return %c0_i32, %c0_i32_0 : i32, i32
  }
  func.func @transform_3(%arg0: i32, %arg1: i32) -> (i32, i32, i32) {
    %c0_i32 = arith.constant 0 : i32
    %c0_i32_0 = arith.constant 0 : i32
    %c0_i32_1 = arith.constant 0 : i32
    return %arg0, %c0_i32, %c0_i32_0 : i32, i32, i32
  }
  func.func @transform_4(%arg0: i32, %arg1: i32) -> (i32, i32, i32) {
    %c0_i32 = arith.constant 0 : i32
    %c0_i32_0 = arith.constant 0 : i32
    %c0_i32_1 = arith.constant 0 : i32
    return %arg0, %c0_i32, %c0_i32_0 : i32, i32, i32
  }
}

module attributes {stable_mosaic.version = 11 : i64} {
  func.func @kernel(%arg0: i32, %arg1: i32, %arg2: memref<1x64x256xbf16, #tpu.memory_space<vmem>>, %arg3: memref<256x128xbf16, #tpu.memory_space<vmem>>, %arg4: memref<1x128xf32, #tpu.memory_space<vmem>>, %arg5: memref<1x64x128xf32, #tpu.memory_space<vmem>>, %arg6: memref<1x128xf32, #tpu.memory_space<vmem>>, %arg7: memref<1x128xf32, #tpu.memory_space<vmem>>) attributes {dimension_semantics = [#tpu.dimension_semantics<parallel>, #tpu.dimension_semantics<arbitrary>], iteration_bounds = array<i64: 2, 1>, scalar_prefetch = 0 : i64, scratch_operands = 2 : i64, tpu.core_type = #tpu.core_type<tc>, window_params = [{transform_indices = @transform_0, window_bounds = array<i64: 1, 64, 256>}, {pipeline_mode = #tpu.pipeline_mode<synchronous>, transform_indices = @transform_1, window_bounds = array<i64: 256, 128>}, {pipeline_mode = #tpu.pipeline_mode<synchronous>, transform_indices = @transform_2, window_bounds = array<i64: 1, 128>}, {transform_indices = @transform_3, window_bounds = array<i64: 1, 64, 128>}]} {
    %c0_i32 = arith.constant 0 : i32
    %0 = arith.cmpi eq, %arg1, %c0_i32 : i32
    %1 = arith.extui %0 : i1 to i32
    %c0_i32_0 = arith.constant 0 : i32
    %2 = arith.cmpi ne, %1, %c0_i32_0 : i32
    scf.if %2 {
      %cst_21 = arith.constant 0.000000e+00 : f32
      %30 = vector.broadcast %cst_21 : f32 to vector<1x128xf32>
      %c0_22 = arith.constant 0 : index
      %c0_23 = arith.constant 0 : index
      %31 = vector.load %arg6[%c0_22, %c0_23] : memref<1x128xf32, #tpu.memory_space<vmem>>, vector<1x128xf32>
      tpu.vector_store %arg6[%c0_22, %c0_23], %30 {strides = array<i32>} : memref<1x128xf32, #tpu.memory_space<vmem>>, vector<1x128xf32>,
      %cst_24 = arith.constant 0.000000e+00 : f32
      %32 = vector.broadcast %cst_24 : f32 to vector<1x128xf32>
      %c0_25 = arith.constant 0 : index
      %c0_26 = arith.constant 0 : index
      %33 = vector.load %arg7[%c0_25, %c0_26] : memref<1x128xf32, #tpu.memory_space<vmem>>, vector<1x128xf32>
      tpu.vector_store %arg7[%c0_25, %c0_26], %32 {strides = array<i32>} : memref<1x128xf32, #tpu.memory_space<vmem>>, vector<1x128xf32>,
    } else {
    }
    %c64_i32 = arith.constant 64 : i32
    %3 = arith.muli %arg1, %c64_i32 : i32
    %4 = tpu.assume_multiple %3, 64 : i32
    %c0 = arith.constant 0 : index
    %c0_1 = arith.constant 0 : index
    %c0_2 = arith.constant 0 : index
    %5 = vector.load %arg2[%c0, %c0_1, %c0_2] : memref<1x64x256xbf16, #tpu.memory_space<vmem>>, vector<1x64x256xbf16>
    %6 = vector.shape_cast %5 : vector<1x64x256xbf16> to vector<64x256xbf16>
    %c0_3 = arith.constant 0 : index
    %c0_4 = arith.constant 0 : index
    %7 = vector.load %arg3[%c0_3, %c0_4] : memref<256x128xbf16, #tpu.memory_space<vmem>>, vector<256x128xbf16>
    %cst = arith.constant dense<0.000000e+00> : vector<64x128xf32>
    %8 = tpu.matmul %6, %7, %cst {dimension_numbers = #tpu.dot_dimension_numbers<[1], [0], [0], [1], [0, 0, 1, 1], [], []>} : vector<64x256xbf16>, vector<256x128xbf16>, vector<64x128xf32> -> vector<64x128xf32>
    %c0_5 = arith.constant 0 : index
    %c0_6 = arith.constant 0 : index
    %9 = vector.load %arg4[%c0_5, %c0_6] : memref<1x128xf32, #tpu.memory_space<vmem>>, vector<1x128xf32>
    %10 = vector.broadcast %9 : vector<1x128xf32> to vector<64x128xf32>
    %11 = arith.addf %8, %10 : vector<64x128xf32>
    %c0_7 = arith.constant 0 : index
    %12 = arith.index_cast %4 : i32 to index
    %c0_8 = arith.constant 0 : index
    %13 = vector.load %arg5[%c0_7, %12, %c0_8] : memref<1x64x128xf32, #tpu.memory_space<vmem>>, vector<1x64x128xf32>
    %14 = vector.shape_cast %13 : vector<1x64x128xf32> to vector<64x128xf32>
    %15 = vector.shape_cast %11 : vector<64x128xf32> to vector<1x64x128xf32>
    tpu.vector_store %arg5[%c0_7, %12, %c0_8], %15 {strides = array<i32>} : memref<1x64x128xf32, #tpu.memory_space<vmem>>, vector<1x64x128xf32>,
    %c0_9 = arith.constant 0 : index
    %c0_10 = arith.constant 0 : index
    %16 = vector.load %arg6[%c0_9, %c0_10] : memref<1x128xf32, #tpu.memory_space<vmem>>, vector<1x128xf32>
    %cst_11 = arith.constant dense<0.000000e+00> : vector<128xf32>
    %17 = vector.multi_reduction <add>, %11, %cst_11 [0] : vector<64x128xf32> to vector<128xf32>
    %18 = vector.shape_cast %17 : vector<128xf32> to vector<1x128xf32>
    %19 = arith.addf %16, %18 : vector<1x128xf32>
    %c0_12 = arith.constant 0 : index
    %c0_13 = arith.constant 0 : index
    %20 = vector.load %arg6[%c0_12, %c0_13] : memref<1x128xf32, #tpu.memory_space<vmem>>, vector<1x128xf32>
    tpu.vector_store %arg6[%c0_12, %c0_13], %19 {strides = array<i32>} : memref<1x128xf32, #tpu.memory_space<vmem>>, vector<1x128xf32>,
    %c0_14 = arith.constant 0 : index
    %c0_15 = arith.constant 0 : index
    %21 = vector.load %arg7[%c0_14, %c0_15] : memref<1x128xf32, #tpu.memory_space<vmem>>, vector<1x128xf32>
    %22 = arith.mulf %11, %11 : vector<64x128xf32>
    %cst_16 = arith.constant dense<0.000000e+00> : vector<128xf32>
    %23 = vector.multi_reduction <add>, %22, %cst_16 [0] : vector<64x128xf32> to vector<128xf32>
    %24 = vector.shape_cast %23 : vector<128xf32> to vector<1x128xf32>
    %25 = arith.addf %21, %24 : vector<1x128xf32>
    %c0_17 = arith.constant 0 : index
    %c0_18 = arith.constant 0 : index
    %26 = vector.load %arg7[%c0_17, %c0_18] : memref<1x128xf32, #tpu.memory_space<vmem>>, vector<1x128xf32>
    tpu.vector_store %arg7[%c0_17, %c0_18], %25 {strides = array<i32>} : memref<1x128xf32, #tpu.memory_space<vmem>>, vector<1x128xf32>,
    %c0_i32_19 = arith.constant 0 : i32
    %27 = arith.cmpi eq, %arg1, %c0_i32_19 : i32
    %28 = arith.extui %27 : i1 to i32
    %c0_i32_20 = arith.constant 0 : i32
    %29 = arith.cmpi ne, %28, %c0_i32_20 : i32
    scf.if %29 {
      %c0_21 = arith.constant 0 : index
      %c0_22 = arith.constant 0 : index
      %30 = vector.load %arg6[%c0_21, %c0_22] : memref<1x128xf32, #tpu.memory_space<vmem>>, vector<1x128xf32>
      %cst_23 = arith.constant 1.562500e-02 : f32
      %31 = vector.broadcast %cst_23 : f32 to vector<1x128xf32>
      %32 = arith.mulf %30, %31 : vector<1x128xf32>
      %c0_24 = arith.constant 0 : index
      %c0_25 = arith.constant 0 : index
      %33 = vector.load %arg7[%c0_24, %c0_25] : memref<1x128xf32, #tpu.memory_space<vmem>>, vector<1x128xf32>
      %cst_26 = arith.constant 1.562500e-02 : f32
      %34 = vector.broadcast %cst_26 : f32 to vector<1x128xf32>
      %35 = arith.mulf %33, %34 : vector<1x128xf32>
      %36 = arith.mulf %32, %32 : vector<1x128xf32>
      %37 = arith.subf %35, %36 : vector<1x128xf32>
      %cst_27 = arith.constant 0.000000e+00 : f32
      %38 = vector.broadcast %cst_27 : f32 to vector<1x128xf32>
      %39 = arith.maximumf %37, %38 : vector<1x128xf32>
      %cst_28 = arith.constant 9.99999974E-6 : f32
      %40 = vector.broadcast %cst_28 : f32 to vector<1x128xf32>
      %41 = arith.addf %39, %40 : vector<1x128xf32>
      %42 = math.rsqrt %41 : vector<1x128xf32>
      %c0_29 = arith.constant 0 : index
      %c0_30 = arith.constant 0 : index
      %c0_31 = arith.constant 0 : index
      %43 = vector.load %arg5[%c0_29, %c0_30, %c0_31] : memref<1x64x128xf32, #tpu.memory_space<vmem>>, vector<1x64x128xf32>
      %44 = vector.shape_cast %43 : vector<1x64x128xf32> to vector<64x128xf32>
      %45 = vector.broadcast %32 : vector<1x128xf32> to vector<64x128xf32>
      %46 = arith.subf %44, %45 : vector<64x128xf32>
      %47 = vector.broadcast %42 : vector<1x128xf32> to vector<64x128xf32>
      %48 = arith.mulf %46, %47 : vector<64x128xf32>
      %cst_32 = arith.constant 0.000000e+00 : f32
      %49 = vector.broadcast %cst_32 : f32 to vector<64x128xf32>
      %50 = arith.maximumf %48, %49 : vector<64x128xf32>
      %c0_33 = arith.constant 0 : index
      %c0_34 = arith.constant 0 : index
      %c0_35 = arith.constant 0 : index
      %51 = vector.load %arg5[%c0_33, %c0_34, %c0_35] : memref<1x64x128xf32, #tpu.memory_space<vmem>>, vector<1x64x128xf32>
      %52 = vector.shape_cast %51 : vector<1x64x128xf32> to vector<64x128xf32>
      %53 = vector.shape_cast %50 : vector<64x128xf32> to vector<1x64x128xf32>
      tpu.vector_store %arg5[%c0_33, %c0_34, %c0_35], %53 {strides = array<i32>} : memref<1x64x128xf32, #tpu.memory_space<vmem>>, vector<1x64x128xf32>,
    } else {
    }
    return
  }
  func.func @transform_0(%arg0: i32, %arg1: i32) -> (i32, i32, i32) {
    %c0_i32 = arith.constant 0 : i32
    %c0_i32_0 = arith.constant 0 : i32
    return %arg0, %arg1, %c0_i32 : i32, i32, i32
  }
  func.func @transform_1(%arg0: i32, %arg1: i32) -> (i32, i32) {
    %c0_i32 = arith.constant 0 : i32
    %c0_i32_0 = arith.constant 0 : i32
    %c0_i32_1 = arith.constant 0 : i32
    return %c0_i32, %c0_i32_0 : i32, i32
  }
  func.func @transform_2(%arg0: i32, %arg1: i32) -> (i32, i32) {
    %c0_i32 = arith.constant 0 : i32
    %c0_i32_0 = arith.constant 0 : i32
    %c0_i32_1 = arith.constant 0 : i32
    return %c0_i32, %c0_i32_0 : i32, i32
  }
  func.func @transform_3(%arg0: i32, %arg1: i32) -> (i32, i32, i32) {
    %c0_i32 = arith.constant 0 : i32
    %c0_i32_0 = arith.constant 0 : i32
    %c0_i32_1 = arith.constant 0 : i32
    return %arg0, %c0_i32, %c0_i32_0 : i32, i32, i32
  }
}

module attributes {stable_mosaic.version = 11 : i64} {
  func.func @kernel(%arg0: i32, %arg1: i32, %arg2: memref<1x256x128xbf16, #tpu.memory_space<vmem>>, %arg3: memref<128x128xbf16, #tpu.memory_space<vmem>>, %arg4: memref<1x128xf32, #tpu.memory_space<vmem>>, %arg5: memref<1x256x128xf32, #tpu.memory_space<vmem>>, %arg6: memref<1x128xf32, #tpu.memory_space<vmem>>, %arg7: memref<1x128xf32, #tpu.memory_space<vmem>>) attributes {dimension_semantics = [#tpu.dimension_semantics<parallel>, #tpu.dimension_semantics<arbitrary>], iteration_bounds = array<i64: 2, 1>, scalar_prefetch = 0 : i64, scratch_operands = 2 : i64, tpu.core_type = #tpu.core_type<tc>, window_params = [{transform_indices = @transform_0, window_bounds = array<i64: 1, 256, 128>}, {pipeline_mode = #tpu.pipeline_mode<synchronous>, transform_indices = @transform_1, window_bounds = array<i64: 128, 128>}, {pipeline_mode = #tpu.pipeline_mode<synchronous>, transform_indices = @transform_2, window_bounds = array<i64: 1, 128>}, {transform_indices = @transform_3, window_bounds = array<i64: 1, 256, 128>}]} {
    %c0_i32 = arith.constant 0 : i32
    %0 = arith.cmpi eq, %arg1, %c0_i32 : i32
    %1 = arith.extui %0 : i1 to i32
    %c0_i32_0 = arith.constant 0 : i32
    %2 = arith.cmpi ne, %1, %c0_i32_0 : i32
    scf.if %2 {
      %cst_21 = arith.constant 0.000000e+00 : f32
      %30 = vector.broadcast %cst_21 : f32 to vector<1x128xf32>
      %c0_22 = arith.constant 0 : index
      %c0_23 = arith.constant 0 : index
      %31 = vector.load %arg6[%c0_22, %c0_23] : memref<1x128xf32, #tpu.memory_space<vmem>>, vector<1x128xf32>
      tpu.vector_store %arg6[%c0_22, %c0_23], %30 {strides = array<i32>} : memref<1x128xf32, #tpu.memory_space<vmem>>, vector<1x128xf32>,
      %cst_24 = arith.constant 0.000000e+00 : f32
      %32 = vector.broadcast %cst_24 : f32 to vector<1x128xf32>
      %c0_25 = arith.constant 0 : index
      %c0_26 = arith.constant 0 : index
      %33 = vector.load %arg7[%c0_25, %c0_26] : memref<1x128xf32, #tpu.memory_space<vmem>>, vector<1x128xf32>
      tpu.vector_store %arg7[%c0_25, %c0_26], %32 {strides = array<i32>} : memref<1x128xf32, #tpu.memory_space<vmem>>, vector<1x128xf32>,
    } else {
    }
    %c256_i32 = arith.constant 256 : i32
    %3 = arith.muli %arg1, %c256_i32 : i32
    %4 = tpu.assume_multiple %3, 256 : i32
    %c0 = arith.constant 0 : index
    %c0_1 = arith.constant 0 : index
    %c0_2 = arith.constant 0 : index
    %5 = vector.load %arg2[%c0, %c0_1, %c0_2] : memref<1x256x128xbf16, #tpu.memory_space<vmem>>, vector<1x256x128xbf16>
    %6 = vector.shape_cast %5 : vector<1x256x128xbf16> to vector<256x128xbf16>
    %c0_3 = arith.constant 0 : index
    %c0_4 = arith.constant 0 : index
    %7 = vector.load %arg3[%c0_3, %c0_4] : memref<128x128xbf16, #tpu.memory_space<vmem>>, vector<128x128xbf16>
    %cst = arith.constant dense<0.000000e+00> : vector<256x128xf32>
    %8 = tpu.matmul %6, %7, %cst {dimension_numbers = #tpu.dot_dimension_numbers<[1], [0], [0], [1], [0, 0, 1, 1], [], []>} : vector<256x128xbf16>, vector<128x128xbf16>, vector<256x128xf32> -> vector<256x128xf32>
    %c0_5 = arith.constant 0 : index
    %c0_6 = arith.constant 0 : index
    %9 = vector.load %arg4[%c0_5, %c0_6] : memref<1x128xf32, #tpu.memory_space<vmem>>, vector<1x128xf32>
    %10 = vector.broadcast %9 : vector<1x128xf32> to vector<256x128xf32>
    %11 = arith.addf %8, %10 : vector<256x128xf32>
    %c0_7 = arith.constant 0 : index
    %12 = arith.index_cast %4 : i32 to index
    %c0_8 = arith.constant 0 : index
    %13 = vector.load %arg5[%c0_7, %12, %c0_8] : memref<1x256x128xf32, #tpu.memory_space<vmem>>, vector<1x256x128xf32>
    %14 = vector.shape_cast %13 : vector<1x256x128xf32> to vector<256x128xf32>
    %15 = vector.shape_cast %11 : vector<256x128xf32> to vector<1x256x128xf32>
    tpu.vector_store %arg5[%c0_7, %12, %c0_8], %15 {strides = array<i32>} : memref<1x256x128xf32, #tpu.memory_space<vmem>>, vector<1x256x128xf32>,
    %c0_9 = arith.constant 0 : index
    %c0_10 = arith.constant 0 : index
    %16 = vector.load %arg6[%c0_9, %c0_10] : memref<1x128xf32, #tpu.memory_space<vmem>>, vector<1x128xf32>
    %cst_11 = arith.constant dense<0.000000e+00> : vector<128xf32>
    %17 = vector.multi_reduction <add>, %11, %cst_11 [0] : vector<256x128xf32> to vector<128xf32>
    %18 = vector.shape_cast %17 : vector<128xf32> to vector<1x128xf32>
    %19 = arith.addf %16, %18 : vector<1x128xf32>
    %c0_12 = arith.constant 0 : index
    %c0_13 = arith.constant 0 : index
    %20 = vector.load %arg6[%c0_12, %c0_13] : memref<1x128xf32, #tpu.memory_space<vmem>>, vector<1x128xf32>
    tpu.vector_store %arg6[%c0_12, %c0_13], %19 {strides = array<i32>} : memref<1x128xf32, #tpu.memory_space<vmem>>, vector<1x128xf32>,
    %c0_14 = arith.constant 0 : index
    %c0_15 = arith.constant 0 : index
    %21 = vector.load %arg7[%c0_14, %c0_15] : memref<1x128xf32, #tpu.memory_space<vmem>>, vector<1x128xf32>
    %22 = arith.mulf %11, %11 : vector<256x128xf32>
    %cst_16 = arith.constant dense<0.000000e+00> : vector<128xf32>
    %23 = vector.multi_reduction <add>, %22, %cst_16 [0] : vector<256x128xf32> to vector<128xf32>
    %24 = vector.shape_cast %23 : vector<128xf32> to vector<1x128xf32>
    %25 = arith.addf %21, %24 : vector<1x128xf32>
    %c0_17 = arith.constant 0 : index
    %c0_18 = arith.constant 0 : index
    %26 = vector.load %arg7[%c0_17, %c0_18] : memref<1x128xf32, #tpu.memory_space<vmem>>, vector<1x128xf32>
    tpu.vector_store %arg7[%c0_17, %c0_18], %25 {strides = array<i32>} : memref<1x128xf32, #tpu.memory_space<vmem>>, vector<1x128xf32>,
    %c0_i32_19 = arith.constant 0 : i32
    %27 = arith.cmpi eq, %arg1, %c0_i32_19 : i32
    %28 = arith.extui %27 : i1 to i32
    %c0_i32_20 = arith.constant 0 : i32
    %29 = arith.cmpi ne, %28, %c0_i32_20 : i32
    scf.if %29 {
      %c0_21 = arith.constant 0 : index
      %c0_22 = arith.constant 0 : index
      %30 = vector.load %arg6[%c0_21, %c0_22] : memref<1x128xf32, #tpu.memory_space<vmem>>, vector<1x128xf32>
      %cst_23 = arith.constant 3.906250e-03 : f32
      %31 = vector.broadcast %cst_23 : f32 to vector<1x128xf32>
      %32 = arith.mulf %30, %31 : vector<1x128xf32>
      %c0_24 = arith.constant 0 : index
      %c0_25 = arith.constant 0 : index
      %33 = vector.load %arg7[%c0_24, %c0_25] : memref<1x128xf32, #tpu.memory_space<vmem>>, vector<1x128xf32>
      %cst_26 = arith.constant 3.906250e-03 : f32
      %34 = vector.broadcast %cst_26 : f32 to vector<1x128xf32>
      %35 = arith.mulf %33, %34 : vector<1x128xf32>
      %36 = arith.mulf %32, %32 : vector<1x128xf32>
      %37 = arith.subf %35, %36 : vector<1x128xf32>
      %cst_27 = arith.constant 0.000000e+00 : f32
      %38 = vector.broadcast %cst_27 : f32 to vector<1x128xf32>
      %39 = arith.maximumf %37, %38 : vector<1x128xf32>
      %cst_28 = arith.constant 9.99999974E-6 : f32
      %40 = vector.broadcast %cst_28 : f32 to vector<1x128xf32>
      %41 = arith.addf %39, %40 : vector<1x128xf32>
      %42 = math.rsqrt %41 : vector<1x128xf32>
      %c0_29 = arith.constant 0 : index
      %c0_30 = arith.constant 0 : index
      %c0_31 = arith.constant 0 : index
      %43 = vector.load %arg5[%c0_29, %c0_30, %c0_31] : memref<1x256x128xf32, #tpu.memory_space<vmem>>, vector<1x256x128xf32>
      %44 = vector.shape_cast %43 : vector<1x256x128xf32> to vector<256x128xf32>
      %45 = vector.broadcast %32 : vector<1x128xf32> to vector<256x128xf32>
      %46 = arith.subf %44, %45 : vector<256x128xf32>
      %47 = vector.broadcast %42 : vector<1x128xf32> to vector<256x128xf32>
      %48 = arith.mulf %46, %47 : vector<256x128xf32>
      %cst_32 = arith.constant 0.000000e+00 : f32
      %49 = vector.broadcast %cst_32 : f32 to vector<256x128xf32>
      %50 = arith.maximumf %48, %49 : vector<256x128xf32>
      %c0_33 = arith.constant 0 : index
      %c0_34 = arith.constant 0 : index
      %c0_35 = arith.constant 0 : index
      %51 = vector.load %arg5[%c0_33, %c0_34, %c0_35] : memref<1x256x128xf32, #tpu.memory_space<vmem>>, vector<1x256x128xf32>
      %52 = vector.shape_cast %51 : vector<1x256x128xf32> to vector<256x128xf32>
      %53 = vector.shape_cast %50 : vector<256x128xf32> to vector<1x256x128xf32>
      tpu.vector_store %arg5[%c0_33, %c0_34, %c0_35], %53 {strides = array<i32>} : memref<1x256x128xf32, #tpu.memory_space<vmem>>, vector<1x256x128xf32>,
    } else {
    }
    return
  }
  func.func @transform_0(%arg0: i32, %arg1: i32) -> (i32, i32, i32) {
    %c0_i32 = arith.constant 0 : i32
    %c0_i32_0 = arith.constant 0 : i32
    return %arg0, %arg1, %c0_i32 : i32, i32, i32
  }
  func.func @transform_1(%arg0: i32, %arg1: i32) -> (i32, i32) {
    %c0_i32 = arith.constant 0 : i32
    %c0_i32_0 = arith.constant 0 : i32
    %c0_i32_1 = arith.constant 0 : i32
    return %c0_i32, %c0_i32_0 : i32, i32
  }
  func.func @transform_2(%arg0: i32, %arg1: i32) -> (i32, i32) {
    %c0_i32 = arith.constant 0 : i32
    %c0_i32_0 = arith.constant 0 : i32
    %c0_i32_1 = arith.constant 0 : i32
    return %c0_i32, %c0_i32_0 : i32, i32
  }
  func.func @transform_3(%arg0: i32, %arg1: i32) -> (i32, i32, i32) {
    %c0_i32 = arith.constant 0 : i32
    %c0_i32_0 = arith.constant 0 : i32
    %c0_i32_1 = arith.constant 0 : i32
    return %arg0, %c0_i32, %c0_i32_0 : i32, i32, i32
  }
}

module attributes {stable_mosaic.version = 11 : i64} {
  func.func @kernel(%arg0: i32, %arg1: i32, %arg2: memref<1x256x256xbf16, #tpu.memory_space<vmem>>, %arg3: memref<256x128xbf16, #tpu.memory_space<vmem>>, %arg4: memref<1x128xf32, #tpu.memory_space<vmem>>, %arg5: memref<1x256x128xf32, #tpu.memory_space<vmem>>) attributes {dimension_semantics = [#tpu.dimension_semantics<parallel>, #tpu.dimension_semantics<parallel>], iteration_bounds = array<i64: 2, 1>, scalar_prefetch = 0 : i64, scratch_operands = 0 : i64, tpu.core_type = #tpu.core_type<tc>, window_params = [{transform_indices = @transform_0, window_bounds = array<i64: 1, 256, 256>}, {pipeline_mode = #tpu.pipeline_mode<synchronous>, transform_indices = @transform_1, window_bounds = array<i64: 256, 128>}, {pipeline_mode = #tpu.pipeline_mode<synchronous>, transform_indices = @transform_2, window_bounds = array<i64: 1, 128>}, {transform_indices = @transform_3, window_bounds = array<i64: 1, 256, 128>}]} {
    %c0 = arith.constant 0 : index
    %c0_0 = arith.constant 0 : index
    %c0_1 = arith.constant 0 : index
    %0 = vector.load %arg2[%c0, %c0_0, %c0_1] : memref<1x256x256xbf16, #tpu.memory_space<vmem>>, vector<1x256x256xbf16>
    %1 = vector.shape_cast %0 : vector<1x256x256xbf16> to vector<256x256xbf16>
    %c0_2 = arith.constant 0 : index
    %c0_3 = arith.constant 0 : index
    %2 = vector.load %arg3[%c0_2, %c0_3] : memref<256x128xbf16, #tpu.memory_space<vmem>>, vector<256x128xbf16>
    %cst = arith.constant dense<0.000000e+00> : vector<256x128xf32>
    %3 = tpu.matmul %1, %2, %cst {dimension_numbers = #tpu.dot_dimension_numbers<[1], [0], [0], [1], [0, 0, 1, 1], [], []>} : vector<256x256xbf16>, vector<256x128xbf16>, vector<256x128xf32> -> vector<256x128xf32>
    %c0_4 = arith.constant 0 : index
    %c0_5 = arith.constant 0 : index
    %4 = vector.load %arg4[%c0_4, %c0_5] : memref<1x128xf32, #tpu.memory_space<vmem>>, vector<1x128xf32>
    %5 = vector.broadcast %4 : vector<1x128xf32> to vector<256x128xf32>
    %6 = arith.addf %3, %5 : vector<256x128xf32>
    %7 = math.tanh %6 : vector<256x128xf32>
    %c0_6 = arith.constant 0 : index
    %c0_7 = arith.constant 0 : index
    %c0_8 = arith.constant 0 : index
    %8 = vector.load %arg5[%c0_6, %c0_7, %c0_8] : memref<1x256x128xf32, #tpu.memory_space<vmem>>, vector<1x256x128xf32>
    %9 = vector.shape_cast %8 : vector<1x256x128xf32> to vector<256x128xf32>
    %10 = vector.shape_cast %7 : vector<256x128xf32> to vector<1x256x128xf32>
    tpu.vector_store %arg5[%c0_6, %c0_7, %c0_8], %10 {strides = array<i32>} : memref<1x256x128xf32, #tpu.memory_space<vmem>>, vector<1x256x128xf32>,
    return
  }
  func.func @transform_0(%arg0: i32, %arg1: i32) -> (i32, i32, i32) {
    %c0_i32 = arith.constant 0 : i32
    %c0_i32_0 = arith.constant 0 : i32
    return %arg0, %arg1, %c0_i32 : i32, i32, i32
  }
  func.func @transform_1(%arg0: i32, %arg1: i32) -> (i32, i32) {
    %c0_i32 = arith.constant 0 : i32
    %c0_i32_0 = arith.constant 0 : i32
    %c0_i32_1 = arith.constant 0 : i32
    return %c0_i32, %c0_i32_0 : i32, i32
  }
  func.func @transform_2(%arg0: i32, %arg1: i32) -> (i32, i32) {
    %c0_i32 = arith.constant 0 : i32
    %c0_i32_0 = arith.constant 0 : i32
    %c0_i32_1 = arith.constant 0 : i32
    return %c0_i32, %c0_i32_0 : i32, i32
  }
  func.func @transform_3(%arg0: i32, %arg1: i32) -> (i32, i32, i32) {
    %c0_i32 = arith.constant 0 : i32
    %c0_i32_0 = arith.constant 0 : i32
    return %arg0, %arg1, %c0_i32 : i32, i32, i32
  }
}

</mosaic_0001>

<bundles_post_ra>
// kernel: generator_forward.24
= control target key start
LH: loop header
LB: loop body
LE: loop exit
PB: predicated region body
PF: predicated region fallthrough
CT: control target
= control target key end

     0   :  { %s1146_s12 = smov 0   ;;  %s1148_s13 = smov 0   ;;  %s1339_s0 = inlined_call_operand.vmem [shape: bf16[2,256,256], index: 0, kind: input, shape index: {}]   ;;  %s1340_s1 = inlined_call_operand.vmem [shape: bf16[256,128], index: 1, kind: input, shape index: {}]   ;;  %s1341_s2 = inlined_call_operand.vmem [shape: f32[1,128], index: 2, kind: input, shape index: {}]   ;;  %s1342_s3 = inlined_call_operand.vmem [shape: f32[2,256,128], index: 3, kind: output, shape index: {}]  }
   0x1   :  { %s1150_s14 = smov 0  }
   0x2 LB: > { %s25_s15 = sadd.s32 1, %s1120_s13  ;;  %p828_p0 = scmp.ge.s32.totalorder %s1124_s14, 1  ;;  %s1124_s14 = sphi %s1150_s14, %s13_s14   ;;  %s1120_s13 = sphi %s1148_s13, %s1344_s13   ;;  %s1116_s12 = sphi %s1146_s12, %s1343_s12  }
   0x3   : > { %p27_p1 = scmp.ge.s32.totalorder %s25_s15, 2  ;;  %p159_p2 = scmp.lt.s32.totalorder %s1124_s14, 3 }
   0x5   : > { %s1346_s15 = smov (%p27_p1, %s25_s15), 0  ;;  %p160_p3 = pnand %p828_p0, %p159_p2 }
   0x6   : > { %v1038_v0 = vld [vmem:[%s1340_s1 + $0x40] sm:$0xff] (!%p160_p3)   ;;  %v1040_v2 = vld [vmem:[%s1340_s1 + $0x48] sm:$0xff] (!%p160_p3)   ;;  %p193_p4 = scmp.lt.s32.totalorder (!%p160_p3), %s1116_s12, 1  ;;  %v1042_v4 = vld [vmem:[%s1340_s1 + $0x50] sm:$0xff] (!%p160_p3)  }
   0x7   : > { %163 = sbr.rel (%p160_p3) target bundleno = 315 (0x13b), region = 32  ;;  %v1039_v1 = vld [vmem:[%s1340_s1] sm:$0xff] (!%p160_p3)   ;;  %886 = vmatprep.subr.bf16.mxu0 (!%p160_p3), %v1038_v0  ;;  %998 = vmatprep.subr.bf16.mxu1 (!%p160_p3), %v1038_v0  ;;  %v1041_v3 = vld [vmem:[%s1340_s1 + $0x8] sm:$0xff] (!%p160_p3)   ;;  %v1043_v5 = vld [vmem:[%s1340_s1 + $0x10] sm:$0xff] (!%p160_p3)  }
   0x8   : > { %887 = vmatpush3.bf16.msra.mxu0 (!%p160_p3), %v1039_v1  ;;  %1006 = vmatpush3.bf16.msra.mxu1 (!%p160_p3), %v1039_v1  ;;  %v1044_v6 = vld [vmem:[%s1340_s1 + $0x58] sm:$0xff] (!%p160_p3)   ;;  %v1046_v8 = vld [vmem:[%s1340_s1 + $0x60] sm:$0xff] (!%p160_p3)   ;;  %v1048_v10 = vld [vmem:[%s1340_s1 + $0x68] sm:$0xff] (!%p160_p3)  }
   0x9   : > { %888 = vmatprep.subr.bf16.mxu0 (!%p160_p3), %v1040_v2  ;;  %999 = vmatprep.subr.bf16.mxu1 (!%p160_p3), %v1040_v2  ;;  %v1045_v7 = vld [vmem:[%s1340_s1 + $0x18] sm:$0xff] (!%p160_p3)   ;;  %v1047_v9 = vld [vmem:[%s1340_s1 + $0x20] sm:$0xff] (!%p160_p3)   ;;  %v1049_v13 = vld [vmem:[%s1340_s1 + $0x28] sm:$0xff] (!%p160_p3)  }
   0xa   : > { %v1050_v14 = vld [vmem:[%s1340_s1 + $0x70] sm:$0xff] (!%p160_p3)   ;;  %v1052_v16 = vld [vmem:[%s1340_s1 + $0x78] sm:$0xff] (!%p160_p3)   ;;  %v1257_v50 = vld [vmem:[%s1341_s2] ss:$0 sm:$0xff] (!%p160_p3) }
   0xb   : > { %v1051_v15 = vld [vmem:[%s1340_s1 + $0x30] sm:$0xff] (!%p160_p3)   ;;  %v1053_v17 = vld [vmem:[%s1340_s1 + $0x38] sm:$0xff] (!%p160_p3)  }
   0xc   : > { %889 = vmatpush3.bf16.msra.mxu0 (!%p160_p3), %v1041_v3  ;;  %1007 = vmatpush3.bf16.msra.mxu1 (!%p160_p3), %v1041_v3 }
   0xd   : > { %890 = vmatprep.subr.bf16.mxu0 (!%p160_p3), %v1042_v4  ;;  %1000 = vmatprep.subr.bf16.mxu1 (!%p160_p3), %v1042_v4 }
   0xe   : > { %s1348_s12 = smov (!%p193_p4, %s1116_s12), 1 }
   0xf   : > { %s884_s5 = sshll.u32 %s1348_s12, 8 }
  0x10   : > { %891 = vmatpush3.bf16.msra.mxu0 %v1043_v5  ;;  %1008 = vmatpush3.bf16.msra.mxu1 %v1043_v5  ;;  %s1199_s10 = scalar_lea.vmem %s1339_s0, %s884_s5  ;;  %s1264_s7 = scalar_lea.vmem %s1342_s3, %s884_s5 }
  0x11   : > { %892 = vmatprep.subr.bf16.mxu0 %v1044_v6  ;;  %1001 = vmatprep.subr.bf16.mxu1 %v1044_v6  ;;  %v1056_v11 = vld [vmem:[%s1199_s10 + $0x4] ss:$8 sps:$4 sm:$0xff]   ;;  %v1054_v18 = vld [vmem:[%s1199_s10] ss:$8 sps:$4 sm:$0xff]   ;;  %v1060_v20 = vld [vmem:[%s1199_s10 + $0x14] ss:$8 sps:$4 sm:$0xff]  }
  0x12   : > { %v1059_v12 = vld [vmem:[%s1199_s10 + $0x84] ss:$8 sps:$4 sm:$0xff]   ;;  %573 = vmatprep.mubr.bf16.mxu0 %v1056_v11  ;;  %v1057_v19 = vld [vmem:[%s1199_s10 + $0x80] ss:$8 sps:$4 sm:$0xff]   ;;  %v1062_v21 = vld [vmem:[%s1199_s10 + $0x94] ss:$8 sps:$4 sm:$0xff]  }
  0x13   : > { %637 = vmatprep.mubr.bf16.mxu1 %v1059_v12  ;;  %v1064_v22 = vld [vmem:[%s1199_s10 + $0x10] ss:$8 sps:$4 sm:$0xff]   ;;  %v1066_v24 = vld [vmem:[%s1199_s10 + $0x24] ss:$8 sps:$4 sm:$0xff]   ;;  %v1070_v26 = vld [vmem:[%s1199_s10 + $0x20] ss:$8 sps:$4 sm:$0xff]  }
  0x14   : > { %893 = vmatpush3.bf16.msra.mxu0 %v1045_v7  ;;  %1009 = vmatpush3.bf16.msra.mxu1 %v1045_v7  ;;  %v1065_v23 = vld [vmem:[%s1199_s10 + $0x90] ss:$8 sps:$4 sm:$0xff]   ;;  %v1068_v25 = vld [vmem:[%s1199_s10 + $0xa4] ss:$8 sps:$4 sm:$0xff]   ;;  %v1071_v27 = vld [vmem:[%s1199_s10 + $0xa0] ss:$8 sps:$4 sm:$0xff]  }
  0x15   : > { %894 = vmatprep.subr.bf16.mxu0 %v1046_v8  ;;  %1002 = vmatprep.subr.bf16.mxu1 %v1046_v8  ;;  %v1072_v28 = vld [vmem:[%s1199_s10 + $0x34] ss:$8 sps:$4 sm:$0xff]   ;;  %v1076_v30 = vld [vmem:[%s1199_s10 + $0x30] ss:$8 sps:$4 sm:$0xff]   ;;  %v1078_v32 = vld [vmem:[%s1199_s10 + $0x44] ss:$8 sps:$4 sm:$0xff]  }
  0x16   : > { %v1074_v29 = vld [vmem:[%s1199_s10 + $0xb4] ss:$8 sps:$4 sm:$0xff]   ;;  %v1077_v31 = vld [vmem:[%s1199_s10 + $0xb0] ss:$8 sps:$4 sm:$0xff]   ;;  %v1080_v33 = vld [vmem:[%s1199_s10 + $0xc4] ss:$8 sps:$4 sm:$0xff]  }
  0x17   : > { %v1082_v34 = vld [vmem:[%s1199_s10 + $0x40] ss:$8 sps:$4 sm:$0xff]   ;;  %v1084_v36 = vld [vmem:[%s1199_s10 + $0x54] ss:$8 sps:$4 sm:$0xff]   ;;  %v1088_v38 = vld [vmem:[%s1199_s10 + $0x50] ss:$8 sps:$4 sm:$0xff]  }
  0x18   : > { %895 = vmatpush3.bf16.msra.mxu0 %v1047_v9  ;;  %1010 = vmatpush3.bf16.msra.mxu1 %v1047_v9  ;;  %v1083_v35 = vld [vmem:[%s1199_s10 + $0xc0] ss:$8 sps:$4 sm:$0xff]   ;;  %v1086_v37 = vld [vmem:[%s1199_s10 + $0xd4] ss:$8 sps:$4 sm:$0xff]   ;;  %v1089_v39 = vld [vmem:[%s1199_s10 + $0xd0] ss:$8 sps:$4 sm:$0xff]  }
  0x19   : > { %896 = vmatprep.subr.bf16.mxu0 %v1048_v10  ;;  %1003 = vmatprep.subr.bf16.mxu1 %v1048_v10  ;;  %v1090_v40 = vld [vmem:[%s1199_s10 + $0x64] ss:$8 sps:$4 sm:$0xff]   ;;  %v1094_v42 = vld [vmem:[%s1199_s10 + $0x60] ss:$8 sps:$4 sm:$0xff]   ;;  %v1096_v44 = vld [vmem:[%s1199_s10 + $0x74] ss:$8 sps:$4 sm:$0xff]  }
  0x1a   : > { %v1092_v41 = vld [vmem:[%s1199_s10 + $0xe4] ss:$8 sps:$4 sm:$0xff]   ;;  %v1095_v43 = vld [vmem:[%s1199_s10 + $0xe0] ss:$8 sps:$4 sm:$0xff]   ;;  %v1098_v45 = vld [vmem:[%s1199_s10 + $0xf4] ss:$8 sps:$4 sm:$0xff]  }
  0x1b   : > { %v1100_v46 = vld [vmem:[%s1199_s10 + $0x70] ss:$8 sps:$4 sm:$0xff]  }
  0x1c   : > { %897 = vmatpush3.bf16.msra.mxu0 %v1049_v13  ;;  %1011 = vmatpush3.bf16.msra.mxu1 %v1049_v13  ;;  %v1101_v47 = vld [vmem:[%s1199_s10 + $0xf0] ss:$8 sps:$4 sm:$0xff]  }
  0x1d   : > { %898 = vmatprep.subr.bf16.mxu0 %v1050_v14  ;;  %1004 = vmatprep.subr.bf16.mxu1 %v1050_v14 }
  0x20   : > { %899 = vmatpush3.bf16.msra.mxu0 %v1051_v15  ;;  %1012 = vmatpush3.bf16.msra.mxu1 %v1051_v15 }
  0x21   : > { %900 = vmatprep.subr.bf16.mxu0 %v1052_v16  ;;  %1005 = vmatprep.subr.bf16.mxu1 %v1052_v16 }
  0x24   : > { %901 = vmatpush3.bf16.msra.mxu0 %v1053_v17  ;;  %1013 = vmatpush3.bf16.msra.mxu1 %v1053_v17 }
  0x27   : > { %574 = vmatmul.mubr.bf16.vlgmr.msra.gmra.mrb[0].mxu0 %v1054_v18  ;;  %638 = vmatmul.mubr.bf16.vlgmr.msra.gmra.mrb[0].mxu1 %v1057_v19 }
  0x28   : > { %581 = vmatprep.mubr.bf16.mxu0 %v1060_v20  ;;  %645 = vmatprep.mubr.bf16.mxu1 %v1062_v21 }
  0x2f   : > { %582 = vmatmul.mubr.bf16.gmra.mrb[4].mxu0 %v1064_v22  ;;  %646 = vmatmul.mubr.bf16.gmra.mrb[4].mxu1 %v1065_v23 }
  0x30   : > { %589 = vmatprep.mubr.bf16.mxu0 %v1066_v24  ;;  %653 = vmatprep.mubr.bf16.mxu1 %v1068_v25 }
  0x37   : > { %590 = vmatmul.mubr.bf16.gmra.mrb[8].mxu0 %v1070_v26  ;;  %654 = vmatmul.mubr.bf16.gmra.mrb[8].mxu1 %v1071_v27 }
  0x38   : > { %597 = vmatprep.mubr.bf16.mxu0 %v1072_v28  ;;  %661 = vmatprep.mubr.bf16.mxu1 %v1074_v29 }
  0x3f   : > { %598 = vmatmul.mubr.bf16.gmra.mrb[12].mxu0 %v1076_v30  ;;  %662 = vmatmul.mubr.bf16.gmra.mrb[12].mxu1 %v1077_v31 }
  0x40   : > { %605 = vmatprep.mubr.bf16.mxu0 %v1078_v32  ;;  %669 = vmatprep.mubr.bf16.mxu1 %v1080_v33 }
  0x47   : > { %606 = vmatmul.mubr.bf16.gmra.mrb[16].mxu0 %v1082_v34  ;;  %670 = vmatmul.mubr.bf16.gmra.mrb[16].mxu1 %v1083_v35 }
  0x48   : > { %613 = vmatprep.mubr.bf16.mxu0 %v1084_v36  ;;  %677 = vmatprep.mubr.bf16.mxu1 %v1086_v37 }
  0x4f   : > { %614 = vmatmul.mubr.bf16.gmra.mrb[20].mxu0 %v1088_v38  ;;  %678 = vmatmul.mubr.bf16.gmra.mrb[20].mxu1 %v1089_v39 }
  0x50   : > { %621 = vmatprep.mubr.bf16.mxu0 %v1090_v40  ;;  %685 = vmatprep.mubr.bf16.mxu1 %v1092_v41 }
  0x57   : > { %622 = vmatmul.mubr.bf16.gmra.mrb[24].mxu0 %v1094_v42  ;;  %686 = vmatmul.mubr.bf16.gmra.mrb[24].mxu1 %v1095_v43 }
  0x58   : > { %629 = vmatprep.mubr.bf16.mxu0 %v1096_v44  ;;  %693 = vmatprep.mubr.bf16.mxu1 %v1098_v45 }
  0x5f   : > { %630 = vmatmul.mubr.bf16.gmra.mrb[28].mxu0 %v1100_v46  ;;  %694 = vmatmul.mubr.bf16.gmra.mrb[28].mxu1 %v1101_v47 }
  0xfa   : > { %v902_v48 = vpop.f32.mrb[0].mxu0  ;;  %v950_v49 = vpop.f32.mrb[0].mxu1 }
  0xfb   : > { %v903_v51 = vpop.f32.mrb[1].mxu0  ;;  %v951_v52 = vpop.f32.mrb[1].mxu1 }
  0xfc   : > { %v904_v53 = vadd.f32 %v903_v51, %v902_v48  ;;  %v952_v54 = vadd.f32 %v951_v52, %v950_v49  ;;  %v905_v55 = vpop.f32.mrb[2].mxu0  ;;  %v953_v56 = vpop.f32.mrb[2].mxu1 }
  0xfd   : > { %v906_v57 = vpop.f32.mrb[3].mxu0  ;;  %v954_v58 = vpop.f32.mrb[3].mxu1 }
  0xfe   : > { %v576_v59 = vadd.f32 %v904_v53, %v1257_v50  ;;  %v640_v60 = vadd.f32 %v952_v54, %v1257_v50  ;;  %v907_v61 = vadd.f32 %v906_v57, %v905_v55  ;;  %v955_v62 = vadd.f32 %v954_v58, %v953_v56 }
 0x100   : > { %702 = vst [vmem:[%s1264_s7] sm:$0xff] %v576_v59  ;;  %718 = vst [vmem:[%s1264_s7 + $0x80] sm:$0xff] %v640_v60  ;;  %v579_v63 = vadd.f32 %v907_v61, %v1257_v50  ;;  %v643_v0 = vadd.f32 %v955_v62, %v1257_v50 }
 0x102   : > { %703 = vst [vmem:[%s1264_s7 + $0x8] sm:$0xff] %v579_v63  ;;  %719 = vst [vmem:[%s1264_s7 + $0x88] sm:$0xff] %v643_v0  ;;  %v908_v1 = vpop.f32.mrb[4].mxu0  ;;  %v956_v2 = vpop.f32.mrb[4].mxu1 }
 0x103   : > { %v909_v3 = vpop.f32.mrb[5].mxu0  ;;  %v957_v4 = vpop.f32.mrb[5].mxu1 }
 0x104   : > { %v910_v5 = vadd.f32 %v909_v3, %v908_v1  ;;  %v958_v6 = vadd.f32 %v957_v4, %v956_v2  ;;  %v911_v7 = vpop.f32.mrb[6].mxu0  ;;  %v959_v8 = vpop.f32.mrb[6].mxu1 }
 0x105   : > { %v912_v9 = vpop.f32.mrb[7].mxu0  ;;  %v960_v10 = vpop.f32.mrb[7].mxu1 }
 0x106   : > { %v584_v11 = vadd.f32 %v910_v5, %v1257_v50  ;;  %v648_v12 = vadd.f32 %v958_v6, %v1257_v50  ;;  %v913_v13 = vadd.f32 %v912_v9, %v911_v7  ;;  %v961_v14 = vadd.f32 %v960_v10, %v959_v8 }
 0x108   : > { %704 = vst [vmem:[%s1264_s7 + $0x10] sm:$0xff] %v584_v11  ;;  %720 = vst [vmem:[%s1264_s7 + $0x90] sm:$0xff] %v648_v12  ;;  %v587_v15 = vadd.f32 %v913_v13, %v1257_v50  ;;  %v651_v16 = vadd.f32 %v961_v14, %v1257_v50 }
 0x10a   : > { %705 = vst [vmem:[%s1264_s7 + $0x18] sm:$0xff] %v587_v15  ;;  %721 = vst [vmem:[%s1264_s7 + $0x98] sm:$0xff] %v651_v16  ;;  %v914_v17 = vpop.f32.mrb[8].mxu0  ;;  %v962_v18 = vpop.f32.mrb[8].mxu1 }
 0x10b   : > { %v915_v19 = vpop.f32.mrb[9].mxu0  ;;  %v963_v20 = vpop.f32.mrb[9].mxu1 }
 0x10c   : > { %v916_v21 = vadd.f32 %v915_v19, %v914_v17  ;;  %v964_v22 = vadd.f32 %v963_v20, %v962_v18  ;;  %v917_v23 = vpop.f32.mrb[10].mxu0  ;;  %v965_v24 = vpop.f32.mrb[10].mxu1 }
 0x10d   : > { %v918_v25 = vpop.f32.mrb[11].mxu0  ;;  %v966_v26 = vpop.f32.mrb[11].mxu1 }
 0x10e   : > { %v592_v27 = vadd.f32 %v916_v21, %v1257_v50  ;;  %v656_v28 = vadd.f32 %v964_v22, %v1257_v50  ;;  %v919_v29 = vadd.f32 %v918_v25, %v917_v23  ;;  %v967_v30 = vadd.f32 %v966_v26, %v965_v24 }
 0x110   : > { %706 = vst [vmem:[%s1264_s7 + $0x20] sm:$0xff] %v592_v27  ;;  %722 = vst [vmem:[%s1264_s7 + $0xa0] sm:$0xff] %v656_v28  ;;  %v595_v31 = vadd.f32 %v919_v29, %v1257_v50  ;;  %v659_v32 = vadd.f32 %v967_v30, %v1257_v50 }
 0x112   : > { %707 = vst [vmem:[%s1264_s7 + $0x28] sm:$0xff] %v595_v31  ;;  %723 = vst [vmem:[%s1264_s7 + $0xa8] sm:$0xff] %v659_v32  ;;  %v920_v33 = vpop.f32.mrb[12].mxu0  ;;  %v968_v34 = vpop.f32.mrb[12].mxu1 }
 0x113   : > { %v921_v35 = vpop.f32.mrb[13].mxu0  ;;  %v969_v36 = vpop.f32.mrb[13].mxu1 }
 0x114   : > { %v922_v37 = vadd.f32 %v921_v35, %v920_v33  ;;  %v970_v38 = vadd.f32 %v969_v36, %v968_v34  ;;  %v923_v39 = vpop.f32.mrb[14].mxu0  ;;  %v971_v40 = vpop.f32.mrb[14].mxu1 }
 0x115   : > { %v924_v41 = vpop.f32.mrb[15].mxu0  ;;  %v972_v42 = vpop.f32.mrb[15].mxu1 }
 0x116   : > { %v600_v43 = vadd.f32 %v922_v37, %v1257_v50  ;;  %v664_v44 = vadd.f32 %v970_v38, %v1257_v50  ;;  %v925_v45 = vadd.f32 %v924_v41, %v923_v39  ;;  %v973_v46 = vadd.f32 %v972_v42, %v971_v40 }
 0x118   : > { %708 = vst [vmem:[%s1264_s7 + $0x30] sm:$0xff] %v600_v43  ;;  %724 = vst [vmem:[%s1264_s7 + $0xb0] sm:$0xff] %v664_v44  ;;  %v603_v47 = vadd.f32 %v925_v45, %v1257_v50  ;;  %v667_v48 = vadd.f32 %v973_v46, %v1257_v50 }
 0x11a   : > { %709 = vst [vmem:[%s1264_s7 + $0x38] sm:$0xff] %v603_v47  ;;  %725 = vst [vmem:[%s1264_s7 + $0xb8] sm:$0xff] %v667_v48  ;;  %v926_v49 = vpop.f32.mrb[16].mxu0  ;;  %v974_v51 = vpop.f32.mrb[16].mxu1 }
 0x11b   : > { %v927_v52 = vpop.f32.mrb[17].mxu0  ;;  %v975_v53 = vpop.f32.mrb[17].mxu1 }
 0x11c   : > { %v928_v54 = vadd.f32 %v927_v52, %v926_v49  ;;  %v976_v55 = vadd.f32 %v975_v53, %v974_v51  ;;  %v929_v56 = vpop.f32.mrb[18].mxu0  ;;  %v977_v57 = vpop.f32.mrb[18].mxu1 }
 0x11d   : > { %v930_v58 = vpop.f32.mrb[19].mxu0  ;;  %v978_v59 = vpop.f32.mrb[19].mxu1 }
 0x11e   : > { %v608_v60 = vadd.f32 %v928_v54, %v1257_v50  ;;  %v672_v61 = vadd.f32 %v976_v55, %v1257_v50  ;;  %v931_v62 = vadd.f32 %v930_v58, %v929_v56  ;;  %v979_v63 = vadd.f32 %v978_v59, %v977_v57 }
 0x120   : > { %710 = vst [vmem:[%s1264_s7 + $0x40] sm:$0xff] %v608_v60  ;;  %726 = vst [vmem:[%s1264_s7 + $0xc0] sm:$0xff] %v672_v61  ;;  %v611_v0 = vadd.f32 %v931_v62, %v1257_v50  ;;  %v675_v1 = vadd.f32 %v979_v63, %v1257_v50 }
 0x122   : > { %711 = vst [vmem:[%s1264_s7 + $0x48] sm:$0xff] %v611_v0  ;;  %727 = vst [vmem:[%s1264_s7 + $0xc8] sm:$0xff] %v675_v1  ;;  %v932_v2 = vpop.f32.mrb[20].mxu0  ;;  %v980_v3 = vpop.f32.mrb[20].mxu1 }
 0x123   : > { %v933_v4 = vpop.f32.mrb[21].mxu0  ;;  %v981_v5 = vpop.f32.mrb[21].mxu1 }
 0x124   : > { %v934_v6 = vadd.f32 %v933_v4, %v932_v2  ;;  %v982_v7 = vadd.f32 %v981_v5, %v980_v3  ;;  %v935_v8 = vpop.f32.mrb[22].mxu0  ;;  %v983_v9 = vpop.f32.mrb[22].mxu1 }
 0x125   : > { %v936_v10 = vpop.f32.mrb[23].mxu0  ;;  %v984_v11 = vpop.f32.mrb[23].mxu1 }
 0x126   : > { %v616_v12 = vadd.f32 %v934_v6, %v1257_v50  ;;  %v680_v13 = vadd.f32 %v982_v7, %v1257_v50  ;;  %v937_v14 = vadd.f32 %v936_v10, %v935_v8  ;;  %v985_v15 = vadd.f32 %v984_v11, %v983_v9 }
 0x128   : > { %712 = vst [vmem:[%s1264_s7 + $0x50] sm:$0xff] %v616_v12  ;;  %728 = vst [vmem:[%s1264_s7 + $0xd0] sm:$0xff] %v680_v13  ;;  %v619_v16 = vadd.f32 %v937_v14, %v1257_v50  ;;  %v683_v17 = vadd.f32 %v985_v15, %v1257_v50 }
 0x12a   : > { %713 = vst [vmem:[%s1264_s7 + $0x58] sm:$0xff] %v619_v16  ;;  %729 = vst [vmem:[%s1264_s7 + $0xd8] sm:$0xff] %v683_v17  ;;  %v938_v18 = vpop.f32.mrb[24].mxu0  ;;  %v986_v19 = vpop.f32.mrb[24].mxu1 }
 0x12b   : > { %v939_v20 = vpop.f32.mrb[25].mxu0  ;;  %v987_v21 = vpop.f32.mrb[25].mxu1 }
 0x12c   : > { %v940_v22 = vadd.f32 %v939_v20, %v938_v18  ;;  %v988_v23 = vadd.f32 %v987_v21, %v986_v19  ;;  %v941_v24 = vpop.f32.mrb[26].mxu0  ;;  %v989_v25 = vpop.f32.mrb[26].mxu1 }
 0x12d   : > { %v942_v26 = vpop.f32.mrb[27].mxu0  ;;  %v990_v27 = vpop.f32.mrb[27].mxu1 }
 0x12e   : > { %v624_v28 = vadd.f32 %v940_v22, %v1257_v50  ;;  %v688_v29 = vadd.f32 %v988_v23, %v1257_v50  ;;  %v943_v30 = vadd.f32 %v942_v26, %v941_v24  ;;  %v991_v31 = vadd.f32 %v990_v27, %v989_v25 }
 0x130   : > { %714 = vst [vmem:[%s1264_s7 + $0x60] sm:$0xff] %v624_v28  ;;  %730 = vst [vmem:[%s1264_s7 + $0xe0] sm:$0xff] %v688_v29  ;;  %v627_v32 = vadd.f32 %v943_v30, %v1257_v50  ;;  %v691_v33 = vadd.f32 %v991_v31, %v1257_v50 }
 0x132   : > { %715 = vst [vmem:[%s1264_s7 + $0x68] sm:$0xff] %v627_v32  ;;  %731 = vst [vmem:[%s1264_s7 + $0xe8] sm:$0xff] %v691_v33  ;;  %v944_v34 = vpop.f32.mrb[28].mxu0  ;;  %v992_v35 = vpop.f32.mrb[28].mxu1 }
 0x133   : > { %v945_v36 = vpop.f32.mrb[29].mxu0  ;;  %v993_v37 = vpop.f32.mrb[29].mxu1 }
 0x134   : > { %v946_v38 = vadd.f32 %v945_v36, %v944_v34  ;;  %v994_v39 = vadd.f32 %v993_v37, %v992_v35  ;;  %v947_v40 = vpop.f32.mrb[30].mxu0  ;;  %v995_v41 = vpop.f32.mrb[30].mxu1 }
 0x135   : > { %v948_v42 = vpop.f32.mrb[31].mxu0  ;;  %v996_v43 = vpop.f32.mrb[31].mxu1 }
 0x136   : > { %v632_v44 = vadd.f32 %v946_v38, %v1257_v50  ;;  %v696_v45 = vadd.f32 %v994_v39, %v1257_v50  ;;  %v949_v46 = vadd.f32 %v948_v42, %v947_v40  ;;  %v997_v47 = vadd.f32 %v996_v43, %v995_v41 }
 0x138   : > { %716 = vst [vmem:[%s1264_s7 + $0x70] sm:$0xff] %v632_v44  ;;  %732 = vst [vmem:[%s1264_s7 + $0xf0] sm:$0xff] %v696_v45  ;;  %v635_v48 = vadd.f32 %v949_v46, %v1257_v50  ;;  %v699_v49 = vadd.f32 %v997_v47, %v1257_v50 }
 0x13a   : > { %717 = vst [vmem:[%s1264_s7 + $0x78] sm:$0xff] %v635_v48  ;;  %733 = vst [vmem:[%s1264_s7 + $0xf8] sm:$0xff] %v699_v49 }
 0x13b PF: > { %s13_s14 = sadd.s32 1, %s1124_s14   ;;  %s1343_s12 = smov %s1120_s13 }
 0x13c   : > { %p10_p5 = scmp.ge.s32.totalorder %s13_s14, 4   ;;  %s1344_s13 = smov %s1346_s15 }
 0x13e   :  { %12 = sbr.rel (!%p10_p5) target bundleno = 2 (0x2), region = 62 }

// kernel: generator_forward.25
= control target key start
LH: loop header
LB: loop body
LE: loop exit
PB: predicated region body
PF: predicated region fallthrough
CT: control target
= control target key end

     0   :  { %s721_s12 = smov 0   ;;  %s723_s13 = smov 0   ;;  %s833_s0 = inlined_call_operand.vmem [shape: bf16[2,64,128], index: 0, kind: input, shape index: {}]   ;;  %s834_s1 = inlined_call_operand.vmem [shape: bf16[128,128], index: 1, kind: input, shape index: {}]   ;;  %s835_s2 = inlined_call_operand.vmem [shape: f32[1,128], index: 2, kind: input, shape index: {}]   ;;  %s836_s3 = inlined_call_operand.vmem [shape: f32[2,64,128], index: 3, kind: output, shape index: {}]  }
   0x1   :  { %s725_s14 = smov 0  }
   0x2 LB: > { %s25_s15 = sadd.s32 1, %s694_s13  ;;  %p563_p0 = scmp.ge.s32.totalorder %s698_s14, 1  ;;  %s698_s14 = sphi %s725_s14, %s13_s14   ;;  %s694_s13 = sphi %s723_s13, %s838_s13   ;;  %s690_s12 = sphi %s721_s12, %s837_s12  }
   0x3   : > { %p27_p1 = scmp.ge.s32.totalorder %s25_s15, 2  ;;  %p156_p2 = scmp.lt.s32.totalorder %s698_s14, 3 }
   0x5   : > { %s840_s15 = smov (%p27_p1, %s25_s15), 0  ;;  %p157_p3 = pnand %p563_p0, %p156_p2 }
   0x6   : > { %v662_v0 = vld [vmem:[%s834_s1] sm:$0xff] (!%p157_p3)   ;;  %p185_p4 = scmp.lt.s32.totalorder (!%p157_p3), %s690_s12, 1  ;;  %v663_v1 = vld [vmem:[%s834_s1 + $0x8] sm:$0xff] (!%p157_p3)   ;;  %v664_v2 = vld [vmem:[%s834_s1 + $0x10] sm:$0xff] (!%p157_p3)   ;;  %v700_v12 = vmov (!%p157_p3), 0.0  }
   0x7   : > { %160 = sbr.rel (%p157_p3) target bundleno = 323 (0x143), region = 32  ;;  %597 = vmatprep.subr.bf16.mxu0 (!%p157_p3), %v662_v0  ;;  %621 = vmatprep.subr.bf16.mxu1 (!%p157_p3), %v662_v0  ;;  %v665_v3 = vld [vmem:[%s834_s1 + $0x18] sm:$0xff] (!%p157_p3)   ;;  %v666_v6 = vld [vmem:[%s834_s1 + $0x20] sm:$0xff] (!%p157_p3)   ;;  %v667_v7 = vld [vmem:[%s834_s1 + $0x28] sm:$0xff] (!%p157_p3)   ;;  %204 = vst [vmem:[#allocation2] sm:$0x1] (!%p157_p3), %v700_v12 }
   0x8   : > { %598 = vmatpush3.bf16.msra.mxu0 (!%p157_p3), %v662_v0  ;;  %629 = vmatpush3.bf16.msra.mxu1 (!%p157_p3), %v662_v0  ;;  %v668_v8 = vld [vmem:[%s834_s1 + $0x30] sm:$0xff] (!%p157_p3)   ;;  %v669_v9 = vld [vmem:[%s834_s1 + $0x38] sm:$0xff] (!%p157_p3)   ;;  %205 = vst [vmem:[#allocation3] sm:$0x1] (!%p157_p3), %v700_v12  ;;  %v568_v13 = vld [vmem:[%s835_s2] ss:$0 sm:$0xff] (!%p157_p3) }
   0x9   : > { %599 = vmatprep.subr.bf16.mxu0 (!%p157_p3), %v663_v1  ;;  %622 = vmatprep.subr.bf16.mxu1 (!%p157_p3), %v663_v1 }
   0xc   : > { %600 = vmatpush3.bf16.msra.mxu0 (!%p157_p3), %v663_v1  ;;  %630 = vmatpush3.bf16.msra.mxu1 (!%p157_p3), %v663_v1 }
   0xd   : > { %601 = vmatprep.subr.bf16.mxu0 (!%p157_p3), %v664_v2  ;;  %623 = vmatprep.subr.bf16.mxu1 (!%p157_p3), %v664_v2 }
   0xe   : > { %s842_s12 = smov (!%p185_p4, %s690_s12), 1  ;;  %v384_v61 = vld [vmem:[#allocation2] sm:$0x1] }
   0xf   : > { %s583_s22 = sshll.u32 %s842_s12, 5  ;;  %v400_v0 = vld [vmem:[#allocation3] sm:$0x1]  ;;  %s584_s11 = sshll.u32 %s842_s12, 6 }
  0x10   : > { %s754_s25 = scalar_lea.vmem %s833_s0, %s583_s22  ;;  %602 = vmatpush3.bf16.msra.mxu0 %v664_v2  ;;  %631 = vmatpush3.bf16.msra.mxu1 %v664_v2  ;;  %s198_s17 = scalar_lea.vmem %s836_s3, %s584_s11 }
  0x11   : > { %v670_v4 = vld [vmem:[%s754_s25] sm:$0xff]   ;;  %v672_v5 = vld [vmem:[%s754_s25 + $0x10] sm:$0xff]   ;;  %603 = vmatprep.subr.bf16.mxu0 %v665_v3  ;;  %624 = vmatprep.subr.bf16.mxu1 %v665_v3  ;;  %v671_v10 = vld [vmem:[%s754_s25 + $0x8] sm:$0xff]  }
  0x12   : > { %613 = vmatprep.mubr.bf16.mxu0 %v670_v4  ;;  %617 = vmatprep.mubr.bf16.mxu1 %v672_v5  ;;  %v673_v11 = vld [vmem:[%s754_s25 + $0x18] sm:$0xff]  }
  0x14   : > { %604 = vmatpush3.bf16.msra.mxu0 %v665_v3  ;;  %632 = vmatpush3.bf16.msra.mxu1 %v665_v3 }
  0x15   : > { %605 = vmatprep.subr.bf16.mxu0 %v666_v6  ;;  %625 = vmatprep.subr.bf16.mxu1 %v666_v6 }
  0x18   : > { %606 = vmatpush3.bf16.msra.mxu0 %v666_v6  ;;  %633 = vmatpush3.bf16.msra.mxu1 %v666_v6 }
  0x19   : > { %607 = vmatprep.subr.bf16.mxu0 %v667_v7  ;;  %626 = vmatprep.subr.bf16.mxu1 %v667_v7 }
  0x1c   : > { %608 = vmatpush3.bf16.msra.mxu0 %v667_v7  ;;  %634 = vmatpush3.bf16.msra.mxu1 %v667_v7 }
  0x1d   : > { %609 = vmatprep.subr.bf16.mxu0 %v668_v8  ;;  %627 = vmatprep.subr.bf16.mxu1 %v668_v8 }
  0x20   : > { %610 = vmatpush3.bf16.msra.mxu0 %v668_v8  ;;  %635 = vmatpush3.bf16.msra.mxu1 %v668_v8 }
  0x21   : > { %611 = vmatprep.subr.bf16.mxu0 %v669_v9  ;;  %628 = vmatprep.subr.bf16.mxu1 %v669_v9 }
  0x24   : > { %612 = vmatpush3.bf16.msra.mxu0 %v669_v9  ;;  %636 = vmatpush3.bf16.msra.mxu1 %v669_v9 }
  0x27   : > { %614 = vmatmul.mubr.bf16.vlgmr.msra.gmra.mrb[0].mxu0 %v671_v10  ;;  %618 = vmatmul.mubr.bf16.vlgmr.msra.gmra.mrb[0].mxu1 %v673_v11  ;;  %v445_v10 = vlaneseq }
  0xfa   : > { %v615_v14 = vpop.f32.mrb[0].mxu0  ;;  %v619_v15 = vpop.f32.mrb[0].mxu1 }
  0xfb   : > { %v344_v16 = vpop.f32.mrb[1].mxu0  ;;  %v360_v17 = vpop.f32.mrb[1].mxu1  ;;  %v780_v23 = vadd.f32 %v615_v14, %v568_v13  ;;  %v804_v38 = vadd.f32 %v619_v15, %v568_v13 }
  0xfc   : > { %v778_v18 = vadd.f32 %v568_v13, %v344_v16  ;;  %v616_v19 = vpop.f32.mrb[2].mxu0  ;;  %v620_v20 = vpop.f32.mrb[2].mxu1  ;;  %v784_v25 = vadd.f32 %v568_v13, %v360_v17 }
  0xfd   : > { %v347_v21 = vpop.f32.mrb[3].mxu0  ;;  %v363_v22 = vpop.f32.mrb[3].mxu1  ;;  %v788_v27 = vadd.f32 %v616_v19, %v568_v13  ;;  %v403_v30 = vmul.f32 %v780_v23, %v780_v23  ;;  %v372_v42 = vadd.f32 %v620_v20, %v568_v13  ;;  %v407_v45 = vmul.f32 %v804_v38, %v804_v38 }
  0xfe   : > { %v782_v24 = vadd.f32 %v568_v13, %v347_v21  ;;  %v401_v26 = vmul.f32 %v778_v18, %v778_v18  ;;  %v405_v33 = vmul.f32 %v784_v25, %v784_v25  ;;  %v802_v37 = vadd.f32 %v568_v13, %v363_v22 }
  0xff   : > { %v404_v34 = vmul.f32 %v788_v27, %v788_v27  ;;  %v408_v48 = vmul.f32 %v372_v42, %v372_v42  ;;  %v446_v13 = vshrl.u32 %v445_v10, 7 }
 0x100   : > { %v385_v28 = vadd.f32 %v782_v24, %v778_v18  ;;  %v402_v29 = vmul.f32 %v782_v24, %v782_v24  ;;  %v406_v44 = vmul.f32 %v802_v37, %v802_v37 }
 0x101   : > { %v447_v14 = vsub.s32 0, %v446_v13 }
 0x102   : > { %v386_v31 = vadd.f32 %v385_v28, %v780_v23  ;;  %v409_v32 = vadd.f32 %v402_v29, %v401_v26 }
 0x104   : > { %v410_v35 = vadd.f32 %v409_v32, %v403_v30  ;;  %v387_v36 = vadd.f32 %v386_v31, %v788_v27 }
 0x106   : > { %v388_v39 = vadd.f32 %v387_v36, %v784_v25  ;;  %v411_v40 = vadd.f32 %v410_v35, %v404_v34 }
 0x108   : > { %v412_v41 = vadd.f32 %v411_v40, %v405_v33  ;;  %v389_v43 = vadd.f32 %v388_v39, %v802_v37 }
 0x10a   : > { %v390_v46 = vadd.f32 %v389_v43, %v804_v38  ;;  %v413_v47 = vadd.f32 %v412_v41, %v406_v44 }
 0x10c   : > { %v391_v49 = vadd.f32 %v390_v46, %v372_v42  ;;  %v414_v50 = vadd.f32 %v413_v47, %v407_v45 }
 0x10e   : > { %v392_v51 = vrot.slane %v391_v49, 4  ;;  %v415_v52 = vadd.f32 %v414_v50, %v408_v48 }
 0x110   : > { %v393_v53 = vadd.f32 %v392_v51, %v391_v49  ;;  %v416_v54 = vrot.slane %v415_v52, 4 }
 0x112   : > { %v394_v55 = vrot.slane %v393_v53, 2  ;;  %v417_v56 = vadd.f32 %v416_v54, %v415_v52 }
 0x114   : > { %v395_v57 = vadd.f32 %v394_v55, %v393_v53  ;;  %v418_v58 = vrot.slane %v417_v56, 2 }
 0x116   : > { %v396_v59 = vrot.slane %v395_v57, 1  ;;  %v419_v60 = vadd.f32 %v418_v58, %v417_v56 }
 0x118   : > { %v397_v62 = vadd.f32 %v396_v59, %v395_v57  ;;  %v420_v63 = vrot.slane %v419_v60, 1 }
 0x11a   : > { %v398_v1 = vadd.f32 %v397_v62, %v384_v61  ;;  %v421_v2 = vadd.f32 %v420_v63, %v419_v60 }
 0x11c   : > { %399 = vst [vmem:[#allocation2] sm:$0x1] %v398_v1  ;;  %v422_v3 = vadd.f32 %v421_v2, %v400_v0 }
 0x11e   : > { %423 = vst [vmem:[#allocation3] sm:$0x1] %v422_v3 }
 0x123   : > { %v427_v4 = vld [vmem:[#allocation2] sm:$0x1] }
 0x124   : > { %v428_v5 = vmul.f32 0.015625, %v427_v4 }
 0x125   : > { %v429_v6 = vld [vmem:[#allocation3] sm:$0x1] }
 0x126   : > { %v430_v7 = vmul.f32 0.015625, %v429_v6  ;;  %v431_v8 = vmul.f32 %v428_v5, %v428_v5  ;;  %v448_v15 = vrot.slane %v428_v5, %v447_v14 }
 0x128   : > { %v432_v9 = vsub.f32 %v430_v7, %v431_v8  ;;  %v450_v17 = vsub.f32 %v778_v18, %v448_v15  ;;  %v451_v19 = vsub.f32 %v782_v24, %v448_v15  ;;  %v452_v20 = vsub.f32 %v780_v23, %v448_v15 }
 0x129   : > { %v453_v21 = vsub.f32 %v788_v27, %v448_v15  ;;  %v454_v26 = vsub.f32 %v784_v25, %v448_v15  ;;  %v455_v28 = vsub.f32 %v802_v37, %v448_v15  ;;  %v456_v29 = vsub.f32 %v804_v38, %v448_v15 }
 0x12a   : > { %v433_v11 = vmax.f32 %v432_v9, 0.0  ;;  %v457_v30 = vsub.f32 %v372_v42, %v448_v15 }
 0x12c   : > { %v434_v12 = vadd.f32 1e-05, %v433_v11 }
 0x12e   : > { %674 = vrsqrt.f32 %v434_v12 }
 0x138   : > { %v675_v16 = vpop.eup %674 }
 0x139   : > { %v462_v22 = vrot.slane %v675_v16, %v447_v14 }
 0x13b   : > { %v464_v31 = vmul.f32 %v462_v22, %v450_v17  ;;  %v465_v32 = vmul.f32 %v462_v22, %v451_v19  ;;  %v466_v33 = vmul.f32 %v462_v22, %v452_v20  ;;  %v467_v34 = vmul.f32 %v462_v22, %v453_v21 }
 0x13c   : > { %v468_v18 = vmul.f32 %v462_v22, %v454_v26  ;;  %v469_v23 = vmul.f32 %v462_v22, %v455_v28  ;;  %v470_v24 = vmul.f32 %v462_v22, %v456_v29  ;;  %v471_v27 = vmul.f32 %v462_v22, %v457_v30 }
 0x13d   : > { %v472_v35 = vmax.f32 %v464_v31, 0.0  ;;  %v473_v36 = vmax.f32 %v465_v32, 0.0  ;;  %v474_v25 = vmax.f32 %v466_v33, 0.0  ;;  %v475_v39 = vmax.f32 %v467_v34, 0.0 }
 0x13e   : > { %v476_v37 = vmax.f32 %v468_v18, 0.0  ;;  %v477_v40 = vmax.f32 %v469_v23, 0.0  ;;  %v478_v38 = vmax.f32 %v470_v24, 0.0  ;;  %v479_v41 = vmax.f32 %v471_v27, 0.0 }
 0x13f   : > { %480 = vst [vmem:[%s198_s17] sm:$0xff] %v472_v35  ;;  %481 = vst [vmem:[%s198_s17 + $0x8] sm:$0xff] %v473_v36 }
 0x140   : > { %482 = vst [vmem:[%s198_s17 + $0x10] sm:$0xff] %v474_v25  ;;  %483 = vst [vmem:[%s198_s17 + $0x18] sm:$0xff] %v475_v39 }
 0x141   : > { %484 = vst [vmem:[%s198_s17 + $0x20] sm:$0xff] %v476_v37  ;;  %485 = vst [vmem:[%s198_s17 + $0x28] sm:$0xff] %v477_v40 }
 0x142   : > { %486 = vst [vmem:[%s198_s17 + $0x30] sm:$0xff] %v478_v38  ;;  %487 = vst [vmem:[%s198_s17 + $0x38] sm:$0xff] %v479_v41 }
 0x143 PF: > { %s13_s14 = sadd.s32 1, %s698_s14   ;;  %s837_s12 = smov %s694_s13 }
 0x144   : > { %p10_p5 = scmp.ge.s32.totalorder %s13_s14, 4   ;;  %s838_s13 = smov %s840_s15 }
 0x146   :  { %12 = sbr.rel (!%p10_p5) target bundleno = 2 (0x2), region = 71 }

// kernel: generator_forward.26
= control target key start
LH: loop header
LB: loop body
LE: loop exit
PB: predicated region body
PF: predicated region fallthrough
CT: control target
= control target key end

     0   :  { %s592_s12 = smov 0   ;;  %s594_s13 = smov 0   ;;  %s656_s0 = inlined_call_operand.vmem [shape: bf16[2,16,128], index: 0, kind: input, shape index: {}]   ;;  %s657_s1 = inlined_call_operand.vmem [shape: bf16[128,128], index: 1, kind: input, shape index: {}]   ;;  %s658_s2 = inlined_call_operand.vmem [shape: f32[1,128], index: 2, kind: input, shape index: {}]   ;;  %s659_s3 = inlined_call_operand.vmem [shape: f32[2,16,128], index: 3, kind: output, shape index: {}]  }
   0x1   :  { %s596_s14 = smov 0  }
   0x2 LB: > { %s25_s15 = sadd.s32 1, %s564_s13  ;;  %p461_p0 = scmp.ge.s32.totalorder %s568_s14, 1  ;;  %s568_s14 = sphi %s596_s14, %s13_s14   ;;  %s564_s13 = sphi %s594_s13, %s661_s13   ;;  %s560_s12 = sphi %s592_s12, %s660_s12  }
   0x3   : > { %p27_p1 = scmp.ge.s32.totalorder %s25_s15, 2  ;;  %p156_p2 = scmp.lt.s32.totalorder %s568_s14, 3 }
   0x5   : > { %s663_s15 = smov (%p27_p1, %s25_s15), 0  ;;  %p157_p3 = pnand %p461_p0, %p156_p2 }
   0x6   : > { %v535_v0 = vld [vmem:[%s657_s1] sm:$0xff] (!%p157_p3)   ;;  %v570_v1 = vmov (!%p157_p3), 0.0   ;;  %v536_v2 = vld [vmem:[%s657_s1 + $0x8] sm:$0xff] (!%p157_p3)   ;;  %vm571_vm0 = vmmov (!%p157_p3), 0   ;;  %p185_p4 = scmp.lt.s32.totalorder (!%p157_p3), %s560_s12, 1  ;;  %v537_v3 = vld [vmem:[%s657_s1 + $0x10] sm:$0xff] (!%p157_p3)   ;;  %v367_v43 = vlaneseq (!%p157_p3) }
   0x7   : > { %160 = sbr.rel (%p157_p3) target bundleno = 307 (0x133), region = 32  ;;  %489 = vmatprep.subr.bf16.mxu0 (!%p157_p3), %v570_v1  ;;  %204 = vst [vmem:[#allocation2] sm:$0x1] (!%p157_p3), %v570_v1  ;;  %205 = vst [vmem:[#allocation3] sm:$0x1] (!%p157_p3), %v570_v1  ;;  %505 = vmatprep.mubr.msk.bf16.mxu0 (!%p157_p3), %vm571_vm0, %v570_v1  ;;  %v538_v4 = vld [vmem:[%s657_s1 + $0x18] sm:$0xff] (!%p157_p3)  }
   0x8   : > { %490 = vmatpush3.bf16.msra.mxu0 (!%p157_p3), %v535_v0  ;;  %v539_v5 = vld [vmem:[%s657_s1 + $0x20] sm:$0xff] (!%p157_p3)   ;;  %v540_v6 = vld [vmem:[%s657_s1 + $0x28] sm:$0xff] (!%p157_p3)   ;;  %v541_v7 = vld [vmem:[%s657_s1 + $0x30] sm:$0xff] (!%p157_p3)   ;;  %v368_v46 = vshrl.u32 (!%p157_p3), %v367_v43, 7 }
   0x9   : > { %491 = vmatprep.subr.bf16.mxu0 (!%p157_p3), %v570_v1  ;;  %v542_v8 = vld [vmem:[%s657_s1 + $0x38] sm:$0xff] (!%p157_p3)   ;;  %v466_v10 = vld [vmem:[%s658_s2] ss:$0 sm:$0xff] (!%p157_p3) }
   0xa   : > { %v369_v47 = vsub.s32 (!%p157_p3), 0, %v368_v46 }
   0xc   : > { %492 = vmatpush3.bf16.msra.mxu0 (!%p157_p3), %v536_v2 }
   0xd   : > { %493 = vmatprep.subr.bf16.mxu0 (!%p157_p3), %v570_v1 }
   0xe   : > { %s665_s12 = smov (!%p185_p4, %s560_s12), 1  ;;  %v330_v30 = vld [vmem:[#allocation2] sm:$0x1]  ;;  %v340_v33 = vld [vmem:[#allocation3] sm:$0x1] }
   0xf   : > { %s478_s22 = sshll.u32 %s665_s12, 3  ;;  %s479_s11 = sshll.u32 %s665_s12, 4 }
  0x10   : > { %s192_s25 = scalar_lea.vmem %s656_s0, %s478_s22  ;;  %494 = vmatpush3.bf16.msra.mxu0 %v537_v3  ;;  %s198_s18 = scalar_lea.vmem %s659_s3, %s479_s11 }
  0x11   : > { %495 = vmatprep.subr.bf16.mxu0 %v570_v1  ;;  %v543_v9 = vld [vmem:[%s192_s25] sm:$0xff]  }
  0x14   : > { %496 = vmatpush3.bf16.msra.mxu0 %v538_v4 }
  0x15   : > { %497 = vmatprep.subr.bf16.mxu0 %v570_v1 }
  0x18   : > { %498 = vmatpush3.bf16.msra.mxu0 %v539_v5 }
  0x19   : > { %499 = vmatprep.subr.bf16.mxu0 %v570_v1 }
  0x1c   : > { %500 = vmatpush3.bf16.msra.mxu0 %v540_v6 }
  0x1d   : > { %501 = vmatprep.subr.bf16.mxu0 %v570_v1 }
  0x20   : > { %502 = vmatpush3.bf16.msra.mxu0 %v541_v7 }
  0x21   : > { %503 = vmatprep.subr.bf16.mxu0 %v570_v1 }
  0x24   : > { %504 = vmatpush3.bf16.msra.mxu0 %v542_v8 }
  0x27   : > { %506 = vmatmul.mubr.bf16.vlgmr.msra.gmra.mrb[0].mxu0 %v543_v9 }
  0xfa   : > { %v320_v11 = vpop.f32.mrb[0].mxu0 }
  0xfb   : > { %v321_v12 = vadd.f32 %v466_v10, %v320_v11  ;;  %v507_v13 = vpop.f32.mrb[1].mxu0 }
  0xfc   : > { %v323_v14 = vpop.f32.mrb[2].mxu0 }
  0xfd   : > { %v324_v15 = vadd.f32 %v466_v10, %v323_v14  ;;  %v508_v16 = vpop.f32.mrb[3].mxu0  ;;  %v341_v17 = vmul.f32 %v321_v12, %v321_v12 }
  0xff   : > { %v331_v18 = vadd.f32 %v324_v15, %v321_v12  ;;  %v342_v19 = vmul.f32 %v324_v15, %v324_v15 }
 0x101   : > { %v332_v20 = vrot.slane %v331_v18, 4  ;;  %v343_v21 = vadd.f32 %v342_v19, %v341_v17 }
 0x103   : > { %v333_v22 = vadd.f32 %v332_v20, %v331_v18  ;;  %v344_v23 = vrot.slane %v343_v21, 4 }
 0x105   : > { %v334_v24 = vrot.slane %v333_v22, 2  ;;  %v345_v25 = vadd.f32 %v344_v23, %v343_v21 }
 0x107   : > { %v335_v26 = vadd.f32 %v334_v24, %v333_v22  ;;  %v346_v27 = vrot.slane %v345_v25, 2 }
 0x109   : > { %v336_v28 = vrot.slane %v335_v26, 1  ;;  %v347_v29 = vadd.f32 %v346_v27, %v345_v25 }
 0x10b   : > { %v337_v31 = vadd.f32 %v336_v28, %v335_v26  ;;  %v348_v32 = vrot.slane %v347_v29, 1 }
 0x10d   : > { %v338_v34 = vadd.f32 %v337_v31, %v330_v30  ;;  %v349_v35 = vadd.f32 %v348_v32, %v347_v29 }
 0x10f   : > { %339 = vst [vmem:[#allocation2] sm:$0x1] %v338_v34  ;;  %v350_v36 = vadd.f32 %v349_v35, %v340_v33 }
 0x111   : > { %351 = vst [vmem:[#allocation3] sm:$0x1] %v350_v36 }
 0x116   : > { %v355_v37 = vld [vmem:[#allocation2] sm:$0x1] }
 0x117   : > { %v356_v38 = vmul.f32 0.0625, %v355_v37 }
 0x118   : > { %v357_v39 = vld [vmem:[#allocation3] sm:$0x1] }
 0x119   : > { %v358_v40 = vmul.f32 0.0625, %v357_v39  ;;  %v359_v41 = vmul.f32 %v356_v38, %v356_v38  ;;  %v370_v48 = vrot.slane %v356_v38, %v369_v47 }
 0x11b   : > { %v360_v42 = vsub.f32 %v358_v40, %v359_v41  ;;  %v372_v50 = vsub.f32 %v321_v12, %v370_v48  ;;  %v373_v51 = vsub.f32 %v324_v15, %v370_v48 }
 0x11d   : > { %v361_v44 = vmax.f32 %v360_v42, 0.0 }
 0x11f   : > { %v362_v45 = vadd.f32 1e-05, %v361_v44 }
 0x121   : > { %544 = vrsqrt.f32 %v362_v45 }
 0x12b   : > { %v545_v49 = vpop.eup %544 }
 0x12c   : > { %v378_v52 = vrot.slane %v545_v49, %v369_v47 }
 0x12e   : > { %v380_v53 = vmul.f32 %v378_v52, %v372_v50  ;;  %v381_v54 = vmul.f32 %v378_v52, %v373_v51 }
 0x130   : > { %v382_v55 = vmax.f32 %v380_v53, 0.0  ;;  %v383_v56 = vmax.f32 %v381_v54, 0.0 }
 0x132   : > { %384 = vst [vmem:[%s198_s18] sm:$0xff] %v382_v55  ;;  %385 = vst [vmem:[%s198_s18 + $0x8] sm:$0xff] %v383_v56 }
 0x133 PF: > { %s13_s14 = sadd.s32 1, %s568_s14   ;;  %s660_s12 = smov %s564_s13 }
 0x134   : > { %p10_p5 = scmp.ge.s32.totalorder %s13_s14, 4   ;;  %s661_s13 = smov %s663_s15 }
 0x136   :  { %12 = sbr.rel (!%p10_p5) target bundleno = 2 (0x2), region = 71 }

// kernel: generator_forward.27
= control target key start
LH: loop header
LB: loop body
LE: loop exit
PB: predicated region body
PF: predicated region fallthrough
CT: control target
= control target key end

     0   :  { %s676_s12 = smov 0   ;;  %s678_s13 = smov 0   ;;  %s767_s0 = inlined_call_operand.vmem [shape: bf16[2,16,256], index: 0, kind: input, shape index: {}]   ;;  %s768_s1 = inlined_call_operand.vmem [shape: bf16[256,128], index: 1, kind: input, shape index: {}]   ;;  %s769_s2 = inlined_call_operand.vmem [shape: f32[1,128], index: 2, kind: input, shape index: {}]   ;;  %s770_s3 = inlined_call_operand.vmem [shape: f32[2,16,128], index: 3, kind: output, shape index: {}]  }
   0x1   :  { %s680_s14 = smov 0  }
   0x2 LB: > { %s25_s15 = sadd.s32 1, %s649_s13  ;;  %p535_p0 = scmp.ge.s32.totalorder %s653_s14, 1  ;;  %s653_s14 = sphi %s680_s14, %s13_s14   ;;  %s649_s13 = sphi %s678_s13, %s772_s13   ;;  %s645_s12 = sphi %s676_s12, %s771_s12  }
   0x3   : > { %p27_p1 = scmp.ge.s32.totalorder %s25_s15, 2  ;;  %p157_p2 = scmp.lt.s32.totalorder %s653_s14, 3 }
   0x5   : > { %s774_s15 = smov (%p27_p1, %s25_s15), 0  ;;  %p158_p3 = pnand %p535_p0, %p157_p2 }
   0x6   : > { %v610_v0 = vld [vmem:[%s768_s1 + $0x40] sm:$0xff] (!%p158_p3)   ;;  %v612_v2 = vld [vmem:[%s768_s1 + $0x48] sm:$0xff] (!%p158_p3)   ;;  %p187_p4 = scmp.lt.s32.totalorder (!%p158_p3), %s645_s12, 1  ;;  %v614_v4 = vld [vmem:[%s768_s1 + $0x50] sm:$0xff] (!%p158_p3)   ;;  %v655_v18 = vmov (!%p158_p3), 0.0   ;;  %v438_v54 = vlaneseq (!%p158_p3) }
   0x7   : > { %161 = sbr.rel (%p158_p3) target bundleno = 310 (0x136), region = 32  ;;  %v611_v1 = vld [vmem:[%s768_s1] sm:$0xff] (!%p158_p3)   ;;  %563 = vmatprep.subr.bf16.mxu0 (!%p158_p3), %v610_v0  ;;  %v613_v3 = vld [vmem:[%s768_s1 + $0x8] sm:$0xff] (!%p158_p3)   ;;  %v615_v5 = vld [vmem:[%s768_s1 + $0x10] sm:$0xff] (!%p158_p3)   ;;  %207 = vst [vmem:[#allocation2] sm:$0x1] (!%p158_p3), %v655_v18 }
   0x8   : > { %564 = vmatpush3.bf16.msra.mxu0 (!%p158_p3), %v611_v1  ;;  %v616_v6 = vld [vmem:[%s768_s1 + $0x58] sm:$0xff] (!%p158_p3)   ;;  %v618_v8 = vld [vmem:[%s768_s1 + $0x60] sm:$0xff] (!%p158_p3)   ;;  %v620_v10 = vld [vmem:[%s768_s1 + $0x68] sm:$0xff] (!%p158_p3)   ;;  %208 = vst [vmem:[#allocation3] sm:$0x1] (!%p158_p3), %v655_v18  ;;  %v439_v57 = vshrl.u32 (!%p158_p3), %v438_v54, 7 }
   0x9   : > { %565 = vmatprep.subr.bf16.mxu0 (!%p158_p3), %v612_v2  ;;  %v617_v7 = vld [vmem:[%s768_s1 + $0x18] sm:$0xff] (!%p158_p3)   ;;  %v619_v9 = vld [vmem:[%s768_s1 + $0x20] sm:$0xff] (!%p158_p3)   ;;  %v621_v12 = vld [vmem:[%s768_s1 + $0x28] sm:$0xff] (!%p158_p3)  }
   0xa   : > { %v622_v13 = vld [vmem:[%s768_s1 + $0x70] sm:$0xff] (!%p158_p3)   ;;  %v624_v15 = vld [vmem:[%s768_s1 + $0x78] sm:$0xff] (!%p158_p3)   ;;  %v540_v20 = vld [vmem:[%s769_s2] ss:$0 sm:$0xff] (!%p158_p3)  ;;  %v440_v58 = vsub.s32 (!%p158_p3), 0, %v439_v57 }
   0xb   : > { %v623_v14 = vld [vmem:[%s768_s1 + $0x30] sm:$0xff] (!%p158_p3)   ;;  %v625_v16 = vld [vmem:[%s768_s1 + $0x38] sm:$0xff] (!%p158_p3)  }
   0xc   : > { %566 = vmatpush3.bf16.msra.mxu0 (!%p158_p3), %v613_v3 }
   0xd   : > { %567 = vmatprep.subr.bf16.mxu0 (!%p158_p3), %v614_v4 }
   0xe   : > { %s776_s12 = smov (!%p187_p4, %s645_s12), 1  ;;  %v401_v41 = vld [vmem:[#allocation2] sm:$0x1] }
   0xf   : > { %s561_s5 = sshll.u32 %s776_s12, 4  ;;  %v411_v44 = vld [vmem:[#allocation3] sm:$0x1] }
  0x10   : > { %568 = vmatpush3.bf16.msra.mxu0 %v615_v5  ;;  %s195_s10 = scalar_lea.vmem %s767_s0, %s561_s5  ;;  %s201_s7 = scalar_lea.vmem %s770_s3, %s561_s5 }
  0x11   : > { %569 = vmatprep.subr.bf16.mxu0 %v616_v6  ;;  %v628_v11 = vld [vmem:[%s195_s10 + $0x4] ss:$8 sps:$4 sm:$0xff]   ;;  %v626_v17 = vld [vmem:[%s195_s10] ss:$8 sps:$4 sm:$0xff]  }
  0x12   : > { %389 = vmatprep.mubr.bf16.mxu0 %v628_v11 }
  0x14   : > { %570 = vmatpush3.bf16.msra.mxu0 %v617_v7 }
  0x15   : > { %571 = vmatprep.subr.bf16.mxu0 %v618_v8 }
  0x18   : > { %572 = vmatpush3.bf16.msra.mxu0 %v619_v9 }
  0x19   : > { %573 = vmatprep.subr.bf16.mxu0 %v620_v10 }
  0x1c   : > { %574 = vmatpush3.bf16.msra.mxu0 %v621_v12 }
  0x1d   : > { %575 = vmatprep.subr.bf16.mxu0 %v622_v13 }
  0x20   : > { %576 = vmatpush3.bf16.msra.mxu0 %v623_v14 }
  0x21   : > { %577 = vmatprep.subr.bf16.mxu0 %v624_v15 }
  0x24   : > { %578 = vmatpush3.bf16.msra.mxu0 %v625_v16 }
  0x27   : > { %390 = vmatmul.mubr.bf16.vlgmr.msra.gmra.mrb[0].mxu0 %v626_v17 }
  0xfa   : > { %v579_v19 = vpop.f32.mrb[0].mxu0 }
  0xfb   : > { %v580_v21 = vpop.f32.mrb[1].mxu0 }
  0xfc   : > { %v581_v22 = vadd.f32 %v580_v21, %v579_v19  ;;  %v582_v23 = vpop.f32.mrb[2].mxu0 }
  0xfd   : > { %v583_v24 = vpop.f32.mrb[3].mxu0 }
  0xfe   : > { %v392_v25 = vadd.f32 %v581_v22, %v540_v20  ;;  %v584_v26 = vadd.f32 %v583_v24, %v582_v23 }
 0x100   : > { %v395_v27 = vadd.f32 %v584_v26, %v540_v20  ;;  %v412_v28 = vmul.f32 %v392_v25, %v392_v25 }
 0x102   : > { %v402_v29 = vadd.f32 %v395_v27, %v392_v25  ;;  %v413_v30 = vmul.f32 %v395_v27, %v395_v27 }
 0x104   : > { %v403_v31 = vrot.slane %v402_v29, 4  ;;  %v414_v32 = vadd.f32 %v413_v30, %v412_v28 }
 0x106   : > { %v404_v33 = vadd.f32 %v403_v31, %v402_v29  ;;  %v415_v34 = vrot.slane %v414_v32, 4 }
 0x108   : > { %v405_v35 = vrot.slane %v404_v33, 2  ;;  %v416_v36 = vadd.f32 %v415_v34, %v414_v32 }
 0x10a   : > { %v406_v37 = vadd.f32 %v405_v35, %v404_v33  ;;  %v417_v38 = vrot.slane %v416_v36, 2 }
 0x10c   : > { %v407_v39 = vrot.slane %v406_v37, 1  ;;  %v418_v40 = vadd.f32 %v417_v38, %v416_v36 }
 0x10e   : > { %v408_v42 = vadd.f32 %v407_v39, %v406_v37  ;;  %v419_v43 = vrot.slane %v418_v40, 1 }
 0x110   : > { %v409_v45 = vadd.f32 %v408_v42, %v401_v41  ;;  %v420_v46 = vadd.f32 %v419_v43, %v418_v40 }
 0x112   : > { %410 = vst [vmem:[#allocation2] sm:$0x1] %v409_v45  ;;  %v421_v47 = vadd.f32 %v420_v46, %v411_v44 }
 0x114   : > { %422 = vst [vmem:[#allocation3] sm:$0x1] %v421_v47 }
 0x119   : > { %v426_v48 = vld [vmem:[#allocation2] sm:$0x1] }
 0x11a   : > { %v427_v49 = vmul.f32 0.0625, %v426_v48 }
 0x11b   : > { %v428_v50 = vld [vmem:[#allocation3] sm:$0x1] }
 0x11c   : > { %v429_v51 = vmul.f32 0.0625, %v428_v50  ;;  %v430_v52 = vmul.f32 %v427_v49, %v427_v49  ;;  %v441_v59 = vrot.slane %v427_v49, %v440_v58 }
 0x11e   : > { %v431_v53 = vsub.f32 %v429_v51, %v430_v52  ;;  %v443_v61 = vsub.f32 %v392_v25, %v441_v59  ;;  %v444_v62 = vsub.f32 %v395_v27, %v441_v59 }
 0x120   : > { %v432_v55 = vmax.f32 %v431_v53, 0.0 }
 0x122   : > { %v433_v56 = vadd.f32 1e-05, %v432_v55 }
 0x124   : > { %629 = vrsqrt.f32 %v433_v56 }
 0x12e   : > { %v630_v60 = vpop.eup %629 }
 0x12f   : > { %v449_v63 = vrot.slane %v630_v60, %v440_v58 }
 0x131   : > { %v451_v0 = vmul.f32 %v449_v63, %v443_v61  ;;  %v452_v1 = vmul.f32 %v449_v63, %v444_v62 }
 0x133   : > { %v453_v2 = vmax.f32 %v451_v0, 0.0  ;;  %v454_v3 = vmax.f32 %v452_v1, 0.0 }
 0x135   : > { %455 = vst [vmem:[%s201_s7] sm:$0xff] %v453_v2  ;;  %456 = vst [vmem:[%s201_s7 + $0x8] sm:$0xff] %v454_v3 }
 0x136 PF: > { %s13_s14 = sadd.s32 1, %s653_s14   ;;  %s771_s12 = smov %s649_s13 }
 0x137   : > { %p10_p5 = scmp.ge.s32.totalorder %s13_s14, 4   ;;  %s772_s13 = smov %s774_s15 }
 0x139   :  { %12 = sbr.rel (!%p10_p5) target bundleno = 2 (0x2), region = 71 }

// kernel: generator_forward.28
= control target key start
LH: loop header
LB: loop body
LE: loop exit
PB: predicated region body
PF: predicated region fallthrough
CT: control target
= control target key end

     0   :  { %s745_s15 = smov 0   ;;  %s747_s16 = smov 0   ;;  %s837_s0 = inlined_call_operand.vmem [shape: bf16[2,16,256], index: 0, kind: input, shape index: {}]   ;;  %s838_s1 = inlined_call_operand.vmem [shape: bf16[256,128], index: 1, kind: input, shape index: {}]   ;;  %s839_s2 = inlined_call_operand.vmem [shape: f32[1,128], index: 2, kind: input, shape index: {}]   ;;  %s840_s3 = inlined_call_operand.vmem [shape: f32[2,16,128], index: 3, kind: input, shape index: {}]   ;;  %s841_s4 = inlined_call_operand.vmem [shape: f32[2,16,128], index: 4, kind: output, shape index: {}]  }
   0x1   :  { %s749_s17 = smov 0  }
   0x2 LB: > { %s26_s18 = sadd.s32 1, %s713_s16  ;;  %p596_p0 = scmp.ge.s32.totalorder %s717_s17, 1  ;;  %s717_s17 = sphi %s749_s17, %s14_s17   ;;  %s713_s16 = sphi %s747_s16, %s843_s16   ;;  %s709_s15 = sphi %s745_s15, %s842_s15  }
   0x3   : > { %p28_p1 = scmp.ge.s32.totalorder %s26_s18, 2  ;;  %p192_p2 = scmp.lt.s32.totalorder %s717_s17, 3 }
   0x5   : > { %s845_s18 = smov (%p28_p1, %s26_s18), 0  ;;  %p193_p3 = pnand %p596_p0, %p192_p2 }
   0x6   : > { %v674_v0 = vld [vmem:[%s838_s1 + $0x40] sm:$0xff] (!%p193_p3)   ;;  %v676_v2 = vld [vmem:[%s838_s1 + $0x48] sm:$0xff] (!%p193_p3)   ;;  %p229_p4 = scmp.lt.s32.totalorder (!%p193_p3), %s709_s15, 1  ;;  %v678_v4 = vld [vmem:[%s838_s1 + $0x50] sm:$0xff] (!%p193_p3)   ;;  %v719_v18 = vmov (!%p193_p3), 0.0   ;;  %v485_v54 = vlaneseq (!%p193_p3) }
   0x7   : > { %196 = sbr.rel (%p193_p3) target bundleno = 310 (0x136), region = 36  ;;  %v675_v1 = vld [vmem:[%s838_s1] sm:$0xff] (!%p193_p3)   ;;  %627 = vmatprep.subr.bf16.mxu0 (!%p193_p3), %v674_v0  ;;  %v677_v3 = vld [vmem:[%s838_s1 + $0x8] sm:$0xff] (!%p193_p3)   ;;  %v679_v5 = vld [vmem:[%s838_s1 + $0x10] sm:$0xff] (!%p193_p3)   ;;  %254 = vst [vmem:[#allocation2] sm:$0x1] (!%p193_p3), %v719_v18 }
   0x8   : > { %628 = vmatpush3.bf16.msra.mxu0 (!%p193_p3), %v675_v1  ;;  %v680_v6 = vld [vmem:[%s838_s1 + $0x58] sm:$0xff] (!%p193_p3)   ;;  %v682_v8 = vld [vmem:[%s838_s1 + $0x60] sm:$0xff] (!%p193_p3)   ;;  %v684_v10 = vld [vmem:[%s838_s1 + $0x68] sm:$0xff] (!%p193_p3)   ;;  %255 = vst [vmem:[#allocation3] sm:$0x1] (!%p193_p3), %v719_v18  ;;  %v486_v57 = vshrl.u32 (!%p193_p3), %v485_v54, 7 }
   0x9   : > { %629 = vmatprep.subr.bf16.mxu0 (!%p193_p3), %v676_v2  ;;  %v681_v7 = vld [vmem:[%s838_s1 + $0x18] sm:$0xff] (!%p193_p3)   ;;  %v683_v9 = vld [vmem:[%s838_s1 + $0x20] sm:$0xff] (!%p193_p3)   ;;  %v685_v12 = vld [vmem:[%s838_s1 + $0x28] sm:$0xff] (!%p193_p3)  }
   0xa   : > { %v686_v13 = vld [vmem:[%s838_s1 + $0x70] sm:$0xff] (!%p193_p3)   ;;  %v688_v15 = vld [vmem:[%s838_s1 + $0x78] sm:$0xff] (!%p193_p3)   ;;  %v603_v20 = vld [vmem:[%s839_s2] ss:$0 sm:$0xff] (!%p193_p3)  ;;  %v487_v58 = vsub.s32 (!%p193_p3), 0, %v486_v57 }
   0xb   : > { %v687_v14 = vld [vmem:[%s838_s1 + $0x30] sm:$0xff] (!%p193_p3)   ;;  %v689_v16 = vld [vmem:[%s838_s1 + $0x38] sm:$0xff] (!%p193_p3)  }
   0xc   : > { %630 = vmatpush3.bf16.msra.mxu0 (!%p193_p3), %v677_v3 }
   0xd   : > { %631 = vmatprep.subr.bf16.mxu0 (!%p193_p3), %v678_v4 }
   0xe   : > { %s847_s15 = smov (!%p229_p4, %s709_s15), 1  ;;  %v448_v41 = vld [vmem:[#allocation2] sm:$0x1] }
   0xf   : > { %s787_s9 = sshll.u32 %s847_s15, 4  ;;  %v458_v44 = vld [vmem:[#allocation3] sm:$0x1] }
  0x10   : > { %632 = vmatpush3.bf16.msra.mxu0 %v679_v5  ;;  %s237_s14 = scalar_lea.vmem %s837_s0, %s787_s9  ;;  %s243_s11 = scalar_lea.vmem %s840_s3, %s787_s9 }
  0x11   : > { %633 = vmatprep.subr.bf16.mxu0 %v680_v6  ;;  %v692_v11 = vld [vmem:[%s237_s14 + $0x4] ss:$8 sps:$4 sm:$0xff]   ;;  %v690_v17 = vld [vmem:[%s237_s14] ss:$8 sps:$4 sm:$0xff]   ;;  %s248_s14 = scalar_lea.vmem %s841_s4, %s787_s9 }
  0x12   : > { %436 = vmatprep.mubr.bf16.mxu0 %v692_v11  ;;  %v500_v0 = vld [vmem:[%s243_s11] sm:$0xff]  ;;  %v501_v1 = vld [vmem:[%s243_s11 + $0x8] sm:$0xff] }
  0x14   : > { %634 = vmatpush3.bf16.msra.mxu0 %v681_v7 }
  0x15   : > { %635 = vmatprep.subr.bf16.mxu0 %v682_v8 }
  0x18   : > { %636 = vmatpush3.bf16.msra.mxu0 %v683_v9 }
  0x19   : > { %637 = vmatprep.subr.bf16.mxu0 %v684_v10 }
  0x1c   : > { %638 = vmatpush3.bf16.msra.mxu0 %v685_v12 }
  0x1d   : > { %639 = vmatprep.subr.bf16.mxu0 %v686_v13 }
  0x20   : > { %640 = vmatpush3.bf16.msra.mxu0 %v687_v14 }
  0x21   : > { %641 = vmatprep.subr.bf16.mxu0 %v688_v15 }
  0x24   : > { %642 = vmatpush3.bf16.msra.mxu0 %v689_v16 }
  0x27   : > { %437 = vmatmul.mubr.bf16.vlgmr.msra.gmra.mrb[0].mxu0 %v690_v17 }
  0xfa   : > { %v643_v19 = vpop.f32.mrb[0].mxu0 }
  0xfb   : > { %v644_v21 = vpop.f32.mrb[1].mxu0 }
  0xfc   : > { %v645_v22 = vadd.f32 %v644_v21, %v643_v19  ;;  %v646_v23 = vpop.f32.mrb[2].mxu0 }
  0xfd   : > { %v647_v24 = vpop.f32.mrb[3].mxu0 }
  0xfe   : > { %v439_v25 = vadd.f32 %v645_v22, %v603_v20  ;;  %v648_v26 = vadd.f32 %v647_v24, %v646_v23 }
 0x100   : > { %v442_v27 = vadd.f32 %v648_v26, %v603_v20  ;;  %v459_v28 = vmul.f32 %v439_v25, %v439_v25 }
 0x102   : > { %v449_v29 = vadd.f32 %v442_v27, %v439_v25  ;;  %v460_v30 = vmul.f32 %v442_v27, %v442_v27 }
 0x104   : > { %v450_v31 = vrot.slane %v449_v29, 4  ;;  %v461_v32 = vadd.f32 %v460_v30, %v459_v28 }
 0x106   : > { %v451_v33 = vadd.f32 %v450_v31, %v449_v29  ;;  %v462_v34 = vrot.slane %v461_v32, 4 }
 0x108   : > { %v452_v35 = vrot.slane %v451_v33, 2  ;;  %v463_v36 = vadd.f32 %v462_v34, %v461_v32 }
 0x10a   : > { %v453_v37 = vadd.f32 %v452_v35, %v451_v33  ;;  %v464_v38 = vrot.slane %v463_v36, 2 }
 0x10c   : > { %v454_v39 = vrot.slane %v453_v37, 1  ;;  %v465_v40 = vadd.f32 %v464_v38, %v463_v36 }
 0x10e   : > { %v455_v42 = vadd.f32 %v454_v39, %v453_v37  ;;  %v466_v43 = vrot.slane %v465_v40, 1 }
 0x110   : > { %v456_v45 = vadd.f32 %v455_v42, %v448_v41  ;;  %v467_v46 = vadd.f32 %v466_v43, %v465_v40 }
 0x112   : > { %457 = vst [vmem:[#allocation2] sm:$0x1] %v456_v45  ;;  %v468_v47 = vadd.f32 %v467_v46, %v458_v44 }
 0x114   : > { %469 = vst [vmem:[#allocation3] sm:$0x1] %v468_v47 }
 0x119   : > { %v473_v48 = vld [vmem:[#allocation2] sm:$0x1] }
 0x11a   : > { %v474_v49 = vmul.f32 0.0625, %v473_v48 }
 0x11b   : > { %v475_v50 = vld [vmem:[#allocation3] sm:$0x1] }
 0x11c   : > { %v476_v51 = vmul.f32 0.0625, %v475_v50  ;;  %v477_v52 = vmul.f32 %v474_v49, %v474_v49  ;;  %v488_v59 = vrot.slane %v474_v49, %v487_v58 }
 0x11e   : > { %v478_v53 = vsub.f32 %v476_v51, %v477_v52  ;;  %v490_v61 = vsub.f32 %v439_v25, %v488_v59  ;;  %v491_v62 = vsub.f32 %v442_v27, %v488_v59 }
 0x120   : > { %v479_v55 = vmax.f32 %v478_v53, 0.0 }
 0x122   : > { %v480_v56 = vadd.f32 1e-05, %v479_v55 }
 0x124   : > { %693 = vrsqrt.f32 %v480_v56 }
 0x12e   : > { %v694_v60 = vpop.eup %693 }
 0x12f   : > { %v496_v63 = vrot.slane %v694_v60, %v487_v58 }
 0x131   : > { %v498_v2 = vmul.f32 %v496_v63, %v490_v61  ;;  %v499_v3 = vmul.f32 %v496_v63, %v491_v62 }
 0x133   : > { %v502_v4 = vadd.f32 %v500_v0, %v498_v2  ;;  %v503_v5 = vadd.f32 %v501_v1, %v499_v3 }
 0x135   : > { %504 = vst [vmem:[%s248_s14] sm:$0xff] %v502_v4  ;;  %505 = vst [vmem:[%s248_s14 + $0x8] sm:$0xff] %v503_v5 }
 0x136 PF: > { %s14_s17 = sadd.s32 1, %s717_s17   ;;  %s842_s15 = smov %s713_s16 }
 0x137   : > { %p11_p5 = scmp.ge.s32.totalorder %s14_s17, 4   ;;  %s843_s16 = smov %s845_s18 }
 0x139   :  { %13 = sbr.rel (!%p11_p5) target bundleno = 2 (0x2), region = 78 }

// kernel: generator_forward.45
= control target key start
LH: loop header
LB: loop body
LE: loop exit
PB: predicated region body
PF: predicated region fallthrough
CT: control target
= control target key end

     0   :  { %s839_s12 = smov 0   ;;  %s841_s13 = smov 0   ;;  %s982_s0 = inlined_call_operand.vmem [shape: bf16[2,64,256], index: 0, kind: input, shape index: {}]   ;;  %s983_s1 = inlined_call_operand.vmem [shape: bf16[256,128], index: 1, kind: input, shape index: {}]   ;;  %s984_s2 = inlined_call_operand.vmem [shape: f32[1,128], index: 2, kind: input, shape index: {}]   ;;  %s985_s3 = inlined_call_operand.vmem [shape: f32[2,64,128], index: 3, kind: output, shape index: {}]  }
   0x1   :  { %s843_s14 = smov 0  }
   0x2 LB: > { %s25_s15 = sadd.s32 1, %s812_s13  ;;  %p649_p0 = scmp.ge.s32.totalorder %s816_s14, 1  ;;  %s816_s14 = sphi %s843_s14, %s13_s14   ;;  %s812_s13 = sphi %s841_s13, %s987_s13   ;;  %s808_s12 = sphi %s839_s12, %s986_s12  }
   0x3   : > { %p27_p1 = scmp.ge.s32.totalorder %s25_s15, 2  ;;  %p157_p2 = scmp.lt.s32.totalorder %s816_s14, 3 }
   0x5   : > { %s989_s15 = smov (%p27_p1, %s25_s15), 0  ;;  %p158_p3 = pnand %p649_p0, %p157_p2 }
   0x6   : > { %v764_v0 = vld [vmem:[%s983_s1 + $0x40] sm:$0xff] (!%p158_p3)   ;;  %v766_v2 = vld [vmem:[%s983_s1 + $0x48] sm:$0xff] (!%p158_p3)   ;;  %p187_p4 = scmp.lt.s32.totalorder (!%p158_p3), %s808_s12, 1  ;;  %v768_v4 = vld [vmem:[%s983_s1 + $0x50] sm:$0xff] (!%p158_p3)   ;;  %v818_v24 = vmov (!%p158_p3), 0.0  }
   0x7   : > { %161 = sbr.rel (%p158_p3) target bundleno = 329 (0x149), region = 32  ;;  %v765_v1 = vld [vmem:[%s983_s1] sm:$0xff] (!%p158_p3)   ;;  %683 = vmatprep.subr.bf16.mxu0 (!%p158_p3), %v764_v0  ;;  %723 = vmatprep.subr.bf16.mxu1 (!%p158_p3), %v764_v0  ;;  %v767_v3 = vld [vmem:[%s983_s1 + $0x8] sm:$0xff] (!%p158_p3)   ;;  %v769_v5 = vld [vmem:[%s983_s1 + $0x10] sm:$0xff] (!%p158_p3)   ;;  %207 = vst [vmem:[#allocation2] sm:$0x1] (!%p158_p3), %v818_v24 }
   0x8   : > { %684 = vmatpush3.bf16.msra.mxu0 (!%p158_p3), %v765_v1  ;;  %731 = vmatpush3.bf16.msra.mxu1 (!%p158_p3), %v765_v1  ;;  %v770_v6 = vld [vmem:[%s983_s1 + $0x58] sm:$0xff] (!%p158_p3)   ;;  %v772_v8 = vld [vmem:[%s983_s1 + $0x60] sm:$0xff] (!%p158_p3)   ;;  %v774_v10 = vld [vmem:[%s983_s1 + $0x68] sm:$0xff] (!%p158_p3)   ;;  %208 = vst [vmem:[#allocation3] sm:$0x1] (!%p158_p3), %v818_v24 }
   0x9   : > { %685 = vmatprep.subr.bf16.mxu0 (!%p158_p3), %v766_v2  ;;  %724 = vmatprep.subr.bf16.mxu1 (!%p158_p3), %v766_v2  ;;  %v771_v7 = vld [vmem:[%s983_s1 + $0x18] sm:$0xff] (!%p158_p3)   ;;  %v773_v9 = vld [vmem:[%s983_s1 + $0x20] sm:$0xff] (!%p158_p3)   ;;  %v775_v13 = vld [vmem:[%s983_s1 + $0x28] sm:$0xff] (!%p158_p3)  }
   0xa   : > { %v776_v14 = vld [vmem:[%s983_s1 + $0x70] sm:$0xff] (!%p158_p3)   ;;  %v778_v16 = vld [vmem:[%s983_s1 + $0x78] sm:$0xff] (!%p158_p3)   ;;  %v654_v27 = vld [vmem:[%s984_s2] ss:$0 sm:$0xff] (!%p158_p3) }
   0xb   : > { %v777_v15 = vld [vmem:[%s983_s1 + $0x30] sm:$0xff] (!%p158_p3)   ;;  %v779_v17 = vld [vmem:[%s983_s1 + $0x38] sm:$0xff] (!%p158_p3)  }
   0xc   : > { %686 = vmatpush3.bf16.msra.mxu0 (!%p158_p3), %v767_v3  ;;  %732 = vmatpush3.bf16.msra.mxu1 (!%p158_p3), %v767_v3 }
   0xd   : > { %687 = vmatprep.subr.bf16.mxu0 (!%p158_p3), %v768_v4  ;;  %725 = vmatprep.subr.bf16.mxu1 (!%p158_p3), %v768_v4 }
   0xe   : > { %s991_s12 = smov (!%p187_p4, %s808_s12), 1 }
   0xf   : > { %s681_s5 = sshll.u32 %s991_s12, 6 }
  0x10   : > { %688 = vmatpush3.bf16.msra.mxu0 %v769_v5  ;;  %733 = vmatpush3.bf16.msra.mxu1 %v769_v5  ;;  %s892_s10 = scalar_lea.vmem %s982_s0, %s681_s5  ;;  %s201_s7 = scalar_lea.vmem %s985_s3, %s681_s5 }
  0x11   : > { %689 = vmatprep.subr.bf16.mxu0 %v770_v6  ;;  %726 = vmatprep.subr.bf16.mxu1 %v770_v6  ;;  %v782_v11 = vld [vmem:[%s892_s10 + $0x4] ss:$8 sps:$4 sm:$0xff]   ;;  %v780_v18 = vld [vmem:[%s892_s10] ss:$8 sps:$4 sm:$0xff]   ;;  %v786_v20 = vld [vmem:[%s892_s10 + $0x14] ss:$8 sps:$4 sm:$0xff]  }
  0x12   : > { %v785_v12 = vld [vmem:[%s892_s10 + $0x24] ss:$8 sps:$4 sm:$0xff]   ;;  %425 = vmatprep.mubr.bf16.mxu0 %v782_v11  ;;  %v783_v19 = vld [vmem:[%s892_s10 + $0x20] ss:$8 sps:$4 sm:$0xff]   ;;  %v789_v21 = vld [vmem:[%s892_s10 + $0x34] ss:$8 sps:$4 sm:$0xff]  }
  0x13   : > { %441 = vmatprep.mubr.bf16.mxu1 %v785_v12  ;;  %v788_v22 = vld [vmem:[%s892_s10 + $0x10] ss:$8 sps:$4 sm:$0xff]  }
  0x14   : > { %690 = vmatpush3.bf16.msra.mxu0 %v771_v7  ;;  %734 = vmatpush3.bf16.msra.mxu1 %v771_v7  ;;  %v791_v23 = vld [vmem:[%s892_s10 + $0x30] ss:$8 sps:$4 sm:$0xff]  }
  0x15   : > { %691 = vmatprep.subr.bf16.mxu0 %v772_v8  ;;  %727 = vmatprep.subr.bf16.mxu1 %v772_v8 }
  0x18   : > { %692 = vmatpush3.bf16.msra.mxu0 %v773_v9  ;;  %735 = vmatpush3.bf16.msra.mxu1 %v773_v9 }
  0x19   : > { %693 = vmatprep.subr.bf16.mxu0 %v774_v10  ;;  %728 = vmatprep.subr.bf16.mxu1 %v774_v10 }
  0x1c   : > { %694 = vmatpush3.bf16.msra.mxu0 %v775_v13  ;;  %736 = vmatpush3.bf16.msra.mxu1 %v775_v13 }
  0x1d   : > { %695 = vmatprep.subr.bf16.mxu0 %v776_v14  ;;  %729 = vmatprep.subr.bf16.mxu1 %v776_v14 }
  0x20   : > { %696 = vmatpush3.bf16.msra.mxu0 %v777_v15  ;;  %737 = vmatpush3.bf16.msra.mxu1 %v777_v15 }
  0x21   : > { %697 = vmatprep.subr.bf16.mxu0 %v778_v16  ;;  %730 = vmatprep.subr.bf16.mxu1 %v778_v16 }
  0x24   : > { %698 = vmatpush3.bf16.msra.mxu0 %v779_v17  ;;  %738 = vmatpush3.bf16.msra.mxu1 %v779_v17 }
  0x27   : > { %426 = vmatmul.mubr.bf16.vlgmr.msra.gmra.mrb[0].mxu0 %v780_v18  ;;  %442 = vmatmul.mubr.bf16.vlgmr.msra.gmra.mrb[0].mxu1 %v783_v19 }
  0x28   : > { %433 = vmatprep.mubr.bf16.mxu0 %v786_v20  ;;  %449 = vmatprep.mubr.bf16.mxu1 %v789_v21 }
  0x2f   : > { %434 = vmatmul.mubr.bf16.gmra.mrb[4].mxu0 %v788_v22  ;;  %450 = vmatmul.mubr.bf16.gmra.mrb[4].mxu1 %v791_v23 }
  0xfa   : > { %v699_v25 = vpop.f32.mrb[0].mxu0  ;;  %v711_v26 = vpop.f32.mrb[0].mxu1 }
  0xfb   : > { %v700_v28 = vpop.f32.mrb[1].mxu0  ;;  %v712_v29 = vpop.f32.mrb[1].mxu1 }
  0xfc   : > { %v701_v30 = vadd.f32 %v700_v28, %v699_v25  ;;  %v702_v31 = vpop.f32.mrb[2].mxu0  ;;  %v713_v32 = vadd.f32 %v712_v29, %v711_v26  ;;  %v714_v33 = vpop.f32.mrb[2].mxu1  ;;  %v467_v25 = vld [vmem:[#allocation2] sm:$0x1] }
  0xfd   : > { %v703_v34 = vpop.f32.mrb[3].mxu0  ;;  %v715_v35 = vpop.f32.mrb[3].mxu1 }
  0xfe   : > { %v926_v36 = vadd.f32 %v701_v30, %v654_v27  ;;  %v704_v37 = vadd.f32 %v703_v34, %v702_v31  ;;  %v716_v38 = vadd.f32 %v715_v35, %v714_v33  ;;  %v938_v57 = vadd.f32 %v713_v32, %v654_v27 }
 0x100   : > { %v928_v39 = vadd.f32 %v704_v37, %v654_v27  ;;  %v484_v40 = vmul.f32 %v926_v36, %v926_v36  ;;  %v945_v61 = vadd.f32 %v716_v38, %v654_v27  ;;  %v488_v2 = vmul.f32 %v938_v57, %v938_v57 }
 0x102   : > { %v468_v41 = vadd.f32 %v928_v39, %v926_v36  ;;  %v485_v42 = vmul.f32 %v928_v39, %v928_v39  ;;  %v705_v43 = vpop.f32.mrb[4].mxu0  ;;  %v717_v44 = vpop.f32.mrb[4].mxu1  ;;  %v489_v5 = vmul.f32 %v945_v61, %v945_v61 }
 0x103   : > { %v706_v45 = vpop.f32.mrb[5].mxu0  ;;  %v718_v46 = vpop.f32.mrb[5].mxu1 }
 0x104   : > { %v492_v47 = vadd.f32 %v485_v42, %v484_v40  ;;  %v707_v48 = vadd.f32 %v706_v45, %v705_v43  ;;  %v708_v49 = vpop.f32.mrb[6].mxu0  ;;  %v719_v50 = vadd.f32 %v718_v46, %v717_v44  ;;  %v720_v51 = vpop.f32.mrb[6].mxu1  ;;  %v528_v40 = vlaneseq }
 0x105   : > { %v709_v52 = vpop.f32.mrb[7].mxu0  ;;  %v721_v53 = vpop.f32.mrb[7].mxu1 }
 0x106   : > { %v936_v54 = vadd.f32 %v707_v48, %v654_v27  ;;  %v710_v55 = vadd.f32 %v709_v52, %v708_v49  ;;  %v722_v56 = vadd.f32 %v721_v53, %v720_v51  ;;  %v950_v1 = vadd.f32 %v719_v50, %v654_v27 }
 0x107   : > { %v529_v43 = vshrl.u32 %v528_v40, 7 }
 0x108   : > { %v469_v58 = vadd.f32 %v468_v41, %v936_v54  ;;  %v486_v59 = vmul.f32 %v936_v54, %v936_v54  ;;  %v943_v60 = vadd.f32 %v710_v55, %v654_v27  ;;  %v490_v8 = vmul.f32 %v950_v1, %v950_v1 }
 0x109   : > { %v455_v9 = vadd.f32 %v722_v56, %v654_v27  ;;  %v483_v27 = vld [vmem:[#allocation3] sm:$0x1]  ;;  %v530_v44 = vsub.s32 0, %v529_v43 }
 0x10a   : > { %v493_v62 = vadd.f32 %v492_v47, %v486_v59  ;;  %v470_v63 = vadd.f32 %v469_v58, %v943_v60  ;;  %v487_v0 = vmul.f32 %v943_v60, %v943_v60 }
 0x10b   : > { %v491_v14 = vmul.f32 %v455_v9, %v455_v9 }
 0x10c   : > { %v471_v3 = vadd.f32 %v470_v63, %v938_v57  ;;  %v494_v4 = vadd.f32 %v493_v62, %v487_v0 }
 0x10e   : > { %v495_v6 = vadd.f32 %v494_v4, %v488_v2  ;;  %v472_v7 = vadd.f32 %v471_v3, %v945_v61 }
 0x110   : > { %v473_v10 = vadd.f32 %v472_v7, %v950_v1  ;;  %v496_v11 = vadd.f32 %v495_v6, %v489_v5 }
 0x112   : > { %v497_v12 = vadd.f32 %v496_v11, %v490_v8  ;;  %v474_v13 = vadd.f32 %v473_v10, %v455_v9 }
 0x114   : > { %v475_v15 = vrot.slane %v474_v13, 4  ;;  %v498_v16 = vadd.f32 %v497_v12, %v491_v14 }
 0x116   : > { %v476_v17 = vadd.f32 %v475_v15, %v474_v13  ;;  %v499_v18 = vrot.slane %v498_v16, 4 }
 0x118   : > { %v477_v19 = vrot.slane %v476_v17, 2  ;;  %v500_v20 = vadd.f32 %v499_v18, %v498_v16 }
 0x11a   : > { %v478_v21 = vadd.f32 %v477_v19, %v476_v17  ;;  %v501_v22 = vrot.slane %v500_v20, 2 }
 0x11c   : > { %v479_v23 = vrot.slane %v478_v21, 1  ;;  %v502_v24 = vadd.f32 %v501_v22, %v500_v20 }
 0x11e   : > { %v480_v26 = vadd.f32 %v479_v23, %v478_v21  ;;  %v503_v28 = vrot.slane %v502_v24, 1 }
 0x120   : > { %v481_v29 = vadd.f32 %v480_v26, %v467_v25  ;;  %v504_v30 = vadd.f32 %v503_v28, %v502_v24 }
 0x122   : > { %482 = vst [vmem:[#allocation2] sm:$0x1] %v481_v29  ;;  %v505_v31 = vadd.f32 %v504_v30, %v483_v27 }
 0x124   : > { %506 = vst [vmem:[#allocation3] sm:$0x1] %v505_v31 }
 0x129   : > { %v510_v32 = vld [vmem:[#allocation2] sm:$0x1] }
 0x12a   : > { %v511_v33 = vmul.f32 0.015625, %v510_v32 }
 0x12b   : > { %v512_v34 = vld [vmem:[#allocation3] sm:$0x1] }
 0x12c   : > { %v513_v35 = vmul.f32 0.015625, %v512_v34  ;;  %v514_v37 = vmul.f32 %v511_v33, %v511_v33  ;;  %v531_v45 = vrot.slane %v511_v33, %v530_v44 }
 0x12e   : > { %v515_v38 = vsub.f32 %v513_v35, %v514_v37  ;;  %v533_v47 = vsub.f32 %v926_v36, %v531_v45  ;;  %v534_v48 = vsub.f32 %v928_v39, %v531_v45  ;;  %v535_v49 = vsub.f32 %v936_v54, %v531_v45 }
 0x12f   : > { %v536_v50 = vsub.f32 %v943_v60, %v531_v45  ;;  %v537_v52 = vsub.f32 %v938_v57, %v531_v45  ;;  %v538_v53 = vsub.f32 %v945_v61, %v531_v45  ;;  %v539_v55 = vsub.f32 %v950_v1, %v531_v45 }
 0x130   : > { %v516_v41 = vmax.f32 %v515_v38, 0.0  ;;  %v540_v56 = vsub.f32 %v455_v9, %v531_v45 }
 0x132   : > { %v517_v42 = vadd.f32 1e-05, %v516_v41 }
 0x134   : > { %792 = vrsqrt.f32 %v517_v42 }
 0x13e   : > { %v793_v46 = vpop.eup %792 }
 0x13f   : > { %v545_v51 = vrot.slane %v793_v46, %v530_v44 }
 0x141   : > { %v547_v58 = vmul.f32 %v545_v51, %v533_v47  ;;  %v548_v59 = vmul.f32 %v545_v51, %v534_v48  ;;  %v549_v62 = vmul.f32 %v545_v51, %v535_v49  ;;  %v550_v63 = vmul.f32 %v545_v51, %v536_v50 }
 0x142   : > { %v551_v36 = vmul.f32 %v545_v51, %v537_v52  ;;  %v552_v39 = vmul.f32 %v545_v51, %v538_v53  ;;  %v553_v54 = vmul.f32 %v545_v51, %v539_v55  ;;  %v554_v60 = vmul.f32 %v545_v51, %v540_v56 }
 0x143   : > { %v555_v0 = vmax.f32 %v547_v58, 0.0  ;;  %v556_v57 = vmax.f32 %v548_v59, 0.0  ;;  %v557_v2 = vmax.f32 %v549_v62, 0.0  ;;  %v558_v61 = vmax.f32 %v550_v63, 0.0 }
 0x144   : > { %v559_v3 = vmax.f32 %v551_v36, 0.0  ;;  %v560_v1 = vmax.f32 %v552_v39, 0.0  ;;  %v561_v4 = vmax.f32 %v553_v54, 0.0  ;;  %v562_v5 = vmax.f32 %v554_v60, 0.0 }
 0x145   : > { %563 = vst [vmem:[%s201_s7] sm:$0xff] %v555_v0  ;;  %564 = vst [vmem:[%s201_s7 + $0x8] sm:$0xff] %v556_v57 }
 0x146   : > { %565 = vst [vmem:[%s201_s7 + $0x10] sm:$0xff] %v557_v2  ;;  %566 = vst [vmem:[%s201_s7 + $0x18] sm:$0xff] %v558_v61 }
 0x147   : > { %567 = vst [vmem:[%s201_s7 + $0x20] sm:$0xff] %v559_v3  ;;  %568 = vst [vmem:[%s201_s7 + $0x28] sm:$0xff] %v560_v1 }
 0x148   : > { %569 = vst [vmem:[%s201_s7 + $0x30] sm:$0xff] %v561_v4  ;;  %570 = vst [vmem:[%s201_s7 + $0x38] sm:$0xff] %v562_v5 }
 0x149 PF: > { %s13_s14 = sadd.s32 1, %s816_s14   ;;  %s986_s12 = smov %s812_s13 }
 0x14a   : > { %p10_p5 = scmp.ge.s32.totalorder %s13_s14, 4   ;;  %s987_s13 = smov %s989_s15 }
 0x14c   :  { %12 = sbr.rel (!%p10_p5) target bundleno = 2 (0x2), region = 71 }

// kernel: generator_forward.46
= control target key start
LH: loop header
LB: loop body
LE: loop exit
PB: predicated region body
PF: predicated region fallthrough
CT: control target
= control target key end

     0   :  { %s1189_s12 = smov 0   ;;  %s1191_s13 = smov 0   ;;  %s1649_s0 = inlined_call_operand.vmem [shape: bf16[2,256,128], index: 0, kind: input, shape index: {}]   ;;  %s1650_s1 = inlined_call_operand.vmem [shape: bf16[128,128], index: 1, kind: input, shape index: {}]   ;;  %s1651_s2 = inlined_call_operand.vmem [shape: f32[1,128], index: 2, kind: input, shape index: {}]   ;;  %s1652_s3 = inlined_call_operand.vmem [shape: f32[2,256,128], index: 3, kind: output, shape index: {}]  }
   0x1   :  { %s1193_s14 = smov 0  }
   0x2 LB: > { %s25_s15 = sadd.s32 1, %s1162_s13  ;;  %p971_p0 = scmp.ge.s32.totalorder %s1166_s14, 1  ;;  %s1166_s14 = sphi %s1193_s14, %s13_s14   ;;  %s1162_s13 = sphi %s1191_s13, %s1654_s13   ;;  %s1158_s12 = sphi %s1189_s12, %s1653_s12  }
   0x3   : > { %p27_p1 = scmp.ge.s32.totalorder %s25_s15, 2  ;;  %p156_p2 = scmp.lt.s32.totalorder %s1166_s14, 3 }
   0x5   : > { %s1656_s15 = smov (%p27_p1, %s25_s15), 0  ;;  %p157_p3 = pnand %p971_p0, %p156_p2 }
   0x6   : > { %v1118_v0 = vld [vmem:[%s1650_s1] sm:$0xff] (!%p157_p3)   ;;  %p185_p4 = scmp.lt.s32.totalorder (!%p157_p3), %s1158_s12, 1  ;;  %v1119_v1 = vld [vmem:[%s1650_s1 + $0x8] sm:$0xff] (!%p157_p3)   ;;  %v1120_v2 = vld [vmem:[%s1650_s1 + $0x10] sm:$0xff] (!%p157_p3)   ;;  %v1168_v24 = vmov (!%p157_p3), 0.0  }
   0x7   : > { %160 = sbr.rel (%p157_p3) target bundleno = 389 (0x185), region = 32  ;;  %1029 = vmatprep.subr.bf16.mxu0 (!%p157_p3), %v1118_v0  ;;  %1077 = vmatprep.subr.bf16.mxu1 (!%p157_p3), %v1118_v0  ;;  %v1121_v3 = vld [vmem:[%s1650_s1 + $0x18] sm:$0xff] (!%p157_p3)   ;;  %v1122_v5 = vld [vmem:[%s1650_s1 + $0x20] sm:$0xff] (!%p157_p3)   ;;  %v1123_v6 = vld [vmem:[%s1650_s1 + $0x28] sm:$0xff] (!%p157_p3)   ;;  %204 = vst [vmem:[#allocation2] sm:$0x1] (!%p157_p3), %v1168_v24 }
   0x8   : > { %1030 = vmatpush3.bf16.msra.mxu0 (!%p157_p3), %v1118_v0  ;;  %1085 = vmatpush3.bf16.msra.mxu1 (!%p157_p3), %v1118_v0  ;;  %v1124_v8 = vld [vmem:[%s1650_s1 + $0x30] sm:$0xff] (!%p157_p3)   ;;  %v1125_v9 = vld [vmem:[%s1650_s1 + $0x38] sm:$0xff] (!%p157_p3)   ;;  %205 = vst [vmem:[#allocation3] sm:$0x1] (!%p157_p3), %v1168_v24  ;;  %v1258_v25 = vld [vmem:[%s1651_s2] ss:$0 sm:$0xff] (!%p157_p3) }
   0x9   : > { %1031 = vmatprep.subr.bf16.mxu0 (!%p157_p3), %v1119_v1  ;;  %1078 = vmatprep.subr.bf16.mxu1 (!%p157_p3), %v1119_v1 }
   0xc   : > { %1032 = vmatpush3.bf16.msra.mxu0 (!%p157_p3), %v1119_v1  ;;  %1086 = vmatpush3.bf16.msra.mxu1 (!%p157_p3), %v1119_v1 }
   0xd   : > { %1033 = vmatprep.subr.bf16.mxu0 (!%p157_p3), %v1120_v2  ;;  %1079 = vmatprep.subr.bf16.mxu1 (!%p157_p3), %v1120_v2 }
   0xe   : > { %s1658_s12 = smov (!%p185_p4, %s1158_s12), 1 }
   0xf   : > { %s1003_s22 = sshll.u32 %s1658_s12, 7  ;;  %s1004_s11 = sshll.u32 %s1658_s12, 8 }
  0x10   : > { %s1222_s25 = scalar_lea.vmem %s1649_s0, %s1003_s22  ;;  %1034 = vmatpush3.bf16.msra.mxu0 %v1120_v2  ;;  %1087 = vmatpush3.bf16.msra.mxu1 %v1120_v2  ;;  %s1586_s17 = scalar_lea.vmem %s1652_s3, %s1004_s11 }
  0x11   : > { %v1126_v4 = vld [vmem:[%s1222_s25] sm:$0xff]   ;;  %1035 = vmatprep.subr.bf16.mxu0 %v1121_v3  ;;  %1080 = vmatprep.subr.bf16.mxu1 %v1121_v3  ;;  %v1127_v10 = vld [vmem:[%s1222_s25 + $0x8] sm:$0xff]   ;;  %v1128_v12 = vld [vmem:[%s1222_s25 + $0x10] sm:$0xff]  }
  0x12   : > { %1045 = vmatprep.mubr.bf16.mxu0 %v1126_v4  ;;  %v1134_v7 = vld [vmem:[%s1222_s25 + $0x40] sm:$0xff]   ;;  %v1135_v11 = vld [vmem:[%s1222_s25 + $0x48] sm:$0xff]   ;;  %v1136_v13 = vld [vmem:[%s1222_s25 + $0x50] sm:$0xff]  }
  0x13   : > { %1061 = vmatprep.mubr.bf16.mxu1 %v1134_v7  ;;  %v1129_v14 = vld [vmem:[%s1222_s25 + $0x18] sm:$0xff]   ;;  %v1130_v16 = vld [vmem:[%s1222_s25 + $0x20] sm:$0xff]   ;;  %v1131_v18 = vld [vmem:[%s1222_s25 + $0x28] sm:$0xff]  }
  0x14   : > { %1036 = vmatpush3.bf16.msra.mxu0 %v1121_v3  ;;  %1088 = vmatpush3.bf16.msra.mxu1 %v1121_v3  ;;  %v1137_v15 = vld [vmem:[%s1222_s25 + $0x58] sm:$0xff]   ;;  %v1138_v17 = vld [vmem:[%s1222_s25 + $0x60] sm:$0xff]   ;;  %v1139_v19 = vld [vmem:[%s1222_s25 + $0x68] sm:$0xff]  }
  0x15   : > { %1037 = vmatprep.subr.bf16.mxu0 %v1122_v5  ;;  %1081 = vmatprep.subr.bf16.mxu1 %v1122_v5  ;;  %v1132_v20 = vld [vmem:[%s1222_s25 + $0x30] sm:$0xff]   ;;  %v1133_v22 = vld [vmem:[%s1222_s25 + $0x38] sm:$0xff]  }
  0x16   : > { %v1140_v21 = vld [vmem:[%s1222_s25 + $0x70] sm:$0xff]   ;;  %v1141_v23 = vld [vmem:[%s1222_s25 + $0x78] sm:$0xff]  }
  0x18   : > { %1038 = vmatpush3.bf16.msra.mxu0 %v1122_v5  ;;  %1089 = vmatpush3.bf16.msra.mxu1 %v1122_v5 }
  0x19   : > { %1039 = vmatprep.subr.bf16.mxu0 %v1123_v6  ;;  %1082 = vmatprep.subr.bf16.mxu1 %v1123_v6 }
  0x1c   : > { %1040 = vmatpush3.bf16.msra.mxu0 %v1123_v6  ;;  %1090 = vmatpush3.bf16.msra.mxu1 %v1123_v6 }
  0x1d   : > { %1041 = vmatprep.subr.bf16.mxu0 %v1124_v8  ;;  %1083 = vmatprep.subr.bf16.mxu1 %v1124_v8 }
  0x20   : > { %1042 = vmatpush3.bf16.msra.mxu0 %v1124_v8  ;;  %1091 = vmatpush3.bf16.msra.mxu1 %v1124_v8 }
  0x21   : > { %1043 = vmatprep.subr.bf16.mxu0 %v1125_v9  ;;  %1084 = vmatprep.subr.bf16.mxu1 %v1125_v9 }
  0x24   : > { %1044 = vmatpush3.bf16.msra.mxu0 %v1125_v9  ;;  %1092 = vmatpush3.bf16.msra.mxu1 %v1125_v9 }
  0x27   : > { %1046 = vmatmul.mubr.bf16.vlgmr.msra.gmra.mrb[0].mxu0 %v1127_v10  ;;  %1062 = vmatmul.mubr.bf16.vlgmr.msra.gmra.mrb[0].mxu1 %v1135_v11 }
  0x28   : > { %1049 = vmatprep.mubr.bf16.mxu0 %v1128_v12  ;;  %1065 = vmatprep.mubr.bf16.mxu1 %v1136_v13 }
  0x2f   : > { %1050 = vmatmul.mubr.bf16.gmra.mrb[4].mxu0 %v1129_v14  ;;  %1066 = vmatmul.mubr.bf16.gmra.mrb[4].mxu1 %v1137_v15 }
  0x30   : > { %1053 = vmatprep.mubr.bf16.mxu0 %v1130_v16  ;;  %1069 = vmatprep.mubr.bf16.mxu1 %v1138_v17 }
  0x37   : > { %1054 = vmatmul.mubr.bf16.gmra.mrb[8].mxu0 %v1131_v18  ;;  %1070 = vmatmul.mubr.bf16.gmra.mrb[8].mxu1 %v1139_v19 }
  0x38   : > { %1057 = vmatprep.mubr.bf16.mxu0 %v1132_v20  ;;  %1073 = vmatprep.mubr.bf16.mxu1 %v1140_v21 }
  0x3f   : > { %1058 = vmatmul.mubr.bf16.gmra.mrb[12].mxu0 %v1133_v22  ;;  %1074 = vmatmul.mubr.bf16.gmra.mrb[12].mxu1 %v1141_v23 }
  0xfa   : > { %v1047_v26 = vpop.f32.mrb[0].mxu0  ;;  %v1260_v27 = vpop.f32.mrb[0].mxu1 }
  0xfb   : > { %v440_v28 = vpop.f32.mrb[1].mxu0  ;;  %v1262_v29 = vpop.f32.mrb[1].mxu1  ;;  %v1272_v35 = vadd.f32 %v1047_v26, %v1258_v25 }
  0xfc   : > { %v1265_v30 = vadd.f32 %v1258_v25, %v440_v28  ;;  %v1048_v31 = vpop.f32.mrb[2].mxu0  ;;  %v1267_v32 = vpop.f32.mrb[2].mxu1 }
  0xfd   : > { %v443_v33 = vpop.f32.mrb[3].mxu0  ;;  %v1269_v34 = vpop.f32.mrb[3].mxu1  ;;  %v1280_v38 = vadd.f32 %v1048_v31, %v1258_v25  ;;  %v643_v41 = vmul.f32 %v1272_v35, %v1272_v35 }
  0xfe   : > { %v1275_v36 = vadd.f32 %v1258_v25, %v443_v33  ;;  %v641_v37 = vmul.f32 %v1265_v30, %v1265_v30 }
  0xff   : > { %v644_v48 = vmul.f32 %v1280_v38, %v1280_v38 }
 0x100   : > { %v601_v39 = vadd.f32 %v1275_v36, %v1265_v30  ;;  %v642_v40 = vmul.f32 %v1275_v36, %v1275_v36 }
 0x102   : > { %v602_v42 = vadd.f32 %v601_v39, %v1272_v35  ;;  %v673_v43 = vadd.f32 %v642_v40, %v641_v37  ;;  %v1051_v44 = vpop.f32.mrb[4].mxu0  ;;  %v1289_v45 = vpop.f32.mrb[4].mxu1 }
 0x103   : > { %v456_v46 = vpop.f32.mrb[5].mxu0  ;;  %v1291_v47 = vpop.f32.mrb[5].mxu1  ;;  %v1302_v54 = vadd.f32 %v1051_v44, %v1258_v25 }
 0x104   : > { %v674_v49 = vadd.f32 %v673_v43, %v643_v41  ;;  %v1296_v50 = vadd.f32 %v1258_v25, %v456_v46  ;;  %v603_v51 = vadd.f32 %v602_v42, %v1280_v38  ;;  %v1052_v52 = vpop.f32.mrb[6].mxu0  ;;  %v1299_v53 = vpop.f32.mrb[6].mxu1 }
 0x105   : > { %v459_v55 = vpop.f32.mrb[7].mxu0  ;;  %v1304_v56 = vpop.f32.mrb[7].mxu1  ;;  %v1313_v62 = vadd.f32 %v1052_v52, %v1258_v25  ;;  %v647_v1 = vmul.f32 %v1302_v54, %v1302_v54 }
 0x106   : > { %v604_v57 = vadd.f32 %v603_v51, %v1296_v50  ;;  %v645_v58 = vmul.f32 %v1296_v50, %v1296_v50  ;;  %v675_v59 = vadd.f32 %v674_v49, %v644_v48  ;;  %v1310_v60 = vadd.f32 %v1258_v25, %v459_v55 }
 0x107   : > { %v648_v8 = vmul.f32 %v1313_v62, %v1313_v62 }
 0x108   : > { %v676_v61 = vadd.f32 %v675_v59, %v645_v58  ;;  %v605_v63 = vadd.f32 %v604_v57, %v1310_v60  ;;  %v646_v0 = vmul.f32 %v1310_v60, %v1310_v60 }
 0x10a   : > { %v606_v2 = vadd.f32 %v605_v63, %v1302_v54  ;;  %v677_v3 = vadd.f32 %v676_v61, %v646_v0  ;;  %v1055_v4 = vpop.f32.mrb[8].mxu0  ;;  %v1321_v5 = vpop.f32.mrb[8].mxu1  ;;  %v1378_v61 = vadd.f32 %v1258_v25, %v1262_v29 }
 0x10b   : > { %v472_v6 = vpop.f32.mrb[9].mxu0  ;;  %v1323_v7 = vpop.f32.mrb[9].mxu1  ;;  %v1334_v14 = vadd.f32 %v1055_v4, %v1258_v25 }
 0x10c   : > { %v678_v9 = vadd.f32 %v677_v3, %v647_v1  ;;  %v1328_v10 = vadd.f32 %v1258_v25, %v472_v6  ;;  %v607_v11 = vadd.f32 %v606_v2, %v1313_v62  ;;  %v1056_v12 = vpop.f32.mrb[10].mxu0  ;;  %v1331_v13 = vpop.f32.mrb[10].mxu1 }
 0x10d   : > { %v475_v15 = vpop.f32.mrb[11].mxu0  ;;  %v1336_v16 = vpop.f32.mrb[11].mxu1  ;;  %v1345_v22 = vadd.f32 %v1056_v12, %v1258_v25  ;;  %v651_v26 = vmul.f32 %v1334_v14, %v1334_v14  ;;  %v1396_v12 = vadd.f32 %v1258_v25, %v1269_v34  ;;  %v1412_v34 = vadd.f32 %v1258_v25, %v1291_v47 }
 0x10e   : > { %v608_v17 = vadd.f32 %v607_v11, %v1328_v10  ;;  %v649_v18 = vmul.f32 %v1328_v10, %v1328_v10  ;;  %v679_v19 = vadd.f32 %v678_v9, %v648_v8  ;;  %v1342_v20 = vadd.f32 %v1258_v25, %v475_v15 }
 0x10f   : > { %v652_v41 = vmul.f32 %v1345_v22, %v1345_v22  ;;  %v657_v8 = vmul.f32 %v1378_v61, %v1378_v61  ;;  %v1400_v15 = vadd.f32 %v1260_v27, %v1258_v25  ;;  %v1428_v47 = vadd.f32 %v1289_v45, %v1258_v25 }
 0x110   : > { %v680_v21 = vadd.f32 %v679_v19, %v649_v18  ;;  %v609_v23 = vadd.f32 %v608_v17, %v1342_v20  ;;  %v650_v24 = vmul.f32 %v1342_v20, %v1342_v20  ;;  %v1405_v19 = vadd.f32 %v1267_v32, %v1258_v25 }
 0x111   : > { %v659_v27 = vmul.f32 %v1400_v15, %v1400_v15  ;;  %v663_v45 = vmul.f32 %v1428_v47, %v1428_v47 }
 0x112   : > { %v610_v28 = vadd.f32 %v609_v23, %v1334_v14  ;;  %v681_v31 = vadd.f32 %v680_v21, %v650_v24  ;;  %v1059_v33 = vpop.f32.mrb[12].mxu0  ;;  %v1353_v37 = vpop.f32.mrb[12].mxu1  ;;  %v658_v24 = vmul.f32 %v1396_v12, %v1396_v12  ;;  %v660_v32 = vmul.f32 %v1405_v19, %v1405_v19 }
 0x113   : > { %v488_v39 = vpop.f32.mrb[13].mxu0  ;;  %v1355_v40 = vpop.f32.mrb[13].mxu1  ;;  %v1366_v49 = vadd.f32 %v1059_v33, %v1258_v25 }
 0x114   : > { %v682_v42 = vadd.f32 %v681_v31, %v651_v26  ;;  %v1360_v43 = vadd.f32 %v1258_v25, %v488_v39  ;;  %v611_v44 = vadd.f32 %v610_v28, %v1345_v22  ;;  %v1060_v46 = vpop.f32.mrb[14].mxu0  ;;  %v1363_v48 = vpop.f32.mrb[14].mxu1  ;;  %v661_v39 = vmul.f32 %v1412_v34, %v1412_v34 }
 0x115   : > { %v491_v51 = vpop.f32.mrb[15].mxu0  ;;  %v1368_v52 = vpop.f32.mrb[15].mxu1  ;;  %v1381_v0 = vadd.f32 %v1060_v46, %v1258_v25  ;;  %v655_v3 = vmul.f32 %v1366_v49, %v1366_v49  ;;  %v1433_v46 = vadd.f32 %v1299_v53, %v1258_v25 }
 0x116   : > { %v612_v55 = vadd.f32 %v611_v44, %v1360_v43  ;;  %v653_v57 = vmul.f32 %v1360_v43, %v1360_v43  ;;  %v683_v58 = vadd.f32 %v682_v42, %v652_v41  ;;  %v1374_v59 = vadd.f32 %v1258_v25, %v491_v51 }
 0x117   : > { %v656_v29 = vmul.f32 %v1381_v0, %v1381_v0  ;;  %v1424_v41 = vadd.f32 %v1258_v25, %v1304_v56  ;;  %v1440_v56 = vadd.f32 %v1258_v25, %v1323_v7  ;;  %v664_v53 = vmul.f32 %v1433_v46, %v1433_v46 }
 0x118   : > { %v684_v63 = vadd.f32 %v683_v58, %v653_v57  ;;  %v613_v1 = vadd.f32 %v612_v55, %v1374_v59  ;;  %v654_v2 = vmul.f32 %v1374_v59, %v1374_v59  ;;  %v1456_v7 = vadd.f32 %v1321_v5, %v1258_v25 }
 0x119   : > { %v662_v57 = vmul.f32 %v1424_v41, %v1424_v41 }
 0x11a   : > { %v614_v4 = vadd.f32 %v613_v1, %v1366_v49  ;;  %v685_v6 = vadd.f32 %v684_v63, %v654_v2  ;;  %v667_v5 = vmul.f32 %v1456_v7, %v1456_v7 }
 0x11c   : > { %v686_v9 = vadd.f32 %v685_v6, %v655_v3  ;;  %v615_v11 = vadd.f32 %v614_v4, %v1381_v0  ;;  %v665_v3 = vmul.f32 %v1440_v56, %v1440_v56  ;;  %v1452_v4 = vadd.f32 %v1258_v25, %v1336_v16 }
 0x11d   : > { %v1468_v16 = vadd.f32 %v1258_v25, %v1355_v40  ;;  %v1484_v40 = vadd.f32 %v1353_v37, %v1258_v25 }
 0x11e   : > { %v616_v17 = vadd.f32 %v615_v11, %v1378_v61  ;;  %v687_v18 = vadd.f32 %v686_v9, %v656_v29  ;;  %v1461_v29 = vadd.f32 %v1331_v13, %v1258_v25 }
 0x120   : > { %v688_v21 = vadd.f32 %v687_v18, %v657_v8  ;;  %v617_v23 = vadd.f32 %v616_v17, %v1396_v12  ;;  %v666_v17 = vmul.f32 %v1452_v4, %v1452_v4  ;;  %v668_v13 = vmul.f32 %v1461_v29, %v1461_v29 }
 0x122   : > { %v618_v26 = vadd.f32 %v617_v23, %v1400_v15  ;;  %v689_v28 = vadd.f32 %v688_v21, %v658_v24 }
 0x124   : > { %v690_v31 = vadd.f32 %v689_v28, %v659_v27  ;;  %v619_v33 = vadd.f32 %v618_v26, %v1405_v19  ;;  %v669_v27 = vmul.f32 %v1468_v16, %v1468_v16  ;;  %v1480_v26 = vadd.f32 %v1258_v25, %v1368_v52 }
 0x125   : > { %v671_v52 = vmul.f32 %v1484_v40, %v1484_v40 }
 0x126   : > { %v620_v42 = vadd.f32 %v619_v33, %v1412_v34  ;;  %v691_v44 = vadd.f32 %v690_v31, %v660_v32  ;;  %v1489_v33 = vadd.f32 %v1363_v48, %v1258_v25 }
 0x128   : > { %v692_v51 = vadd.f32 %v691_v44, %v661_v39  ;;  %v621_v55 = vadd.f32 %v620_v42, %v1424_v41  ;;  %v670_v42 = vmul.f32 %v1480_v26, %v1480_v26 }
 0x12a   : > { %v622_v58 = vadd.f32 %v621_v55, %v1428_v47  ;;  %v693_v63 = vadd.f32 %v692_v51, %v662_v57  ;;  %v672_v51 = vmul.f32 %v1489_v33, %v1489_v33 }
 0x12c   : > { %v694_v1 = vadd.f32 %v693_v63, %v663_v45  ;;  %v623_v2 = vadd.f32 %v622_v58, %v1433_v46 }
 0x12e   : > { %v624_v6 = vadd.f32 %v623_v2, %v1440_v56  ;;  %v695_v8 = vadd.f32 %v694_v1, %v664_v53 }
 0x130   : > { %v696_v9 = vadd.f32 %v695_v8, %v665_v3  ;;  %v625_v11 = vadd.f32 %v624_v6, %v1452_v4  ;;  %v600_v8 = vld [vmem:[#allocation2] sm:$0x1] }
 0x132   : > { %v626_v18 = vadd.f32 %v625_v11, %v1456_v7  ;;  %v697_v21 = vadd.f32 %v696_v9, %v666_v17  ;;  %v640_v17 = vld [vmem:[#allocation3] sm:$0x1] }
 0x134   : > { %v698_v23 = vadd.f32 %v697_v21, %v667_v5  ;;  %v627_v24 = vadd.f32 %v626_v18, %v1461_v29 }
 0x136   : > { %v628_v28 = vadd.f32 %v627_v24, %v1468_v16  ;;  %v699_v32 = vadd.f32 %v698_v23, %v668_v13  ;;  %v757_v13 = vlaneseq }
 0x138   : > { %v700_v31 = vadd.f32 %v699_v32, %v669_v27  ;;  %v629_v39 = vadd.f32 %v628_v28, %v1480_v26 }
 0x13a   : > { %v630_v44 = vadd.f32 %v629_v39, %v1484_v40  ;;  %v701_v37 = vadd.f32 %v700_v31, %v670_v42  ;;  %v758_v31 = vshrl.u32 %v757_v13, 7 }
 0x13c   : > { %v631_v55 = vadd.f32 %v630_v44, %v1489_v33  ;;  %v702_v57 = vadd.f32 %v701_v37, %v671_v52  ;;  %v759_v52 = vsub.s32 0, %v758_v31 }
 0x13e   : > { %v632_v45 = vrot.slane %v631_v55, 4  ;;  %v703_v25 = vadd.f32 %v702_v57, %v672_v51 }
 0x140   : > { %v633_v48 = vadd.f32 %v632_v45, %v631_v55  ;;  %v704_v58 = vrot.slane %v703_v25, 4 }
 0x142   : > { %v634_v63 = vrot.slane %v633_v48, 2  ;;  %v705_v53 = vadd.f32 %v704_v58, %v703_v25 }
 0x144   : > { %v635_v1 = vadd.f32 %v634_v63, %v633_v48  ;;  %v706_v2 = vrot.slane %v705_v53, 2 }
 0x146   : > { %v636_v3 = vrot.slane %v635_v1, 1  ;;  %v707_v6 = vadd.f32 %v706_v2, %v705_v53 }
 0x148   : > { %v637_v9 = vadd.f32 %v636_v3, %v635_v1  ;;  %v708_v11 = vrot.slane %v707_v6, 1 }
 0x14a   : > { %v638_v5 = vadd.f32 %v637_v9, %v600_v8  ;;  %v709_v18 = vadd.f32 %v708_v11, %v707_v6 }
 0x14c   : > { %639 = vst [vmem:[#allocation2] sm:$0x1] %v638_v5  ;;  %v710_v21 = vadd.f32 %v709_v18, %v640_v17 }
 0x14e   : > { %711 = vst [vmem:[#allocation3] sm:$0x1] %v710_v21 }
 0x153   : > { %v715_v23 = vld [vmem:[#allocation2] sm:$0x1] }
 0x154   : > { %v716_v24 = vmul.f32 0.00390625, %v715_v23 }
 0x155   : > { %v717_v27 = vld [vmem:[#allocation3] sm:$0x1] }
 0x156   : > { %v718_v28 = vmul.f32 0.00390625, %v717_v27  ;;  %v719_v32 = vmul.f32 %v716_v24, %v716_v24  ;;  %v1500_v37 = vrot.slane %v716_v24, %v759_v52 }
 0x158   : > { %v720_v39 = vsub.f32 %v718_v28, %v719_v32  ;;  %v762_v51 = vsub.f32 %v1265_v30, %v1500_v37  ;;  %v763_v55 = vsub.f32 %v1275_v36, %v1500_v37  ;;  %v764_v57 = vsub.f32 %v1272_v35, %v1500_v37 }
 0x159   : > { %v765_v45 = vsub.f32 %v1280_v38, %v1500_v37  ;;  %v766_v25 = vsub.f32 %v1296_v50, %v1500_v37  ;;  %v767_v48 = vsub.f32 %v1310_v60, %v1500_v37  ;;  %v768_v58 = vsub.f32 %v1302_v54, %v1500_v37 }
 0x15a   : > { %v721_v42 = vmax.f32 %v720_v39, 0.0  ;;  %v769_v30 = vsub.f32 %v1313_v62, %v1500_v37  ;;  %v770_v36 = vsub.f32 %v1328_v10, %v1500_v37  ;;  %v771_v35 = vsub.f32 %v1342_v20, %v1500_v37 }
 0x15b   : > { %v772_v38 = vsub.f32 %v1334_v14, %v1500_v37  ;;  %v773_v50 = vsub.f32 %v1345_v22, %v1500_v37  ;;  %v774_v60 = vsub.f32 %v1360_v43, %v1500_v37  ;;  %v775_v54 = vsub.f32 %v1374_v59, %v1500_v37 }
 0x15c   : > { %v722_v44 = vadd.f32 1e-05, %v721_v42  ;;  %v776_v62 = vsub.f32 %v1366_v49, %v1500_v37  ;;  %v777_v10 = vsub.f32 %v1381_v0, %v1500_v37  ;;  %v778_v20 = vsub.f32 %v1378_v61, %v1500_v37 }
 0x15d   : > { %v779_v14 = vsub.f32 %v1396_v12, %v1500_v37  ;;  %v780_v22 = vsub.f32 %v1400_v15, %v1500_v37  ;;  %v781_v43 = vsub.f32 %v1405_v19, %v1500_v37  ;;  %v782_v59 = vsub.f32 %v1412_v34, %v1500_v37 }
 0x15e   : > { %1142 = vrsqrt.f32 %v722_v44  ;;  %v783_v49 = vsub.f32 %v1424_v41, %v1500_v37  ;;  %v784_v0 = vsub.f32 %v1428_v47, %v1500_v37  ;;  %v785_v61 = vsub.f32 %v1433_v46, %v1500_v37 }
 0x15f   : > { %v786_v12 = vsub.f32 %v1440_v56, %v1500_v37  ;;  %v787_v15 = vsub.f32 %v1452_v4, %v1500_v37  ;;  %v788_v19 = vsub.f32 %v1456_v7, %v1500_v37  ;;  %v789_v34 = vsub.f32 %v1461_v29, %v1500_v37 }
 0x160   : > { %v790_v41 = vsub.f32 %v1468_v16, %v1500_v37  ;;  %v791_v47 = vsub.f32 %v1480_v26, %v1500_v37  ;;  %v792_v46 = vsub.f32 %v1484_v40, %v1500_v37  ;;  %v793_v56 = vsub.f32 %v1489_v33, %v1500_v37 }
 0x168   : > { %v1143_v63 = vpop.eup %1142 }
 0x169   : > { %v798_v53 = vrot.slane %v1143_v63, %v759_v52 }
 0x16b   : > { %v800_v4 = vmul.f32 %v798_v53, %v762_v51  ;;  %v801_v1 = vmul.f32 %v798_v53, %v763_v55  ;;  %v802_v7 = vmul.f32 %v798_v53, %v764_v57  ;;  %v803_v2 = vmul.f32 %v798_v53, %v765_v45 }
 0x16c   : > { %v804_v3 = vmul.f32 %v798_v53, %v766_v25  ;;  %v805_v29 = vmul.f32 %v798_v53, %v767_v48  ;;  %v806_v6 = vmul.f32 %v798_v53, %v768_v58  ;;  %v807_v8 = vmul.f32 %v798_v53, %v769_v30 }
 0x16d   : > { %v808_v9 = vmul.f32 %v798_v53, %v770_v36  ;;  %v809_v16 = vmul.f32 %v798_v53, %v771_v35  ;;  %v810_v11 = vmul.f32 %v798_v53, %v772_v38  ;;  %v811_v17 = vmul.f32 %v798_v53, %v773_v50 }
 0x16e   : > { %v812_v26 = vmul.f32 %v798_v53, %v774_v60  ;;  %v813_v5 = vmul.f32 %v798_v53, %v775_v54  ;;  %v814_v18 = vmul.f32 %v798_v53, %v776_v62  ;;  %v815_v40 = vmul.f32 %v798_v53, %v777_v10 }
 0x16f   : > { %v816_v21 = vmul.f32 %v798_v53, %v778_v20  ;;  %v817_v33 = vmul.f32 %v798_v53, %v779_v14  ;;  %v818_v13 = vmul.f32 %v798_v53, %v780_v22  ;;  %v819_v23 = vmul.f32 %v798_v53, %v781_v43 }
 0x170   : > { %v1567_v24 = vmul.f32 %v798_v53, %v782_v59  ;;  %v1569_v27 = vmul.f32 %v798_v53, %v783_v49  ;;  %v1571_v28 = vmul.f32 %v798_v53, %v784_v0  ;;  %v1573_v32 = vmul.f32 %v798_v53, %v785_v61 }
 0x171   : > { %v1575_v31 = vmul.f32 %v798_v53, %v786_v12  ;;  %v1577_v39 = vmul.f32 %v798_v53, %v787_v15  ;;  %v1579_v42 = vmul.f32 %v798_v53, %v788_v19  ;;  %v1581_v52 = vmul.f32 %v798_v53, %v789_v34 }
 0x172   : > { %v1588_v44 = vmul.f32 %v798_v53, %v790_v41  ;;  %v1590_v37 = vmul.f32 %v798_v53, %v791_v47  ;;  %v1592_v51 = vmul.f32 %v798_v53, %v792_v46  ;;  %v1594_v55 = vmul.f32 %v798_v53, %v793_v56 }
 0x173   : > { %v832_v57 = vmax.f32 %v800_v4, 0.0  ;;  %v833_v45 = vmax.f32 %v801_v1, 0.0  ;;  %v834_v25 = vmax.f32 %v802_v7, 0.0  ;;  %v835_v48 = vmax.f32 %v803_v2, 0.0 }
 0x174   : > { %v836_v58 = vmax.f32 %v804_v3, 0.0  ;;  %v837_v30 = vmax.f32 %v805_v29, 0.0  ;;  %v838_v36 = vmax.f32 %v806_v6, 0.0  ;;  %v839_v35 = vmax.f32 %v807_v8, 0.0 }
 0x175   : > { %v840_v38 = vmax.f32 %v808_v9, 0.0  ;;  %v841_v50 = vmax.f32 %v809_v16, 0.0  ;;  %v842_v60 = vmax.f32 %v810_v11, 0.0  ;;  %v843_v54 = vmax.f32 %v811_v17, 0.0  ;;  %864 = vst [vmem:[%s1586_s17] sm:$0xff] %v832_v57  ;;  %865 = vst [vmem:[%s1586_s17 + $0x8] sm:$0xff] %v833_v45 }
 0x176   : > { %866 = vst [vmem:[%s1586_s17 + $0x10] sm:$0xff] %v834_v25  ;;  %867 = vst [vmem:[%s1586_s17 + $0x18] sm:$0xff] %v835_v48  ;;  %v844_v62 = vmax.f32 %v812_v26, 0.0  ;;  %v845_v10 = vmax.f32 %v813_v5, 0.0  ;;  %v846_v20 = vmax.f32 %v814_v18, 0.0  ;;  %v847_v14 = vmax.f32 %v815_v40, 0.0 }
 0x177   : > { %868 = vst [vmem:[%s1586_s17 + $0x20] sm:$0xff] %v836_v58  ;;  %869 = vst [vmem:[%s1586_s17 + $0x28] sm:$0xff] %v837_v30  ;;  %v848_v22 = vmax.f32 %v816_v21, 0.0  ;;  %v849_v43 = vmax.f32 %v817_v33, 0.0  ;;  %v850_v59 = vmax.f32 %v818_v13, 0.0  ;;  %v851_v63 = vmax.f32 %v819_v23, 0.0 }
 0x178   : > { %870 = vst [vmem:[%s1586_s17 + $0x30] sm:$0xff] %v838_v36  ;;  %871 = vst [vmem:[%s1586_s17 + $0x38] sm:$0xff] %v839_v35  ;;  %v852_v49 = vmax.f32 %v1567_v24, 0.0  ;;  %v853_v0 = vmax.f32 %v1569_v27, 0.0  ;;  %v854_v61 = vmax.f32 %v1571_v28, 0.0  ;;  %v855_v12 = vmax.f32 %v1573_v32, 0.0 }
 0x179   : > { %872 = vst [vmem:[%s1586_s17 + $0x40] sm:$0xff] %v840_v38  ;;  %873 = vst [vmem:[%s1586_s17 + $0x48] sm:$0xff] %v841_v50  ;;  %v856_v15 = vmax.f32 %v1575_v31, 0.0  ;;  %v857_v19 = vmax.f32 %v1577_v39, 0.0  ;;  %v858_v34 = vmax.f32 %v1579_v42, 0.0  ;;  %v859_v53 = vmax.f32 %v1581_v52, 0.0 }
 0x17a   : > { %874 = vst [vmem:[%s1586_s17 + $0x50] sm:$0xff] %v842_v60  ;;  %875 = vst [vmem:[%s1586_s17 + $0x58] sm:$0xff] %v843_v54  ;;  %v860_v41 = vmax.f32 %v1588_v44, 0.0  ;;  %v861_v47 = vmax.f32 %v1590_v37, 0.0  ;;  %v862_v46 = vmax.f32 %v1592_v51, 0.0  ;;  %v863_v56 = vmax.f32 %v1594_v55, 0.0 }
 0x17b   : > { %876 = vst [vmem:[%s1586_s17 + $0x60] sm:$0xff] %v844_v62  ;;  %877 = vst [vmem:[%s1586_s17 + $0x68] sm:$0xff] %v845_v10 }
 0x17c   : > { %878 = vst [vmem:[%s1586_s17 + $0x70] sm:$0xff] %v846_v20  ;;  %879 = vst [vmem:[%s1586_s17 + $0x78] sm:$0xff] %v847_v14 }
 0x17d   : > { %880 = vst [vmem:[%s1586_s17 + $0x80] sm:$0xff] %v848_v22  ;;  %881 = vst [vmem:[%s1586_s17 + $0x88] sm:$0xff] %v849_v43 }
 0x17e   : > { %882 = vst [vmem:[%s1586_s17 + $0x90] sm:$0xff] %v850_v59  ;;  %883 = vst [vmem:[%s1586_s17 + $0x98] sm:$0xff] %v851_v63 }
 0x17f   : > { %884 = vst [vmem:[%s1586_s17 + $0xa0] sm:$0xff] %v852_v49  ;;  %885 = vst [vmem:[%s1586_s17 + $0xa8] sm:$0xff] %v853_v0 }
 0x180   : > { %886 = vst [vmem:[%s1586_s17 + $0xb0] sm:$0xff] %v854_v61  ;;  %887 = vst [vmem:[%s1586_s17 + $0xb8] sm:$0xff] %v855_v12 }
 0x181   : > { %888 = vst [vmem:[%s1586_s17 + $0xc0] sm:$0xff] %v856_v15  ;;  %889 = vst [vmem:[%s1586_s17 + $0xc8] sm:$0xff] %v857_v19 }
 0x182   : > { %890 = vst [vmem:[%s1586_s17 + $0xd0] sm:$0xff] %v858_v34  ;;  %891 = vst [vmem:[%s1586_s17 + $0xd8] sm:$0xff] %v859_v53 }
 0x183   : > { %892 = vst [vmem:[%s1586_s17 + $0xe0] sm:$0xff] %v860_v41  ;;  %893 = vst [vmem:[%s1586_s17 + $0xe8] sm:$0xff] %v861_v47 }
 0x184   : > { %894 = vst [vmem:[%s1586_s17 + $0xf0] sm:$0xff] %v862_v46  ;;  %895 = vst [vmem:[%s1586_s17 + $0xf8] sm:$0xff] %v863_v56 }
 0x185 PF: > { %s13_s14 = sadd.s32 1, %s1166_s14   ;;  %s1653_s12 = smov %s1162_s13 }
 0x186   : > { %p10_p5 = scmp.ge.s32.totalorder %s13_s14, 4   ;;  %s1654_s13 = smov %s1656_s15 }
 0x188   :  { %12 = sbr.rel (!%p10_p5) target bundleno = 2 (0x2), region = 71 }

// kernel: generator_forward.47
= control target key start
LH: loop header
LB: loop body
LE: loop exit
PB: predicated region body
PF: predicated region fallthrough
CT: control target
= control target key end

     0   :  { %s1242_s12 = smov 0   ;;  %s1244_s13 = smov 0   ;;  %s1435_s0 = inlined_call_operand.vmem [shape: bf16[2,256,256], index: 0, kind: input, shape index: {}]   ;;  %s1436_s1 = inlined_call_operand.vmem [shape: bf16[256,128], index: 1, kind: input, shape index: {}]   ;;  %s1437_s2 = inlined_call_operand.vmem [shape: f32[1,128], index: 2, kind: input, shape index: {}]   ;;  %s1438_s3 = inlined_call_operand.vmem [shape: f32[2,256,128], index: 3, kind: output, shape index: {}]  }
   0x1   :  { %s1246_s14 = smov 0  }
   0x2 LB: > { %s25_s15 = sadd.s32 1, %s1216_s13  ;;  %p860_p0 = scmp.ge.s32.totalorder %s1220_s14, 1  ;;  %s1220_s14 = sphi %s1246_s14, %s13_s14   ;;  %s1216_s13 = sphi %s1244_s13, %s1440_s13   ;;  %s1212_s12 = sphi %s1242_s12, %s1439_s12  }
   0x3   : > { %p27_p1 = scmp.ge.s32.totalorder %s25_s15, 2  ;;  %p159_p2 = scmp.lt.s32.totalorder %s1220_s14, 3 }
   0x5   : > { %s1442_s15 = smov (%p27_p1, %s25_s15), 0  ;;  %p160_p3 = pnand %p860_p0, %p159_p2 }
   0x6   : > { %v1070_v0 = vld [vmem:[%s1436_s1 + $0x40] sm:$0xff] (!%p160_p3)   ;;  %v1072_v2 = vld [vmem:[%s1436_s1 + $0x48] sm:$0xff] (!%p160_p3)   ;;  %p193_p4 = scmp.lt.s32.totalorder (!%p160_p3), %s1212_s12, 1  ;;  %v1074_v4 = vld [vmem:[%s1436_s1 + $0x50] sm:$0xff] (!%p160_p3)  }
   0x7   : > { %163 = sbr.rel (%p160_p3) target bundleno = 329 (0x149), region = 32  ;;  %v1071_v1 = vld [vmem:[%s1436_s1] sm:$0xff] (!%p160_p3)   ;;  %918 = vmatprep.subr.bf16.mxu0 (!%p160_p3), %v1070_v0  ;;  %1030 = vmatprep.subr.bf16.mxu1 (!%p160_p3), %v1070_v0  ;;  %v1073_v3 = vld [vmem:[%s1436_s1 + $0x8] sm:$0xff] (!%p160_p3)   ;;  %v1075_v5 = vld [vmem:[%s1436_s1 + $0x10] sm:$0xff] (!%p160_p3)  }
   0x8   : > { %919 = vmatpush3.bf16.msra.mxu0 (!%p160_p3), %v1071_v1  ;;  %1038 = vmatpush3.bf16.msra.mxu1 (!%p160_p3), %v1071_v1  ;;  %v1076_v6 = vld [vmem:[%s1436_s1 + $0x58] sm:$0xff] (!%p160_p3)   ;;  %v1078_v8 = vld [vmem:[%s1436_s1 + $0x60] sm:$0xff] (!%p160_p3)   ;;  %v1080_v10 = vld [vmem:[%s1436_s1 + $0x68] sm:$0xff] (!%p160_p3)  }
   0x9   : > { %920 = vmatprep.subr.bf16.mxu0 (!%p160_p3), %v1072_v2  ;;  %1031 = vmatprep.subr.bf16.mxu1 (!%p160_p3), %v1072_v2  ;;  %v1077_v7 = vld [vmem:[%s1436_s1 + $0x18] sm:$0xff] (!%p160_p3)   ;;  %v1079_v9 = vld [vmem:[%s1436_s1 + $0x20] sm:$0xff] (!%p160_p3)   ;;  %v1081_v13 = vld [vmem:[%s1436_s1 + $0x28] sm:$0xff] (!%p160_p3)  }
   0xa   : > { %v1082_v14 = vld [vmem:[%s1436_s1 + $0x70] sm:$0xff] (!%p160_p3)   ;;  %v1084_v16 = vld [vmem:[%s1436_s1 + $0x78] sm:$0xff] (!%p160_p3)   ;;  %v1353_v50 = vld [vmem:[%s1437_s2] ss:$0 sm:$0xff] (!%p160_p3) }
   0xb   : > { %v1083_v15 = vld [vmem:[%s1436_s1 + $0x30] sm:$0xff] (!%p160_p3)   ;;  %v1085_v17 = vld [vmem:[%s1436_s1 + $0x38] sm:$0xff] (!%p160_p3)  }
   0xc   : > { %921 = vmatpush3.bf16.msra.mxu0 (!%p160_p3), %v1073_v3  ;;  %1039 = vmatpush3.bf16.msra.mxu1 (!%p160_p3), %v1073_v3 }
   0xd   : > { %922 = vmatprep.subr.bf16.mxu0 (!%p160_p3), %v1074_v4  ;;  %1032 = vmatprep.subr.bf16.mxu1 (!%p160_p3), %v1074_v4 }
   0xe   : > { %s1444_s12 = smov (!%p193_p4, %s1212_s12), 1 }
   0xf   : > { %s916_s5 = sshll.u32 %s1444_s12, 8 }
  0x10   : > { %923 = vmatpush3.bf16.msra.mxu0 %v1075_v5  ;;  %1040 = vmatpush3.bf16.msra.mxu1 %v1075_v5  ;;  %s1295_s10 = scalar_lea.vmem %s1435_s0, %s916_s5  ;;  %s1366_s7 = scalar_lea.vmem %s1438_s3, %s916_s5 }
  0x11   : > { %924 = vmatprep.subr.bf16.mxu0 %v1076_v6  ;;  %1033 = vmatprep.subr.bf16.mxu1 %v1076_v6  ;;  %v1088_v11 = vld [vmem:[%s1295_s10 + $0x4] ss:$8 sps:$4 sm:$0xff]   ;;  %v1086_v18 = vld [vmem:[%s1295_s10] ss:$8 sps:$4 sm:$0xff]   ;;  %v1092_v20 = vld [vmem:[%s1295_s10 + $0x14] ss:$8 sps:$4 sm:$0xff]  }
  0x12   : > { %v1091_v12 = vld [vmem:[%s1295_s10 + $0x84] ss:$8 sps:$4 sm:$0xff]   ;;  %573 = vmatprep.mubr.bf16.mxu0 %v1088_v11  ;;  %v1089_v19 = vld [vmem:[%s1295_s10 + $0x80] ss:$8 sps:$4 sm:$0xff]   ;;  %v1094_v21 = vld [vmem:[%s1295_s10 + $0x94] ss:$8 sps:$4 sm:$0xff]  }
  0x13   : > { %637 = vmatprep.mubr.bf16.mxu1 %v1091_v12  ;;  %v1096_v22 = vld [vmem:[%s1295_s10 + $0x10] ss:$8 sps:$4 sm:$0xff]   ;;  %v1098_v24 = vld [vmem:[%s1295_s10 + $0x24] ss:$8 sps:$4 sm:$0xff]   ;;  %v1102_v26 = vld [vmem:[%s1295_s10 + $0x20] ss:$8 sps:$4 sm:$0xff]  }
  0x14   : > { %925 = vmatpush3.bf16.msra.mxu0 %v1077_v7  ;;  %1041 = vmatpush3.bf16.msra.mxu1 %v1077_v7  ;;  %v1097_v23 = vld [vmem:[%s1295_s10 + $0x90] ss:$8 sps:$4 sm:$0xff]   ;;  %v1100_v25 = vld [vmem:[%s1295_s10 + $0xa4] ss:$8 sps:$4 sm:$0xff]   ;;  %v1103_v27 = vld [vmem:[%s1295_s10 + $0xa0] ss:$8 sps:$4 sm:$0xff]  }
  0x15   : > { %926 = vmatprep.subr.bf16.mxu0 %v1078_v8  ;;  %1034 = vmatprep.subr.bf16.mxu1 %v1078_v8  ;;  %v1104_v28 = vld [vmem:[%s1295_s10 + $0x34] ss:$8 sps:$4 sm:$0xff]   ;;  %v1108_v30 = vld [vmem:[%s1295_s10 + $0x30] ss:$8 sps:$4 sm:$0xff]   ;;  %v1110_v32 = vld [vmem:[%s1295_s10 + $0x44] ss:$8 sps:$4 sm:$0xff]  }
  0x16   : > { %v1106_v29 = vld [vmem:[%s1295_s10 + $0xb4] ss:$8 sps:$4 sm:$0xff]   ;;  %v1109_v31 = vld [vmem:[%s1295_s10 + $0xb0] ss:$8 sps:$4 sm:$0xff]   ;;  %v1112_v33 = vld [vmem:[%s1295_s10 + $0xc4] ss:$8 sps:$4 sm:$0xff]  }
  0x17   : > { %v1114_v34 = vld [vmem:[%s1295_s10 + $0x40] ss:$8 sps:$4 sm:$0xff]   ;;  %v1116_v36 = vld [vmem:[%s1295_s10 + $0x54] ss:$8 sps:$4 sm:$0xff]   ;;  %v1120_v38 = vld [vmem:[%s1295_s10 + $0x50] ss:$8 sps:$4 sm:$0xff]  }
  0x18   : > { %927 = vmatpush3.bf16.msra.mxu0 %v1079_v9  ;;  %1042 = vmatpush3.bf16.msra.mxu1 %v1079_v9  ;;  %v1115_v35 = vld [vmem:[%s1295_s10 + $0xc0] ss:$8 sps:$4 sm:$0xff]   ;;  %v1118_v37 = vld [vmem:[%s1295_s10 + $0xd4] ss:$8 sps:$4 sm:$0xff]   ;;  %v1121_v39 = vld [vmem:[%s1295_s10 + $0xd0] ss:$8 sps:$4 sm:$0xff]  }
  0x19   : > { %928 = vmatprep.subr.bf16.mxu0 %v1080_v10  ;;  %1035 = vmatprep.subr.bf16.mxu1 %v1080_v10  ;;  %v1122_v40 = vld [vmem:[%s1295_s10 + $0x64] ss:$8 sps:$4 sm:$0xff]   ;;  %v1126_v42 = vld [vmem:[%s1295_s10 + $0x60] ss:$8 sps:$4 sm:$0xff]   ;;  %v1128_v44 = vld [vmem:[%s1295_s10 + $0x74] ss:$8 sps:$4 sm:$0xff]  }
  0x1a   : > { %v1124_v41 = vld [vmem:[%s1295_s10 + $0xe4] ss:$8 sps:$4 sm:$0xff]   ;;  %v1127_v43 = vld [vmem:[%s1295_s10 + $0xe0] ss:$8 sps:$4 sm:$0xff]   ;;  %v1130_v45 = vld [vmem:[%s1295_s10 + $0xf4] ss:$8 sps:$4 sm:$0xff]  }
  0x1b   : > { %v1132_v46 = vld [vmem:[%s1295_s10 + $0x70] ss:$8 sps:$4 sm:$0xff]  }
  0x1c   : > { %929 = vmatpush3.bf16.msra.mxu0 %v1081_v13  ;;  %1043 = vmatpush3.bf16.msra.mxu1 %v1081_v13  ;;  %v1133_v47 = vld [vmem:[%s1295_s10 + $0xf0] ss:$8 sps:$4 sm:$0xff]  }
  0x1d   : > { %930 = vmatprep.subr.bf16.mxu0 %v1082_v14  ;;  %1036 = vmatprep.subr.bf16.mxu1 %v1082_v14 }
  0x20   : > { %931 = vmatpush3.bf16.msra.mxu0 %v1083_v15  ;;  %1044 = vmatpush3.bf16.msra.mxu1 %v1083_v15 }
  0x21   : > { %932 = vmatprep.subr.bf16.mxu0 %v1084_v16  ;;  %1037 = vmatprep.subr.bf16.mxu1 %v1084_v16 }
  0x24   : > { %933 = vmatpush3.bf16.msra.mxu0 %v1085_v17  ;;  %1045 = vmatpush3.bf16.msra.mxu1 %v1085_v17 }
  0x27   : > { %574 = vmatmul.mubr.bf16.vlgmr.msra.gmra.mrb[0].mxu0 %v1086_v18  ;;  %638 = vmatmul.mubr.bf16.vlgmr.msra.gmra.mrb[0].mxu1 %v1089_v19 }
  0x28   : > { %581 = vmatprep.mubr.bf16.mxu0 %v1092_v20  ;;  %645 = vmatprep.mubr.bf16.mxu1 %v1094_v21 }
  0x2f   : > { %582 = vmatmul.mubr.bf16.gmra.mrb[4].mxu0 %v1096_v22  ;;  %646 = vmatmul.mubr.bf16.gmra.mrb[4].mxu1 %v1097_v23 }
  0x30   : > { %589 = vmatprep.mubr.bf16.mxu0 %v1098_v24  ;;  %653 = vmatprep.mubr.bf16.mxu1 %v1100_v25 }
  0x37   : > { %590 = vmatmul.mubr.bf16.gmra.mrb[8].mxu0 %v1102_v26  ;;  %654 = vmatmul.mubr.bf16.gmra.mrb[8].mxu1 %v1103_v27 }
  0x38   : > { %597 = vmatprep.mubr.bf16.mxu0 %v1104_v28  ;;  %661 = vmatprep.mubr.bf16.mxu1 %v1106_v29 }
  0x3f   : > { %598 = vmatmul.mubr.bf16.gmra.mrb[12].mxu0 %v1108_v30  ;;  %662 = vmatmul.mubr.bf16.gmra.mrb[12].mxu1 %v1109_v31 }
  0x40   : > { %605 = vmatprep.mubr.bf16.mxu0 %v1110_v32  ;;  %669 = vmatprep.mubr.bf16.mxu1 %v1112_v33 }
  0x47   : > { %606 = vmatmul.mubr.bf16.gmra.mrb[16].mxu0 %v1114_v34  ;;  %670 = vmatmul.mubr.bf16.gmra.mrb[16].mxu1 %v1115_v35 }
  0x48   : > { %613 = vmatprep.mubr.bf16.mxu0 %v1116_v36  ;;  %677 = vmatprep.mubr.bf16.mxu1 %v1118_v37 }
  0x4f   : > { %614 = vmatmul.mubr.bf16.gmra.mrb[20].mxu0 %v1120_v38  ;;  %678 = vmatmul.mubr.bf16.gmra.mrb[20].mxu1 %v1121_v39 }
  0x50   : > { %621 = vmatprep.mubr.bf16.mxu0 %v1122_v40  ;;  %685 = vmatprep.mubr.bf16.mxu1 %v1124_v41 }
  0x57   : > { %622 = vmatmul.mubr.bf16.gmra.mrb[24].mxu0 %v1126_v42  ;;  %686 = vmatmul.mubr.bf16.gmra.mrb[24].mxu1 %v1127_v43 }
  0x58   : > { %629 = vmatprep.mubr.bf16.mxu0 %v1128_v44  ;;  %693 = vmatprep.mubr.bf16.mxu1 %v1130_v45 }
  0x5f   : > { %630 = vmatmul.mubr.bf16.gmra.mrb[28].mxu0 %v1132_v46  ;;  %694 = vmatmul.mubr.bf16.gmra.mrb[28].mxu1 %v1133_v47 }
  0xfa   : > { %v934_v48 = vpop.f32.mrb[0].mxu0  ;;  %v982_v49 = vpop.f32.mrb[0].mxu1 }
  0xfb   : > { %v935_v51 = vpop.f32.mrb[1].mxu0  ;;  %v983_v52 = vpop.f32.mrb[1].mxu1 }
  0xfc   : > { %v936_v53 = vadd.f32 %v935_v51, %v934_v48  ;;  %v984_v54 = vadd.f32 %v983_v52, %v982_v49  ;;  %v937_v55 = vpop.f32.mrb[2].mxu0  ;;  %v985_v56 = vpop.f32.mrb[2].mxu1 }
  0xfd   : > { %v938_v57 = vpop.f32.mrb[3].mxu0  ;;  %v986_v58 = vpop.f32.mrb[3].mxu1 }
  0xfe   : > { %v576_v59 = vadd.f32 %v936_v53, %v1353_v50  ;;  %v640_v60 = vadd.f32 %v984_v54, %v1353_v50  ;;  %v939_v61 = vadd.f32 %v938_v57, %v937_v55  ;;  %v987_v62 = vadd.f32 %v986_v58, %v985_v56 }
 0x100   : > { %1134 = vtanh.f32 %v576_v59  ;;  %v579_v63 = vadd.f32 %v939_v61, %v1353_v50  ;;  %v643_v0 = vadd.f32 %v987_v62, %v1353_v50 }
 0x101   : > { %1136 = vtanh.f32 %v640_v60 }
 0x102   : > { %1138 = vtanh.f32 %v579_v63  ;;  %v940_v1 = vpop.f32.mrb[4].mxu0  ;;  %v988_v2 = vpop.f32.mrb[4].mxu1 }
 0x103   : > { %1140 = vtanh.f32 %v643_v0  ;;  %v941_v3 = vpop.f32.mrb[5].mxu0  ;;  %v989_v4 = vpop.f32.mrb[5].mxu1 }
 0x104   : > { %v942_v5 = vadd.f32 %v941_v3, %v940_v1  ;;  %v990_v6 = vadd.f32 %v989_v4, %v988_v2  ;;  %v943_v7 = vpop.f32.mrb[6].mxu0  ;;  %v991_v8 = vpop.f32.mrb[6].mxu1 }
 0x105   : > { %v944_v9 = vpop.f32.mrb[7].mxu0  ;;  %v992_v10 = vpop.f32.mrb[7].mxu1 }
 0x106   : > { %v584_v11 = vadd.f32 %v942_v5, %v1353_v50  ;;  %v648_v12 = vadd.f32 %v990_v6, %v1353_v50  ;;  %v945_v13 = vadd.f32 %v944_v9, %v943_v7  ;;  %v993_v14 = vadd.f32 %v992_v10, %v991_v8 }
 0x108   : > { %1142 = vtanh.f32 %v584_v11  ;;  %v587_v15 = vadd.f32 %v945_v13, %v1353_v50  ;;  %v651_v16 = vadd.f32 %v993_v14, %v1353_v50 }
 0x109   : > { %1144 = vtanh.f32 %v648_v12 }
 0x10a   : > { %v1135_v17 = vpop.eup %1134  ;;  %1146 = vtanh.f32 %v587_v15  ;;  %v946_v18 = vpop.f32.mrb[8].mxu0 }
 0x10b   : > { %v994_v19 = vpop.f32.mrb[8].mxu1  ;;  %v1137_v20 = vpop.eup %1136  ;;  %734 = vst [vmem:[%s1366_s7] sm:$0xff] %v1135_v17  ;;  %1148 = vtanh.f32 %v651_v16 }
 0x10c   : > { %v947_v21 = vpop.f32.mrb[9].mxu0  ;;  %v995_v22 = vpop.f32.mrb[9].mxu1  ;;  %750 = vst [vmem:[%s1366_s7 + $0x80] sm:$0xff] %v1137_v20 }
 0x10d   : > { %v1139_v23 = vpop.eup %1138  ;;  %v948_v24 = vadd.f32 %v947_v21, %v946_v18  ;;  %v996_v25 = vadd.f32 %v995_v22, %v994_v19  ;;  %v949_v26 = vpop.f32.mrb[10].mxu0 }
 0x10e   : > { %v997_v27 = vpop.f32.mrb[10].mxu1  ;;  %v1141_v28 = vpop.eup %1140  ;;  %735 = vst [vmem:[%s1366_s7 + $0x8] sm:$0xff] %v1139_v23 }
 0x10f   : > { %v950_v29 = vpop.f32.mrb[11].mxu0  ;;  %v998_v30 = vpop.f32.mrb[11].mxu1  ;;  %751 = vst [vmem:[%s1366_s7 + $0x88] sm:$0xff] %v1141_v28  ;;  %v592_v31 = vadd.f32 %v948_v24, %v1353_v50  ;;  %v656_v32 = vadd.f32 %v996_v25, %v1353_v50 }
 0x110   : > { %v951_v33 = vadd.f32 %v950_v29, %v949_v26  ;;  %v999_v34 = vadd.f32 %v998_v30, %v997_v27 }
 0x111   : > { %1150 = vtanh.f32 %v592_v31 }
 0x112   : > { %v595_v35 = vadd.f32 %v951_v33, %v1353_v50  ;;  %v659_v36 = vadd.f32 %v999_v34, %v1353_v50  ;;  %1152 = vtanh.f32 %v656_v32  ;;  %v1143_v37 = vpop.eup %1142  ;;  %v952_v38 = vpop.f32.mrb[12].mxu0 }
 0x113   : > { %v1000_v39 = vpop.f32.mrb[12].mxu1  ;;  %v1145_v40 = vpop.eup %1144  ;;  %736 = vst [vmem:[%s1366_s7 + $0x10] sm:$0xff] %v1143_v37 }
 0x114   : > { %1154 = vtanh.f32 %v595_v35  ;;  %v953_v41 = vpop.f32.mrb[13].mxu0  ;;  %v1001_v42 = vpop.f32.mrb[13].mxu1  ;;  %752 = vst [vmem:[%s1366_s7 + $0x90] sm:$0xff] %v1145_v40 }
 0x115   : > { %1156 = vtanh.f32 %v659_v36  ;;  %v1147_v43 = vpop.eup %1146  ;;  %v954_v44 = vadd.f32 %v953_v41, %v952_v38  ;;  %v1002_v45 = vadd.f32 %v1001_v42, %v1000_v39  ;;  %v955_v46 = vpop.f32.mrb[14].mxu0 }
 0x116   : > { %v1003_v47 = vpop.f32.mrb[14].mxu1  ;;  %v1149_v48 = vpop.eup %1148  ;;  %737 = vst [vmem:[%s1366_s7 + $0x18] sm:$0xff] %v1147_v43 }
 0x117   : > { %v956_v49 = vpop.f32.mrb[15].mxu0  ;;  %v1004_v51 = vpop.f32.mrb[15].mxu1  ;;  %753 = vst [vmem:[%s1366_s7 + $0x98] sm:$0xff] %v1149_v48  ;;  %v600_v52 = vadd.f32 %v954_v44, %v1353_v50  ;;  %v664_v53 = vadd.f32 %v1002_v45, %v1353_v50 }
 0x118   : > { %v957_v54 = vadd.f32 %v956_v49, %v955_v46  ;;  %v1005_v55 = vadd.f32 %v1004_v51, %v1003_v47 }
 0x119   : > { %1158 = vtanh.f32 %v600_v52 }
 0x11a   : > { %v603_v56 = vadd.f32 %v957_v54, %v1353_v50  ;;  %v667_v57 = vadd.f32 %v1005_v55, %v1353_v50  ;;  %1160 = vtanh.f32 %v664_v53  ;;  %v958_v59 = vpop.f32.mrb[16].mxu0  ;;  %v1006_v60 = vpop.f32.mrb[16].mxu1 }
 0x11b   : > { %v1151_v58 = vpop.eup %1150  ;;  %v959_v62 = vpop.f32.mrb[17].mxu0 }
 0x11c   : > { %1162 = vtanh.f32 %v603_v56  ;;  %v1153_v61 = vpop.eup %1152  ;;  %738 = vst [vmem:[%s1366_s7 + $0x20] sm:$0xff] %v1151_v58  ;;  %v1007_v63 = vpop.f32.mrb[17].mxu1  ;;  %v960_v1 = vadd.f32 %v959_v62, %v958_v59 }
 0x11d   : > { %1164 = vtanh.f32 %v667_v57  ;;  %754 = vst [vmem:[%s1366_s7 + $0xa0] sm:$0xff] %v1153_v61  ;;  %v1008_v2 = vadd.f32 %v1007_v63, %v1006_v60  ;;  %v961_v3 = vpop.f32.mrb[18].mxu0  ;;  %v1009_v4 = vpop.f32.mrb[18].mxu1 }
 0x11e   : > { %v1155_v0 = vpop.eup %1154  ;;  %v962_v6 = vpop.f32.mrb[19].mxu0  ;;  %v608_v8 = vadd.f32 %v960_v1, %v1353_v50 }
 0x11f   : > { %v1157_v5 = vpop.eup %1156  ;;  %739 = vst [vmem:[%s1366_s7 + $0x28] sm:$0xff] %v1155_v0  ;;  %v1010_v7 = vpop.f32.mrb[19].mxu1  ;;  %v672_v9 = vadd.f32 %v1008_v2, %v1353_v50  ;;  %v963_v10 = vadd.f32 %v962_v6, %v961_v3 }
 0x120   : > { %755 = vst [vmem:[%s1366_s7 + $0xa8] sm:$0xff] %v1157_v5  ;;  %v1011_v11 = vadd.f32 %v1010_v7, %v1009_v4  ;;  %1166 = vtanh.f32 %v608_v8 }
 0x121   : > { %v611_v12 = vadd.f32 %v963_v10, %v1353_v50  ;;  %1168 = vtanh.f32 %v672_v9 }
 0x122   : > { %v675_v13 = vadd.f32 %v1011_v11, %v1353_v50  ;;  %v964_v15 = vpop.f32.mrb[20].mxu0  ;;  %v1012_v16 = vpop.f32.mrb[20].mxu1 }
 0x123   : > { %v1159_v14 = vpop.eup %1158  ;;  %1170 = vtanh.f32 %v611_v12  ;;  %v965_v18 = vpop.f32.mrb[21].mxu0 }
 0x124   : > { %v1161_v17 = vpop.eup %1160  ;;  %740 = vst [vmem:[%s1366_s7 + $0x30] sm:$0xff] %v1159_v14  ;;  %1172 = vtanh.f32 %v675_v13  ;;  %v1013_v19 = vpop.f32.mrb[21].mxu1  ;;  %v966_v21 = vadd.f32 %v965_v18, %v964_v15 }
 0x125   : > { %756 = vst [vmem:[%s1366_s7 + $0xb0] sm:$0xff] %v1161_v17  ;;  %v1014_v22 = vadd.f32 %v1013_v19, %v1012_v16  ;;  %v967_v23 = vpop.f32.mrb[22].mxu0  ;;  %v1015_v24 = vpop.f32.mrb[22].mxu1 }
 0x126   : > { %v1163_v20 = vpop.eup %1162  ;;  %v968_v26 = vpop.f32.mrb[23].mxu0  ;;  %v616_v28 = vadd.f32 %v966_v21, %v1353_v50 }
 0x127   : > { %v1165_v25 = vpop.eup %1164  ;;  %741 = vst [vmem:[%s1366_s7 + $0x38] sm:$0xff] %v1163_v20  ;;  %v1016_v27 = vpop.f32.mrb[23].mxu1  ;;  %v680_v29 = vadd.f32 %v1014_v22, %v1353_v50  ;;  %v969_v30 = vadd.f32 %v968_v26, %v967_v23 }
 0x128   : > { %757 = vst [vmem:[%s1366_s7 + $0xb8] sm:$0xff] %v1165_v25  ;;  %v1017_v31 = vadd.f32 %v1016_v27, %v1015_v24  ;;  %1174 = vtanh.f32 %v616_v28 }
 0x129   : > { %v619_v32 = vadd.f32 %v969_v30, %v1353_v50  ;;  %1176 = vtanh.f32 %v680_v29 }
 0x12a   : > { %v683_v33 = vadd.f32 %v1017_v31, %v1353_v50  ;;  %v1167_v34 = vpop.eup %1166  ;;  %v970_v35 = vpop.f32.mrb[24].mxu0 }
 0x12b   : > { %1178 = vtanh.f32 %v619_v32  ;;  %v1018_v36 = vpop.f32.mrb[24].mxu1  ;;  %v1169_v37 = vpop.eup %1168  ;;  %742 = vst [vmem:[%s1366_s7 + $0x40] sm:$0xff] %v1167_v34 }
 0x12c   : > { %1180 = vtanh.f32 %v683_v33  ;;  %v971_v38 = vpop.f32.mrb[25].mxu0  ;;  %v1019_v39 = vpop.f32.mrb[25].mxu1  ;;  %758 = vst [vmem:[%s1366_s7 + $0xc0] sm:$0xff] %v1169_v37 }
 0x12d   : > { %v1171_v40 = vpop.eup %1170  ;;  %v972_v41 = vadd.f32 %v971_v38, %v970_v35  ;;  %v1020_v42 = vadd.f32 %v1019_v39, %v1018_v36  ;;  %v973_v43 = vpop.f32.mrb[26].mxu0 }
 0x12e   : > { %v1021_v44 = vpop.f32.mrb[26].mxu1  ;;  %v1173_v45 = vpop.eup %1172  ;;  %743 = vst [vmem:[%s1366_s7 + $0x48] sm:$0xff] %v1171_v40 }
 0x12f   : > { %v974_v46 = vpop.f32.mrb[27].mxu0  ;;  %v1022_v47 = vpop.f32.mrb[27].mxu1  ;;  %759 = vst [vmem:[%s1366_s7 + $0xc8] sm:$0xff] %v1173_v45  ;;  %v624_v48 = vadd.f32 %v972_v41, %v1353_v50  ;;  %v688_v49 = vadd.f32 %v1020_v42, %v1353_v50 }
 0x130   : > { %v975_v51 = vadd.f32 %v974_v46, %v973_v43  ;;  %v1023_v52 = vadd.f32 %v1022_v47, %v1021_v44 }
 0x131   : > { %1182 = vtanh.f32 %v624_v48 }
 0x132   : > { %v627_v53 = vadd.f32 %v975_v51, %v1353_v50  ;;  %v691_v54 = vadd.f32 %v1023_v52, %v1353_v50  ;;  %1184 = vtanh.f32 %v688_v49  ;;  %v1175_v55 = vpop.eup %1174  ;;  %v976_v56 = vpop.f32.mrb[28].mxu0 }
 0x133   : > { %v1024_v57 = vpop.f32.mrb[28].mxu1  ;;  %v1177_v58 = vpop.eup %1176  ;;  %744 = vst [vmem:[%s1366_s7 + $0x50] sm:$0xff] %v1175_v55 }
 0x134   : > { %1186 = vtanh.f32 %v627_v53  ;;  %v977_v59 = vpop.f32.mrb[29].mxu0  ;;  %v1025_v60 = vpop.f32.mrb[29].mxu1  ;;  %760 = vst [vmem:[%s1366_s7 + $0xd0] sm:$0xff] %v1177_v58 }
 0x135   : > { %1188 = vtanh.f32 %v691_v54  ;;  %v1179_v61 = vpop.eup %1178  ;;  %v978_v62 = vadd.f32 %v977_v59, %v976_v56  ;;  %v1026_v63 = vadd.f32 %v1025_v60, %v1024_v57  ;;  %v979_v0 = vpop.f32.mrb[30].mxu0 }
 0x136   : > { %v1027_v1 = vpop.f32.mrb[30].mxu1  ;;  %v1181_v2 = vpop.eup %1180  ;;  %745 = vst [vmem:[%s1366_s7 + $0x58] sm:$0xff] %v1179_v61 }
 0x137   : > { %v980_v3 = vpop.f32.mrb[31].mxu0  ;;  %v1028_v4 = vpop.f32.mrb[31].mxu1  ;;  %761 = vst [vmem:[%s1366_s7 + $0xd8] sm:$0xff] %v1181_v2  ;;  %v632_v5 = vadd.f32 %v978_v62, %v1353_v50  ;;  %v696_v6 = vadd.f32 %v1026_v63, %v1353_v50 }
 0x138   : > { %v981_v7 = vadd.f32 %v980_v3, %v979_v0  ;;  %v1029_v8 = vadd.f32 %v1028_v4, %v1027_v1 }
 0x139   : > { %1190 = vtanh.f32 %v632_v5 }
 0x13a   : > { %v635_v9 = vadd.f32 %v981_v7, %v1353_v50  ;;  %v699_v10 = vadd.f32 %v1029_v8, %v1353_v50  ;;  %1192 = vtanh.f32 %v696_v6 }
 0x13b   : > { %v1183_v11 = vpop.eup %1182 }
 0x13c   : > { %1194 = vtanh.f32 %v635_v9  ;;  %v1185_v12 = vpop.eup %1184  ;;  %746 = vst [vmem:[%s1366_s7 + $0x60] sm:$0xff] %v1183_v11 }
 0x13d   : > { %1196 = vtanh.f32 %v699_v10  ;;  %762 = vst [vmem:[%s1366_s7 + $0xe0] sm:$0xff] %v1185_v12 }
 0x13e   : > { %v1187_v13 = vpop.eup %1186 }
 0x13f   : > { %v1189_v14 = vpop.eup %1188  ;;  %747 = vst [vmem:[%s1366_s7 + $0x68] sm:$0xff] %v1187_v13 }
 0x140   : > { %763 = vst [vmem:[%s1366_s7 + $0xe8] sm:$0xff] %v1189_v14 }
 0x143   : > { %v1191_v15 = vpop.eup %1190 }
 0x144   : > { %v1193_v16 = vpop.eup %1192  ;;  %748 = vst [vmem:[%s1366_s7 + $0x70] sm:$0xff] %v1191_v15 }
 0x145   : > { %764 = vst [vmem:[%s1366_s7 + $0xf0] sm:$0xff] %v1193_v16 }
 0x146   : > { %v1195_v17 = vpop.eup %1194 }
 0x147   : > { %v1197_v50 = vpop.eup %1196  ;;  %749 = vst [vmem:[%s1366_s7 + $0x78] sm:$0xff] %v1195_v17 }
 0x148   : > { %765 = vst [vmem:[%s1366_s7 + $0xf8] sm:$0xff] %v1197_v50 }
 0x149 PF: > { %s13_s14 = sadd.s32 1, %s1220_s14   ;;  %s1439_s12 = smov %s1216_s13 }
 0x14a   : > { %p10_p5 = scmp.ge.s32.totalorder %s13_s14, 4   ;;  %s1440_s13 = smov %s1442_s15 }
 0x14c   :  { %12 = sbr.rel (!%p10_p5) target bundleno = 2 (0x2), region = 62 }

</bundles_post_ra>
